<compile_context>
chip_gen: v5e
topology: v5e:2x2
jax: 0.10.0
libtpu: 0.0.40
codegen_flags: <defaults>
</compile_context>

<pallas_src>
import functools
import math

import jax
import jax.numpy as jnp
from jax.experimental import pallas as pl
from jax.experimental.pallas import tpu as pltpu

LN_EPS = 1e-5            # PyTorch nn.LayerNorm default
INV_SQRT2 = 0.7071067811865476

_VMEM = pl.BlockSpec(memory_space=pltpu.MemorySpace.VMEM)


# ----------------------------- in-kernel helpers -----------------------------
def _layernorm(x, g, b):
    mu = jnp.mean(x, axis=-1, keepdims=True)
    var = jnp.mean((x - mu) ** 2, axis=-1, keepdims=True)
    return (x - mu) * jax.lax.rsqrt(var + LN_EPS) * g + b


def _erf(x):
    # Abramowitz & Stegun 7.1.26 polynomial approximation (|err| < 1.5e-7).
    # TODO(synk): nn.GELU() uses exact erf; Mosaic has no erf primitive, so we
    # build it from supported elementwise ops (abs/exp/where) instead.
    a1, a2, a3 = 0.254829592, -0.284496736, 1.421413741
    a4, a5, p = -1.453152027, 1.061405429, 0.3275911
    ax = jnp.abs(x)
    t = 1.0 / (1.0 + p * ax)
    poly = ((((a5 * t + a4) * t + a3) * t + a2) * t + a1) * t
    y = 1.0 - poly * jnp.exp(-ax * ax)
    return jnp.where(x >= 0, y, -y)


def _gelu(x):
    return 0.5 * x * (1.0 + _erf(x * INV_SQRT2))


# --------------------------------- kernel -----------------------------------
def vit_kernel(patches_ref, in_w_ref, in_b_ref, cls_ref, pos_ref,
               ln1g_ref, ln1b_ref, wqkv_ref, bqkv_ref, wo_ref, bo_ref,
               ln2g_ref, ln2b_ref, w1_ref, b1_ref, w2_ref, b2_ref,
               hg_ref, hb_ref, hw_ref, hbias_ref, o_ref,
               *, batch, seq_t, num_heads, num_layers):
    """Entire ViT forward; every operand lives in VMEM, runs once (no grid)."""
    B, T = batch, seq_t
    S = T + 1
    E = in_w_ref.shape[-1]
    hd = E // num_heads
    scale = 1.0 / math.sqrt(hd)

    # ---- patch embedding (one fused matmul over all batches) ----
    pe = (jnp.dot(patches_ref[...], in_w_ref[...],
                  preferred_element_type=jnp.float32)
          + in_b_ref[...])                                   # [B*T, E]

    # ---- prepend CLS token and add positional embedding ----
    cls = cls_ref[...]                                        # [1, E]
    pos = pos_ref[...]                                        # [S, E]
    rows = []
    for b in range(B):                                        # static unroll
        xb = jnp.concatenate([cls, pe[b * T:(b + 1) * T, :]], axis=0) + pos
        rows.append(xb)
    x = jnp.concatenate(rows, axis=0)                         # [B*S, E]
    # nn.Dropout(p=0.0) -> identity (inference semantics)

    # ---- transformer blocks (statically unrolled over layers) ----
    for l in range(num_layers):
        # pre-LN + multi-head self-attention + residual
        xn = _layernorm(x, ln1g_ref[l], ln1b_ref[l])          # [B*S, E]
        qkv = (jnp.dot(xn, wqkv_ref[l], preferred_element_type=jnp.float32)
               + bqkv_ref[l])                                 # [B*S, 3E]
        q_all = qkv[:, :E] * scale                            # scale hoisted
        k_all = qkv[:, E:2 * E]
        v_all = qkv[:, 2 * E:]

        per_batch = []
        for b in range(B):                                    # static unroll
            r0, r1 = b * S, (b + 1) * S
            head_outs = []
            for h in range(num_heads):                        # static unroll
                c0, c1 = h * hd, (h + 1) * hd
                qh = q_all[r0:r1, c0:c1]                      # [S, hd]
                kh = k_all[r0:r1, c0:c1]
                vh = v_all[r0:r1, c0:c1]
                s = jnp.einsum('qd,kd->qk', qh, kh,
                               preferred_element_type=jnp.float32)
                s = s - jnp.max(s, axis=-1, keepdims=True)
                p = jnp.exp(s)
                p = p * pl.reciprocal(jnp.sum(p, axis=-1, keepdims=True),
                                      approx=True)
                head_outs.append(jnp.dot(p, vh,
                                         preferred_element_type=jnp.float32))
            per_batch.append(jnp.concatenate(head_outs, axis=-1))  # [S, E]
        attn = jnp.concatenate(per_batch, axis=0)             # [B*S, E]
        # single output projection on the concatenated heads, bias added once
        x = x + (jnp.dot(attn, wo_ref[l], preferred_element_type=jnp.float32)
                 + bo_ref[l])

        # pre-LN + MLP (Linear -> GELU -> Linear) + residual
        yn = _layernorm(x, ln2g_ref[l], ln2b_ref[l])
        hmid = _gelu(jnp.dot(yn, w1_ref[l],
                             preferred_element_type=jnp.float32) + b1_ref[l])
        x = x + (jnp.dot(hmid, w2_ref[l],
                         preferred_element_type=jnp.float32) + b2_ref[l])

    # ---- classification head on the CLS tokens (rows b*S) ----
    cls_rows = jnp.concatenate([x[b * S:b * S + 1, :] for b in range(B)],
                               axis=0)                        # [B, E]
    y = _layernorm(cls_rows, hg_ref[...], hb_ref[...])
    o_ref[...] = (jnp.dot(y, hw_ref[...], preferred_element_type=jnp.float32)
                  + hbias_ref[...])


# ------------------------------ model (glue) ----------------------------------
def img_to_patch(x, patch_size):
    B, C, H, W = x.shape
    x = x.reshape(B, C, H // patch_size, patch_size, W // patch_size, patch_size)
    x = x.transpose(0, 2, 4, 1, 3, 5)            # [B, H', W', C, p, p]
    x = x.reshape(B, (H // patch_size) * (W // patch_size),
                  C * patch_size * patch_size)   # [B, T, C*p*p]
    return x


def vit_forward(img, packed, *, patch_size, num_heads, num_layers):
    patches = img_to_patch(img, patch_size)      # [B, T, C*p*p]
    B, T, P = patches.shape
    E = packed['in_w'].shape[1]
    C = packed['head_w'].shape[1]
    pos = packed['pos_embedding'][0, :T + 1, :]  # [S, E]

    args = (
        patches.reshape(B * T, P),
        packed['in_w'], packed['in_b'],
        packed['cls_token'], pos,
        packed['ln1_g'], packed['ln1_b'],
        packed['wqkv'], packed['bqkv'],
        packed['wo'], packed['bo'],
        packed['ln2_g'], packed['ln2_b'],
        packed['w1'], packed['b1'],
        packed['w2'], packed['b2'],
        packed['head_ln_g'], packed['head_ln_b'],
        packed['head_w'], packed['head_b'],
    )
    kernel = functools.partial(vit_kernel, batch=B, seq_t=T,
                               num_heads=num_heads, num_layers=num_layers)
    return pl.pallas_call(
        kernel,
        out_shape=jax.ShapeDtypeStruct((B, C), jnp.float32),
        in_specs=[_VMEM] * len(args),
        out_specs=_VMEM,
    )(*args)


def pack_params(params):
    """One-time: pre-transpose weights to [in, out] and stack layers on axis 0."""
    def stack(key, fn):
        return jnp.stack([fn(lp[key]) for lp in params['layers']], axis=0)

    E = params['in_w'].shape[0]
    return {
        'in_w': params['in_w'].T,                         # [P, E]
        'in_b': params['in_b'].reshape(1, -1),
        'cls_token': params['cls_token'].reshape(1, E),
        'pos_embedding': params['pos_embedding'],         # [1, 1+N, E]
        'head_ln_g': params['head_ln_g'].reshape(1, -1),
        'head_ln_b': params['head_ln_b'].reshape(1, -1),
        'head_w': params['head_w'].T,                     # [E, num_classes]
        'head_b': params['head_b'].reshape(1, -1),
        'ln1_g': stack('ln1_g', lambda a: a.reshape(1, -1)),
        'ln1_b': stack('ln1_b', lambda a: a.reshape(1, -1)),
        'wqkv': stack('in_proj_w', lambda a: a.T),        # [L, E, 3E]
        'bqkv': stack('in_proj_b', lambda a: a.reshape(1, -1)),
        'wo': stack('out_proj_w', lambda a: a.T),         # [L, E, E]
        'bo': stack('out_proj_b', lambda a: a.reshape(1, -1)),
        'ln2_g': stack('ln2_g', lambda a: a.reshape(1, -1)),
        'ln2_b': stack('ln2_b', lambda a: a.reshape(1, -1)),
        'w1': stack('fc1_w', lambda a: a.T),              # [L, E, H]
        'b1': stack('fc1_b', lambda a: a.reshape(1, -1)),
        'w2': stack('fc2_w', lambda a: a.T),              # [L, H, E]
        'b2': stack('fc2_b', lambda a: a.reshape(1, -1)),
    }


def init_params(key, *, embed_dim, hidden_dim, num_channels, num_layers,
                num_classes, patch_size, num_patches):
    """Parameters in PyTorch layout (weights [out, in]); packed once later."""
    P = num_channels * patch_size ** 2
    ks = iter(jax.random.split(key, 8 + 12 * num_layers))

    def nrm(shape, scale=0.05):
        return scale * jax.random.normal(next(ks), shape, dtype=jnp.float32)

    params = {
        'in_w': nrm((embed_dim, P)),
        'in_b': nrm((embed_dim,), 0.01),
        'cls_token': nrm((1, 1, embed_dim), 1.0),
        'pos_embedding': nrm((1, 1 + num_patches, embed_dim), 1.0),
        'head_ln_g': jnp.ones((embed_dim,), jnp.float32),
        'head_ln_b': jnp.zeros((embed_dim,), jnp.float32),
        'head_w': nrm((num_classes, embed_dim)),
        'head_b': nrm((num_classes,), 0.01),
        'layers': [],
    }
    for _ in range(num_layers):
        params['layers'].append({
            'ln1_g': jnp.ones((embed_dim,), jnp.float32),
            'ln1_b': jnp.zeros((embed_dim,), jnp.float32),
            'in_proj_w': nrm((3 * embed_dim, embed_dim)),
            'in_proj_b': nrm((3 * embed_dim,), 0.01),
            'out_proj_w': nrm((embed_dim, embed_dim)),
            'out_proj_b': nrm((embed_dim,), 0.01),
            'ln2_g': jnp.ones((embed_dim,), jnp.float32),
            'ln2_b': jnp.zeros((embed_dim,), jnp.float32),
            'fc1_w': nrm((hidden_dim, embed_dim)),
            'fc1_b': nrm((hidden_dim,), 0.01),
            'fc2_w': nrm((embed_dim, hidden_dim)),
            'fc2_b': nrm((embed_dim,), 0.01),
        })
    return params


if __name__ == "__main__":
    EMBED_DIM, HIDDEN_DIM = 32, 64
    NUM_CHANNELS, NUM_HEADS, NUM_LAYERS = 4, 4, 2
    NUM_CLASSES, PATCH_SIZE, IMG = 10, 4, 16
    NUM_PATCHES = (IMG // PATCH_SIZE) ** 2       # 16 patches -> seq len 17

    key = jax.random.PRNGKey(0)
    pkey, xkey = jax.random.split(key)
    params = init_params(pkey, embed_dim=EMBED_DIM, hidden_dim=HIDDEN_DIM,
                         num_channels=NUM_CHANNELS, num_layers=NUM_LAYERS,
                         num_classes=NUM_CLASSES, patch_size=PATCH_SIZE,
                         num_patches=NUM_PATCHES)
    packed = pack_params(params)                 # one-time transpose/stack

    x = jax.random.normal(xkey, (2, NUM_CHANNELS, IMG, IMG), dtype=jnp.float32)

    forward = jax.jit(functools.partial(vit_forward, patch_size=PATCH_SIZE,
                                        num_heads=NUM_HEADS,
                                        num_layers=NUM_LAYERS))
    out = forward(x, packed)
    out = jax.block_until_ready(out)
    assert out.shape == (2, NUM_CLASSES)
    assert bool(jnp.isfinite(out).all())
    print("KERNEL_OK")
</pallas_src>

<mosaic_0001>
module attributes {stable_mosaic.version = 11 : i64} {
  func.func @vit_kernel(%arg0: memref<32x64xf32, #tpu.memory_space<vmem>>, %arg1: memref<64x32xf32, #tpu.memory_space<vmem>>, %arg2: memref<1x32xf32, #tpu.memory_space<vmem>>, %arg3: memref<1x32xf32, #tpu.memory_space<vmem>>, %arg4: memref<17x32xf32, #tpu.memory_space<vmem>>, %arg5: memref<2x1x32xf32, #tpu.memory_space<vmem>>, %arg6: memref<2x1x32xf32, #tpu.memory_space<vmem>>, %arg7: memref<2x32x96xf32, #tpu.memory_space<vmem>>, %arg8: memref<2x1x96xf32, #tpu.memory_space<vmem>>, %arg9: memref<2x32x32xf32, #tpu.memory_space<vmem>>, %arg10: memref<2x1x32xf32, #tpu.memory_space<vmem>>, %arg11: memref<2x1x32xf32, #tpu.memory_space<vmem>>, %arg12: memref<2x1x32xf32, #tpu.memory_space<vmem>>, %arg13: memref<2x32x64xf32, #tpu.memory_space<vmem>>, %arg14: memref<2x1x64xf32, #tpu.memory_space<vmem>>, %arg15: memref<2x64x32xf32, #tpu.memory_space<vmem>>, %arg16: memref<2x1x32xf32, #tpu.memory_space<vmem>>, %arg17: memref<1x32xf32, #tpu.memory_space<vmem>>, %arg18: memref<1x32xf32, #tpu.memory_space<vmem>>, %arg19: memref<32x10xf32, #tpu.memory_space<vmem>>, %arg20: memref<1x10xf32, #tpu.memory_space<vmem>>, %arg21: memref<2x10xf32, #tpu.memory_space<vmem>>) attributes {dimension_semantics = [], scalar_prefetch = 0 : i64, scratch_operands = 0 : i64, tpu.core_type = #tpu.core_type<tc>} {
    %c0 = arith.constant 0 : index
    %c0_0 = arith.constant 0 : index
    %0 = vector.load %arg0[%c0, %c0_0] : memref<32x64xf32, #tpu.memory_space<vmem>>, vector<32x64xf32>
    %c0_1 = arith.constant 0 : index
    %c0_2 = arith.constant 0 : index
    %1 = vector.load %arg1[%c0_1, %c0_2] : memref<64x32xf32, #tpu.memory_space<vmem>>, vector<64x32xf32>
    %cst = arith.constant dense<0.000000e+00> : vector<32x32xf32>
    %2 = tpu.matmul %0, %1, %cst {dimension_numbers = #tpu.dot_dimension_numbers<[1], [0], [0], [1], [0, 0, 1, 1], [], []>} : vector<32x64xf32>, vector<64x32xf32>, vector<32x32xf32> -> vector<32x32xf32>
    %c0_3 = arith.constant 0 : index
    %c0_4 = arith.constant 0 : index
    %3 = vector.load %arg2[%c0_3, %c0_4] : memref<1x32xf32, #tpu.memory_space<vmem>>, vector<1x32xf32>
    %4 = vector.broadcast %3 : vector<1x32xf32> to vector<32x32xf32>
    %5 = arith.addf %2, %4 : vector<32x32xf32>
    %c0_5 = arith.constant 0 : index
    %c0_6 = arith.constant 0 : index
    %6 = vector.load %arg3[%c0_5, %c0_6] : memref<1x32xf32, #tpu.memory_space<vmem>>, vector<1x32xf32>
    %c0_7 = arith.constant 0 : index
    %c0_8 = arith.constant 0 : index
    %7 = vector.load %arg4[%c0_7, %c0_8] : memref<17x32xf32, #tpu.memory_space<vmem>>, vector<17x32xf32>
    %8 = vector.extract_strided_slice %5 {offsets = [0, 0], sizes = [16, 32], strides = [1, 1]} : vector<32x32xf32> to vector<16x32xf32>
    %9 = tpu.concatenate %6, %8 in 0 : vector<1x32xf32>, vector<16x32xf32> -> vector<17x32xf32>
    %10 = arith.addf %9, %7 : vector<17x32xf32>
    %11 = vector.extract_strided_slice %5 {offsets = [16, 0], sizes = [16, 32], strides = [1, 1]} : vector<32x32xf32> to vector<16x32xf32>
    %12 = tpu.concatenate %6, %11 in 0 : vector<1x32xf32>, vector<16x32xf32> -> vector<17x32xf32>
    %13 = arith.addf %12, %7 : vector<17x32xf32>
    %14 = tpu.concatenate %10, %13 in 0 : vector<17x32xf32>, vector<17x32xf32> -> vector<34x32xf32>
    %c0_9 = arith.constant 0 : index
    %c0_10 = arith.constant 0 : index
    %c0_11 = arith.constant 0 : index
    %15 = vector.load %arg5[%c0_9, %c0_10, %c0_11] : memref<2x1x32xf32, #tpu.memory_space<vmem>>, vector<1x1x32xf32>
    %16 = vector.shape_cast %15 : vector<1x1x32xf32> to vector<1x32xf32>
    %c0_12 = arith.constant 0 : index
    %c0_13 = arith.constant 0 : index
    %c0_14 = arith.constant 0 : index
    %17 = vector.load %arg6[%c0_12, %c0_13, %c0_14] : memref<2x1x32xf32, #tpu.memory_space<vmem>>, vector<1x1x32xf32>
    %18 = vector.shape_cast %17 : vector<1x1x32xf32> to vector<1x32xf32>
    %cst_15 = arith.constant dense<0.000000e+00> : vector<34xf32>
    %19 = vector.multi_reduction <add>, %14, %cst_15 [1] : vector<34x32xf32> to vector<34xf32>
    %20 = vector.shape_cast %19 : vector<34xf32> to vector<34x1xf32>
    %cst_16 = arith.constant 3.200000e+01 : f32
    %21 = vector.broadcast %cst_16 : f32 to vector<34x1xf32>
    %22 = arith.divf %20, %21 : vector<34x1xf32>
    %23 = vector.broadcast %22 : vector<34x1xf32> to vector<34x32xf32>
    %24 = arith.subf %14, %23 : vector<34x32xf32>
    %25 = arith.mulf %24, %24 : vector<34x32xf32>
    %cst_17 = arith.constant dense<0.000000e+00> : vector<34xf32>
    %26 = vector.multi_reduction <add>, %25, %cst_17 [1] : vector<34x32xf32> to vector<34xf32>
    %27 = vector.shape_cast %26 : vector<34xf32> to vector<34x1xf32>
    %cst_18 = arith.constant 3.200000e+01 : f32
    %28 = vector.broadcast %cst_18 : f32 to vector<34x1xf32>
    %29 = arith.divf %27, %28 : vector<34x1xf32>
    %30 = vector.broadcast %22 : vector<34x1xf32> to vector<34x32xf32>
    %31 = arith.subf %14, %30 : vector<34x32xf32>
    %cst_19 = arith.constant 9.99999974E-6 : f32
    %32 = vector.broadcast %cst_19 : f32 to vector<34x1xf32>
    %33 = arith.addf %29, %32 : vector<34x1xf32>
    %34 = math.rsqrt %33 : vector<34x1xf32>
    %35 = vector.broadcast %34 : vector<34x1xf32> to vector<34x32xf32>
    %36 = arith.mulf %31, %35 : vector<34x32xf32>
    %37 = vector.broadcast %16 : vector<1x32xf32> to vector<34x32xf32>
    %38 = arith.mulf %36, %37 : vector<34x32xf32>
    %39 = vector.broadcast %18 : vector<1x32xf32> to vector<34x32xf32>
    %40 = arith.addf %38, %39 : vector<34x32xf32>
    %c0_20 = arith.constant 0 : index
    %c0_21 = arith.constant 0 : index
    %c0_22 = arith.constant 0 : index
    %41 = vector.load %arg7[%c0_20, %c0_21, %c0_22] : memref<2x32x96xf32, #tpu.memory_space<vmem>>, vector<1x32x96xf32>
    %42 = vector.shape_cast %41 : vector<1x32x96xf32> to vector<32x96xf32>
    %cst_23 = arith.constant dense<0.000000e+00> : vector<34x96xf32>
    %43 = tpu.matmul %40, %42, %cst_23 {dimension_numbers = #tpu.dot_dimension_numbers<[1], [0], [0], [1], [0, 0, 1, 1], [], []>} : vector<34x32xf32>, vector<32x96xf32>, vector<34x96xf32> -> vector<34x96xf32>
    %c0_24 = arith.constant 0 : index
    %c0_25 = arith.constant 0 : index
    %c0_26 = arith.constant 0 : index
    %44 = vector.load %arg8[%c0_24, %c0_25, %c0_26] : memref<2x1x96xf32, #tpu.memory_space<vmem>>, vector<1x1x96xf32>
    %45 = vector.shape_cast %44 : vector<1x1x96xf32> to vector<1x96xf32>
    %46 = vector.broadcast %45 : vector<1x96xf32> to vector<34x96xf32>
    %47 = arith.addf %43, %46 : vector<34x96xf32>
    %48 = vector.extract_strided_slice %47 {offsets = [0, 0], sizes = [34, 32], strides = [1, 1]} : vector<34x96xf32> to vector<34x32xf32>
    %cst_27 = arith.constant 0.353553385 : f32
    %49 = vector.broadcast %cst_27 : f32 to vector<34x32xf32>
    %50 = arith.mulf %48, %49 : vector<34x32xf32>
    %51 = vector.extract_strided_slice %47 {offsets = [0, 32], sizes = [34, 32], strides = [1, 1]} : vector<34x96xf32> to vector<34x32xf32>
    %52 = vector.extract_strided_slice %47 {offsets = [0, 64], sizes = [34, 32], strides = [1, 1]} : vector<34x96xf32> to vector<34x32xf32>
    %53 = vector.extract_strided_slice %50 {offsets = [0, 0], sizes = [17, 8], strides = [1, 1]} : vector<34x32xf32> to vector<17x8xf32>
    %54 = vector.extract_strided_slice %51 {offsets = [0, 0], sizes = [17, 8], strides = [1, 1]} : vector<34x32xf32> to vector<17x8xf32>
    %55 = vector.extract_strided_slice %52 {offsets = [0, 0], sizes = [17, 8], strides = [1, 1]} : vector<34x32xf32> to vector<17x8xf32>
    "tpu.trace_start"() <{level = 10 : i32, message = "qd,kd->qk"}> : () -> ()
    %cst_28 = arith.constant dense<0.000000e+00> : vector<17x17xf32>
    %56 = tpu.matmul %53, %54, %cst_28 {dimension_numbers = #tpu.dot_dimension_numbers<[1], [1], [0], [0], [0, 0, 1, 0], [], []>} : vector<17x8xf32>, vector<17x8xf32>, vector<17x17xf32> -> vector<17x17xf32>
    "tpu.trace_stop"() : () -> ()
    %cst_29 = arith.constant dense<0xFF800000> : vector<17xf32>
    %57 = vector.multi_reduction <maximumf>, %56, %cst_29 [1] : vector<17x17xf32> to vector<17xf32>
    %58 = vector.shape_cast %57 : vector<17xf32> to vector<17x1xf32>
    %59 = vector.broadcast %58 : vector<17x1xf32> to vector<17x17xf32>
    %60 = arith.subf %56, %59 : vector<17x17xf32>
    %61 = math.exp %60 : vector<17x17xf32>
    %cst_30 = arith.constant dense<0.000000e+00> : vector<17xf32>
    %62 = vector.multi_reduction <add>, %61, %cst_30 [1] : vector<17x17xf32> to vector<17xf32>
    %63 = vector.shape_cast %62 : vector<17xf32> to vector<17x1xf32>
    %64 = tpu.reciprocal %63 {approx = true} : vector<17x1xf32> -> vector<17x1xf32>
    %65 = vector.broadcast %64 : vector<17x1xf32> to vector<17x17xf32>
    %66 = arith.mulf %61, %65 : vector<17x17xf32>
    %cst_31 = arith.constant dense<0.000000e+00> : vector<17x8xf32>
    %67 = tpu.matmul %66, %55, %cst_31 {dimension_numbers = #tpu.dot_dimension_numbers<[1], [0], [0], [1], [0, 0, 1, 1], [], []>} : vector<17x17xf32>, vector<17x8xf32>, vector<17x8xf32> -> vector<17x8xf32>
    %68 = vector.extract_strided_slice %50 {offsets = [0, 8], sizes = [17, 8], strides = [1, 1]} : vector<34x32xf32> to vector<17x8xf32>
    %69 = vector.extract_strided_slice %51 {offsets = [0, 8], sizes = [17, 8], strides = [1, 1]} : vector<34x32xf32> to vector<17x8xf32>
    %70 = vector.extract_strided_slice %52 {offsets = [0, 8], sizes = [17, 8], strides = [1, 1]} : vector<34x32xf32> to vector<17x8xf32>
    "tpu.trace_start"() <{level = 10 : i32, message = "qd,kd->qk"}> : () -> ()
    %cst_32 = arith.constant dense<0.000000e+00> : vector<17x17xf32>
    %71 = tpu.matmul %68, %69, %cst_32 {dimension_numbers = #tpu.dot_dimension_numbers<[1], [1], [0], [0], [0, 0, 1, 0], [], []>} : vector<17x8xf32>, vector<17x8xf32>, vector<17x17xf32> -> vector<17x17xf32>
    "tpu.trace_stop"() : () -> ()
    %cst_33 = arith.constant dense<0xFF800000> : vector<17xf32>
    %72 = vector.multi_reduction <maximumf>, %71, %cst_33 [1] : vector<17x17xf32> to vector<17xf32>
    %73 = vector.shape_cast %72 : vector<17xf32> to vector<17x1xf32>
    %74 = vector.broadcast %73 : vector<17x1xf32> to vector<17x17xf32>
    %75 = arith.subf %71, %74 : vector<17x17xf32>
    %76 = math.exp %75 : vector<17x17xf32>
    %cst_34 = arith.constant dense<0.000000e+00> : vector<17xf32>
    %77 = vector.multi_reduction <add>, %76, %cst_34 [1] : vector<17x17xf32> to vector<17xf32>
    %78 = vector.shape_cast %77 : vector<17xf32> to vector<17x1xf32>
    %79 = tpu.reciprocal %78 {approx = true} : vector<17x1xf32> -> vector<17x1xf32>
    %80 = vector.broadcast %79 : vector<17x1xf32> to vector<17x17xf32>
    %81 = arith.mulf %76, %80 : vector<17x17xf32>
    %cst_35 = arith.constant dense<0.000000e+00> : vector<17x8xf32>
    %82 = tpu.matmul %81, %70, %cst_35 {dimension_numbers = #tpu.dot_dimension_numbers<[1], [0], [0], [1], [0, 0, 1, 1], [], []>} : vector<17x17xf32>, vector<17x8xf32>, vector<17x8xf32> -> vector<17x8xf32>
    %83 = vector.extract_strided_slice %50 {offsets = [0, 16], sizes = [17, 8], strides = [1, 1]} : vector<34x32xf32> to vector<17x8xf32>
    %84 = vector.extract_strided_slice %51 {offsets = [0, 16], sizes = [17, 8], strides = [1, 1]} : vector<34x32xf32> to vector<17x8xf32>
    %85 = vector.extract_strided_slice %52 {offsets = [0, 16], sizes = [17, 8], strides = [1, 1]} : vector<34x32xf32> to vector<17x8xf32>
    "tpu.trace_start"() <{level = 10 : i32, message = "qd,kd->qk"}> : () -> ()
    %cst_36 = arith.constant dense<0.000000e+00> : vector<17x17xf32>
    %86 = tpu.matmul %83, %84, %cst_36 {dimension_numbers = #tpu.dot_dimension_numbers<[1], [1], [0], [0], [0, 0, 1, 0], [], []>} : vector<17x8xf32>, vector<17x8xf32>, vector<17x17xf32> -> vector<17x17xf32>
    "tpu.trace_stop"() : () -> ()
    %cst_37 = arith.constant dense<0xFF800000> : vector<17xf32>
    %87 = vector.multi_reduction <maximumf>, %86, %cst_37 [1] : vector<17x17xf32> to vector<17xf32>
    %88 = vector.shape_cast %87 : vector<17xf32> to vector<17x1xf32>
    %89 = vector.broadcast %88 : vector<17x1xf32> to vector<17x17xf32>
    %90 = arith.subf %86, %89 : vector<17x17xf32>
    %91 = math.exp %90 : vector<17x17xf32>
    %cst_38 = arith.constant dense<0.000000e+00> : vector<17xf32>
    %92 = vector.multi_reduction <add>, %91, %cst_38 [1] : vector<17x17xf32> to vector<17xf32>
    %93 = vector.shape_cast %92 : vector<17xf32> to vector<17x1xf32>
    %94 = tpu.reciprocal %93 {approx = true} : vector<17x1xf32> -> vector<17x1xf32>
    %95 = vector.broadcast %94 : vector<17x1xf32> to vector<17x17xf32>
    %96 = arith.mulf %91, %95 : vector<17x17xf32>
    %cst_39 = arith.constant dense<0.000000e+00> : vector<17x8xf32>
    %97 = tpu.matmul %96, %85, %cst_39 {dimension_numbers = #tpu.dot_dimension_numbers<[1], [0], [0], [1], [0, 0, 1, 1], [], []>} : vector<17x17xf32>, vector<17x8xf32>, vector<17x8xf32> -> vector<17x8xf32>
    %98 = vector.extract_strided_slice %50 {offsets = [0, 24], sizes = [17, 8], strides = [1, 1]} : vector<34x32xf32> to vector<17x8xf32>
    %99 = vector.extract_strided_slice %51 {offsets = [0, 24], sizes = [17, 8], strides = [1, 1]} : vector<34x32xf32> to vector<17x8xf32>
    %100 = vector.extract_strided_slice %52 {offsets = [0, 24], sizes = [17, 8], strides = [1, 1]} : vector<34x32xf32> to vector<17x8xf32>
    "tpu.trace_start"() <{level = 10 : i32, message = "qd,kd->qk"}> : () -> ()
    %cst_40 = arith.constant dense<0.000000e+00> : vector<17x17xf32>
    %101 = tpu.matmul %98, %99, %cst_40 {dimension_numbers = #tpu.dot_dimension_numbers<[1], [1], [0], [0], [0, 0, 1, 0], [], []>} : vector<17x8xf32>, vector<17x8xf32>, vector<17x17xf32> -> vector<17x17xf32>
    "tpu.trace_stop"() : () -> ()
    %cst_41 = arith.constant dense<0xFF800000> : vector<17xf32>
    %102 = vector.multi_reduction <maximumf>, %101, %cst_41 [1] : vector<17x17xf32> to vector<17xf32>
    %103 = vector.shape_cast %102 : vector<17xf32> to vector<17x1xf32>
    %104 = vector.broadcast %103 : vector<17x1xf32> to vector<17x17xf32>
    %105 = arith.subf %101, %104 : vector<17x17xf32>
    %106 = math.exp %105 : vector<17x17xf32>
    %cst_42 = arith.constant dense<0.000000e+00> : vector<17xf32>
    %107 = vector.multi_reduction <add>, %106, %cst_42 [1] : vector<17x17xf32> to vector<17xf32>
    %108 = vector.shape_cast %107 : vector<17xf32> to vector<17x1xf32>
    %109 = tpu.reciprocal %108 {approx = true} : vector<17x1xf32> -> vector<17x1xf32>
    %110 = vector.broadcast %109 : vector<17x1xf32> to vector<17x17xf32>
    %111 = arith.mulf %106, %110 : vector<17x17xf32>
    %cst_43 = arith.constant dense<0.000000e+00> : vector<17x8xf32>
    %112 = tpu.matmul %111, %100, %cst_43 {dimension_numbers = #tpu.dot_dimension_numbers<[1], [0], [0], [1], [0, 0, 1, 1], [], []>} : vector<17x17xf32>, vector<17x8xf32>, vector<17x8xf32> -> vector<17x8xf32>
    %113 = tpu.concatenate %67, %82, %97, %112 in 1 : vector<17x8xf32>, vector<17x8xf32>, vector<17x8xf32>, vector<17x8xf32> -> vector<17x32xf32>
    %114 = vector.extract_strided_slice %50 {offsets = [17, 0], sizes = [17, 8], strides = [1, 1]} : vector<34x32xf32> to vector<17x8xf32>
    %115 = vector.extract_strided_slice %51 {offsets = [17, 0], sizes = [17, 8], strides = [1, 1]} : vector<34x32xf32> to vector<17x8xf32>
    %116 = vector.extract_strided_slice %52 {offsets = [17, 0], sizes = [17, 8], strides = [1, 1]} : vector<34x32xf32> to vector<17x8xf32>
    "tpu.trace_start"() <{level = 10 : i32, message = "qd,kd->qk"}> : () -> ()
    %cst_44 = arith.constant dense<0.000000e+00> : vector<17x17xf32>
    %117 = tpu.matmul %114, %115, %cst_44 {dimension_numbers = #tpu.dot_dimension_numbers<[1], [1], [0], [0], [0, 0, 1, 0], [], []>} : vector<17x8xf32>, vector<17x8xf32>, vector<17x17xf32> -> vector<17x17xf32>
    "tpu.trace_stop"() : () -> ()
    %cst_45 = arith.constant dense<0xFF800000> : vector<17xf32>
    %118 = vector.multi_reduction <maximumf>, %117, %cst_45 [1] : vector<17x17xf32> to vector<17xf32>
    %119 = vector.shape_cast %118 : vector<17xf32> to vector<17x1xf32>
    %120 = vector.broadcast %119 : vector<17x1xf32> to vector<17x17xf32>
    %121 = arith.subf %117, %120 : vector<17x17xf32>
    %122 = math.exp %121 : vector<17x17xf32>
    %cst_46 = arith.constant dense<0.000000e+00> : vector<17xf32>
    %123 = vector.multi_reduction <add>, %122, %cst_46 [1] : vector<17x17xf32> to vector<17xf32>
    %124 = vector.shape_cast %123 : vector<17xf32> to vector<17x1xf32>
    %125 = tpu.reciprocal %124 {approx = true} : vector<17x1xf32> -> vector<17x1xf32>
    %126 = vector.broadcast %125 : vector<17x1xf32> to vector<17x17xf32>
    %127 = arith.mulf %122, %126 : vector<17x17xf32>
    %cst_47 = arith.constant dense<0.000000e+00> : vector<17x8xf32>
    %128 = tpu.matmul %127, %116, %cst_47 {dimension_numbers = #tpu.dot_dimension_numbers<[1], [0], [0], [1], [0, 0, 1, 1], [], []>} : vector<17x17xf32>, vector<17x8xf32>, vector<17x8xf32> -> vector<17x8xf32>
    %129 = vector.extract_strided_slice %50 {offsets = [17, 8], sizes = [17, 8], strides = [1, 1]} : vector<34x32xf32> to vector<17x8xf32>
    %130 = vector.extract_strided_slice %51 {offsets = [17, 8], sizes = [17, 8], strides = [1, 1]} : vector<34x32xf32> to vector<17x8xf32>
    %131 = vector.extract_strided_slice %52 {offsets = [17, 8], sizes = [17, 8], strides = [1, 1]} : vector<34x32xf32> to vector<17x8xf32>
    "tpu.trace_start"() <{level = 10 : i32, message = "qd,kd->qk"}> : () -> ()
    %cst_48 = arith.constant dense<0.000000e+00> : vector<17x17xf32>
    %132 = tpu.matmul %129, %130, %cst_48 {dimension_numbers = #tpu.dot_dimension_numbers<[1], [1], [0], [0], [0, 0, 1, 0], [], []>} : vector<17x8xf32>, vector<17x8xf32>, vector<17x17xf32> -> vector<17x17xf32>
    "tpu.trace_stop"() : () -> ()
    %cst_49 = arith.constant dense<0xFF800000> : vector<17xf32>
    %133 = vector.multi_reduction <maximumf>, %132, %cst_49 [1] : vector<17x17xf32> to vector<17xf32>
    %134 = vector.shape_cast %133 : vector<17xf32> to vector<17x1xf32>
    %135 = vector.broadcast %134 : vector<17x1xf32> to vector<17x17xf32>
    %136 = arith.subf %132, %135 : vector<17x17xf32>
    %137 = math.exp %136 : vector<17x17xf32>
    %cst_50 = arith.constant dense<0.000000e+00> : vector<17xf32>
    %138 = vector.multi_reduction <add>, %137, %cst_50 [1] : vector<17x17xf32> to vector<17xf32>
    %139 = vector.shape_cast %138 : vector<17xf32> to vector<17x1xf32>
    %140 = tpu.reciprocal %139 {approx = true} : vector<17x1xf32> -> vector<17x1xf32>
    %141 = vector.broadcast %140 : vector<17x1xf32> to vector<17x17xf32>
    %142 = arith.mulf %137, %141 : vector<17x17xf32>
    %cst_51 = arith.constant dense<0.000000e+00> : vector<17x8xf32>
    %143 = tpu.matmul %142, %131, %cst_51 {dimension_numbers = #tpu.dot_dimension_numbers<[1], [0], [0], [1], [0, 0, 1, 1], [], []>} : vector<17x17xf32>, vector<17x8xf32>, vector<17x8xf32> -> vector<17x8xf32>
    %144 = vector.extract_strided_slice %50 {offsets = [17, 16], sizes = [17, 8], strides = [1, 1]} : vector<34x32xf32> to vector<17x8xf32>
    %145 = vector.extract_strided_slice %51 {offsets = [17, 16], sizes = [17, 8], strides = [1, 1]} : vector<34x32xf32> to vector<17x8xf32>
    %146 = vector.extract_strided_slice %52 {offsets = [17, 16], sizes = [17, 8], strides = [1, 1]} : vector<34x32xf32> to vector<17x8xf32>
    "tpu.trace_start"() <{level = 10 : i32, message = "qd,kd->qk"}> : () -> ()
    %cst_52 = arith.constant dense<0.000000e+00> : vector<17x17xf32>
    %147 = tpu.matmul %144, %145, %cst_52 {dimension_numbers = #tpu.dot_dimension_numbers<[1], [1], [0], [0], [0, 0, 1, 0], [], []>} : vector<17x8xf32>, vector<17x8xf32>, vector<17x17xf32> -> vector<17x17xf32>
    "tpu.trace_stop"() : () -> ()
    %cst_53 = arith.constant dense<0xFF800000> : vector<17xf32>
    %148 = vector.multi_reduction <maximumf>, %147, %cst_53 [1] : vector<17x17xf32> to vector<17xf32>
    %149 = vector.shape_cast %148 : vector<17xf32> to vector<17x1xf32>
    %150 = vector.broadcast %149 : vector<17x1xf32> to vector<17x17xf32>
    %151 = arith.subf %147, %150 : vector<17x17xf32>
    %152 = math.exp %151 : vector<17x17xf32>
    %cst_54 = arith.constant dense<0.000000e+00> : vector<17xf32>
    %153 = vector.multi_reduction <add>, %152, %cst_54 [1] : vector<17x17xf32> to vector<17xf32>
    %154 = vector.shape_cast %153 : vector<17xf32> to vector<17x1xf32>
    %155 = tpu.reciprocal %154 {approx = true} : vector<17x1xf32> -> vector<17x1xf32>
    %156 = vector.broadcast %155 : vector<17x1xf32> to vector<17x17xf32>
    %157 = arith.mulf %152, %156 : vector<17x17xf32>
    %cst_55 = arith.constant dense<0.000000e+00> : vector<17x8xf32>
    %158 = tpu.matmul %157, %146, %cst_55 {dimension_numbers = #tpu.dot_dimension_numbers<[1], [0], [0], [1], [0, 0, 1, 1], [], []>} : vector<17x17xf32>, vector<17x8xf32>, vector<17x8xf32> -> vector<17x8xf32>
    %159 = vector.extract_strided_slice %50 {offsets = [17, 24], sizes = [17, 8], strides = [1, 1]} : vector<34x32xf32> to vector<17x8xf32>
    %160 = vector.extract_strided_slice %51 {offsets = [17, 24], sizes = [17, 8], strides = [1, 1]} : vector<34x32xf32> to vector<17x8xf32>
    %161 = vector.extract_strided_slice %52 {offsets = [17, 24], sizes = [17, 8], strides = [1, 1]} : vector<34x32xf32> to vector<17x8xf32>
    "tpu.trace_start"() <{level = 10 : i32, message = "qd,kd->qk"}> : () -> ()
    %cst_56 = arith.constant dense<0.000000e+00> : vector<17x17xf32>
    %162 = tpu.matmul %159, %160, %cst_56 {dimension_numbers = #tpu.dot_dimension_numbers<[1], [1], [0], [0], [0, 0, 1, 0], [], []>} : vector<17x8xf32>, vector<17x8xf32>, vector<17x17xf32> -> vector<17x17xf32>
    "tpu.trace_stop"() : () -> ()
    %cst_57 = arith.constant dense<0xFF800000> : vector<17xf32>
    %163 = vector.multi_reduction <maximumf>, %162, %cst_57 [1] : vector<17x17xf32> to vector<17xf32>
    %164 = vector.shape_cast %163 : vector<17xf32> to vector<17x1xf32>
    %165 = vector.broadcast %164 : vector<17x1xf32> to vector<17x17xf32>
    %166 = arith.subf %162, %165 : vector<17x17xf32>
    %167 = math.exp %166 : vector<17x17xf32>
    %cst_58 = arith.constant dense<0.000000e+00> : vector<17xf32>
    %168 = vector.multi_reduction <add>, %167, %cst_58 [1] : vector<17x17xf32> to vector<17xf32>
    %169 = vector.shape_cast %168 : vector<17xf32> to vector<17x1xf32>
    %170 = tpu.reciprocal %169 {approx = true} : vector<17x1xf32> -> vector<17x1xf32>
    %171 = vector.broadcast %170 : vector<17x1xf32> to vector<17x17xf32>
    %172 = arith.mulf %167, %171 : vector<17x17xf32>
    %cst_59 = arith.constant dense<0.000000e+00> : vector<17x8xf32>
    %173 = tpu.matmul %172, %161, %cst_59 {dimension_numbers = #tpu.dot_dimension_numbers<[1], [0], [0], [1], [0, 0, 1, 1], [], []>} : vector<17x17xf32>, vector<17x8xf32>, vector<17x8xf32> -> vector<17x8xf32>
    %174 = tpu.concatenate %128, %143, %158, %173 in 1 : vector<17x8xf32>, vector<17x8xf32>, vector<17x8xf32>, vector<17x8xf32> -> vector<17x32xf32>
    %175 = tpu.concatenate %113, %174 in 0 : vector<17x32xf32>, vector<17x32xf32> -> vector<34x32xf32>
    %c0_60 = arith.constant 0 : index
    %c0_61 = arith.constant 0 : index
    %c0_62 = arith.constant 0 : index
    %176 = vector.load %arg9[%c0_60, %c0_61, %c0_62] : memref<2x32x32xf32, #tpu.memory_space<vmem>>, vector<1x32x32xf32>
    %177 = vector.shape_cast %176 : vector<1x32x32xf32> to vector<32x32xf32>
    %cst_63 = arith.constant dense<0.000000e+00> : vector<34x32xf32>
    %178 = tpu.matmul %175, %177, %cst_63 {dimension_numbers = #tpu.dot_dimension_numbers<[1], [0], [0], [1], [0, 0, 1, 1], [], []>} : vector<34x32xf32>, vector<32x32xf32>, vector<34x32xf32> -> vector<34x32xf32>
    %c0_64 = arith.constant 0 : index
    %c0_65 = arith.constant 0 : index
    %c0_66 = arith.constant 0 : index
    %179 = vector.load %arg10[%c0_64, %c0_65, %c0_66] : memref<2x1x32xf32, #tpu.memory_space<vmem>>, vector<1x1x32xf32>
    %180 = vector.shape_cast %179 : vector<1x1x32xf32> to vector<1x32xf32>
    %181 = vector.broadcast %180 : vector<1x32xf32> to vector<34x32xf32>
    %182 = arith.addf %178, %181 : vector<34x32xf32>
    %183 = arith.addf %14, %182 : vector<34x32xf32>
    %c0_67 = arith.constant 0 : index
    %c0_68 = arith.constant 0 : index
    %c0_69 = arith.constant 0 : index
    %184 = vector.load %arg11[%c0_67, %c0_68, %c0_69] : memref<2x1x32xf32, #tpu.memory_space<vmem>>, vector<1x1x32xf32>
    %185 = vector.shape_cast %184 : vector<1x1x32xf32> to vector<1x32xf32>
    %c0_70 = arith.constant 0 : index
    %c0_71 = arith.constant 0 : index
    %c0_72 = arith.constant 0 : index
    %186 = vector.load %arg12[%c0_70, %c0_71, %c0_72] : memref<2x1x32xf32, #tpu.memory_space<vmem>>, vector<1x1x32xf32>
    %187 = vector.shape_cast %186 : vector<1x1x32xf32> to vector<1x32xf32>
    %cst_73 = arith.constant dense<0.000000e+00> : vector<34xf32>
    %188 = vector.multi_reduction <add>, %183, %cst_73 [1] : vector<34x32xf32> to vector<34xf32>
    %189 = vector.shape_cast %188 : vector<34xf32> to vector<34x1xf32>
    %cst_74 = arith.constant 3.200000e+01 : f32
    %190 = vector.broadcast %cst_74 : f32 to vector<34x1xf32>
    %191 = arith.divf %189, %190 : vector<34x1xf32>
    %192 = vector.broadcast %191 : vector<34x1xf32> to vector<34x32xf32>
    %193 = arith.subf %183, %192 : vector<34x32xf32>
    %194 = arith.mulf %193, %193 : vector<34x32xf32>
    %cst_75 = arith.constant dense<0.000000e+00> : vector<34xf32>
    %195 = vector.multi_reduction <add>, %194, %cst_75 [1] : vector<34x32xf32> to vector<34xf32>
    %196 = vector.shape_cast %195 : vector<34xf32> to vector<34x1xf32>
    %cst_76 = arith.constant 3.200000e+01 : f32
    %197 = vector.broadcast %cst_76 : f32 to vector<34x1xf32>
    %198 = arith.divf %196, %197 : vector<34x1xf32>
    %199 = vector.broadcast %191 : vector<34x1xf32> to vector<34x32xf32>
    %200 = arith.subf %183, %199 : vector<34x32xf32>
    %cst_77 = arith.constant 9.99999974E-6 : f32
    %201 = vector.broadcast %cst_77 : f32 to vector<34x1xf32>
    %202 = arith.addf %198, %201 : vector<34x1xf32>
    %203 = math.rsqrt %202 : vector<34x1xf32>
    %204 = vector.broadcast %203 : vector<34x1xf32> to vector<34x32xf32>
    %205 = arith.mulf %200, %204 : vector<34x32xf32>
    %206 = vector.broadcast %185 : vector<1x32xf32> to vector<34x32xf32>
    %207 = arith.mulf %205, %206 : vector<34x32xf32>
    %208 = vector.broadcast %187 : vector<1x32xf32> to vector<34x32xf32>
    %209 = arith.addf %207, %208 : vector<34x32xf32>
    %c0_78 = arith.constant 0 : index
    %c0_79 = arith.constant 0 : index
    %c0_80 = arith.constant 0 : index
    %210 = vector.load %arg13[%c0_78, %c0_79, %c0_80] : memref<2x32x64xf32, #tpu.memory_space<vmem>>, vector<1x32x64xf32>
    %211 = vector.shape_cast %210 : vector<1x32x64xf32> to vector<32x64xf32>
    %cst_81 = arith.constant dense<0.000000e+00> : vector<34x64xf32>
    %212 = tpu.matmul %209, %211, %cst_81 {dimension_numbers = #tpu.dot_dimension_numbers<[1], [0], [0], [1], [0, 0, 1, 1], [], []>} : vector<34x32xf32>, vector<32x64xf32>, vector<34x64xf32> -> vector<34x64xf32>
    %c0_82 = arith.constant 0 : index
    %c0_83 = arith.constant 0 : index
    %c0_84 = arith.constant 0 : index
    %213 = vector.load %arg14[%c0_82, %c0_83, %c0_84] : memref<2x1x64xf32, #tpu.memory_space<vmem>>, vector<1x1x64xf32>
    %214 = vector.shape_cast %213 : vector<1x1x64xf32> to vector<1x64xf32>
    %215 = vector.broadcast %214 : vector<1x64xf32> to vector<34x64xf32>
    %216 = arith.addf %212, %215 : vector<34x64xf32>
    %cst_85 = arith.constant 5.000000e-01 : f32
    %217 = vector.broadcast %cst_85 : f32 to vector<34x64xf32>
    %218 = arith.mulf %217, %216 : vector<34x64xf32>
    %cst_86 = arith.constant 0.707106769 : f32
    %219 = vector.broadcast %cst_86 : f32 to vector<34x64xf32>
    %220 = arith.mulf %216, %219 : vector<34x64xf32>
    %221 = math.absf %220 : vector<34x64xf32>
    %cst_87 = arith.constant 0.327591091 : f32
    %222 = vector.broadcast %cst_87 : f32 to vector<34x64xf32>
    %223 = arith.mulf %222, %221 : vector<34x64xf32>
    %cst_88 = arith.constant 1.000000e+00 : f32
    %224 = vector.broadcast %cst_88 : f32 to vector<34x64xf32>
    %225 = arith.addf %224, %223 : vector<34x64xf32>
    %cst_89 = arith.constant 1.000000e+00 : f32
    %226 = vector.broadcast %cst_89 : f32 to vector<34x64xf32>
    %227 = arith.divf %226, %225 : vector<34x64xf32>
    %cst_90 = arith.constant 1.06140542 : f32
    %228 = vector.broadcast %cst_90 : f32 to vector<34x64xf32>
    %229 = arith.mulf %228, %227 : vector<34x64xf32>
    %cst_91 = arith.constant -1.45315206 : f32
    %230 = vector.broadcast %cst_91 : f32 to vector<34x64xf32>
    %231 = arith.addf %229, %230 : vector<34x64xf32>
    %232 = arith.mulf %231, %227 : vector<34x64xf32>
    %cst_92 = arith.constant 1.42141378 : f32
    %233 = vector.broadcast %cst_92 : f32 to vector<34x64xf32>
    %234 = arith.addf %232, %233 : vector<34x64xf32>
    %235 = arith.mulf %234, %227 : vector<34x64xf32>
    %cst_93 = arith.constant -0.284496725 : f32
    %236 = vector.broadcast %cst_93 : f32 to vector<34x64xf32>
    %237 = arith.addf %235, %236 : vector<34x64xf32>
    %238 = arith.mulf %237, %227 : vector<34x64xf32>
    %cst_94 = arith.constant 0.254829586 : f32
    %239 = vector.broadcast %cst_94 : f32 to vector<34x64xf32>
    %240 = arith.addf %238, %239 : vector<34x64xf32>
    %241 = arith.mulf %240, %227 : vector<34x64xf32>
    %cst_95 = arith.constant 0.000000e+00 : f32
    %242 = vector.broadcast %cst_95 : f32 to vector<34x64xf32>
    %243 = arith.subf %242, %221 : vector<34x64xf32>
    %244 = arith.mulf %243, %221 : vector<34x64xf32>
    %245 = math.exp %244 : vector<34x64xf32>
    %246 = arith.mulf %241, %245 : vector<34x64xf32>
    %cst_96 = arith.constant 1.000000e+00 : f32
    %247 = vector.broadcast %cst_96 : f32 to vector<34x64xf32>
    %248 = arith.subf %247, %246 : vector<34x64xf32>
    %cst_97 = arith.constant 0.000000e+00 : f32
    %249 = vector.broadcast %cst_97 : f32 to vector<34x64xf32>
    %250 = arith.cmpf oge, %220, %249 : vector<34x64xf32>
    %cst_98 = arith.constant 0.000000e+00 : f32
    %251 = vector.broadcast %cst_98 : f32 to vector<34x64xf32>
    %252 = arith.subf %251, %248 : vector<34x64xf32>
    %253 = arith.select %250, %248, %252 : vector<34x64xi1>, vector<34x64xf32>
    %cst_99 = arith.constant 1.000000e+00 : f32
    %254 = vector.broadcast %cst_99 : f32 to vector<34x64xf32>
    %255 = arith.addf %254, %253 : vector<34x64xf32>
    %256 = arith.mulf %218, %255 : vector<34x64xf32>
    %c0_100 = arith.constant 0 : index
    %c0_101 = arith.constant 0 : index
    %c0_102 = arith.constant 0 : index
    %257 = vector.load %arg15[%c0_100, %c0_101, %c0_102] : memref<2x64x32xf32, #tpu.memory_space<vmem>>, vector<1x64x32xf32>
    %258 = vector.shape_cast %257 : vector<1x64x32xf32> to vector<64x32xf32>
    %cst_103 = arith.constant dense<0.000000e+00> : vector<34x32xf32>
    %259 = tpu.matmul %256, %258, %cst_103 {dimension_numbers = #tpu.dot_dimension_numbers<[1], [0], [0], [1], [0, 0, 1, 1], [], []>} : vector<34x64xf32>, vector<64x32xf32>, vector<34x32xf32> -> vector<34x32xf32>
    %c0_104 = arith.constant 0 : index
    %c0_105 = arith.constant 0 : index
    %c0_106 = arith.constant 0 : index
    %260 = vector.load %arg16[%c0_104, %c0_105, %c0_106] : memref<2x1x32xf32, #tpu.memory_space<vmem>>, vector<1x1x32xf32>
    %261 = vector.shape_cast %260 : vector<1x1x32xf32> to vector<1x32xf32>
    %262 = vector.broadcast %261 : vector<1x32xf32> to vector<34x32xf32>
    %263 = arith.addf %259, %262 : vector<34x32xf32>
    %264 = arith.addf %183, %263 : vector<34x32xf32>
    %c1 = arith.constant 1 : index
    %c0_107 = arith.constant 0 : index
    %c0_108 = arith.constant 0 : index
    %265 = vector.load %arg5[%c1, %c0_107, %c0_108] : memref<2x1x32xf32, #tpu.memory_space<vmem>>, vector<1x1x32xf32>
    %266 = vector.shape_cast %265 : vector<1x1x32xf32> to vector<1x32xf32>
    %c1_109 = arith.constant 1 : index
    %c0_110 = arith.constant 0 : index
    %c0_111 = arith.constant 0 : index
    %267 = vector.load %arg6[%c1_109, %c0_110, %c0_111] : memref<2x1x32xf32, #tpu.memory_space<vmem>>, vector<1x1x32xf32>
    %268 = vector.shape_cast %267 : vector<1x1x32xf32> to vector<1x32xf32>
    %cst_112 = arith.constant dense<0.000000e+00> : vector<34xf32>
    %269 = vector.multi_reduction <add>, %264, %cst_112 [1] : vector<34x32xf32> to vector<34xf32>
    %270 = vector.shape_cast %269 : vector<34xf32> to vector<34x1xf32>
    %cst_113 = arith.constant 3.200000e+01 : f32
    %271 = vector.broadcast %cst_113 : f32 to vector<34x1xf32>
    %272 = arith.divf %270, %271 : vector<34x1xf32>
    %273 = vector.broadcast %272 : vector<34x1xf32> to vector<34x32xf32>
    %274 = arith.subf %264, %273 : vector<34x32xf32>
    %275 = arith.mulf %274, %274 : vector<34x32xf32>
    %cst_114 = arith.constant dense<0.000000e+00> : vector<34xf32>
    %276 = vector.multi_reduction <add>, %275, %cst_114 [1] : vector<34x32xf32> to vector<34xf32>
    %277 = vector.shape_cast %276 : vector<34xf32> to vector<34x1xf32>
    %cst_115 = arith.constant 3.200000e+01 : f32
    %278 = vector.broadcast %cst_115 : f32 to vector<34x1xf32>
    %279 = arith.divf %277, %278 : vector<34x1xf32>
    %280 = vector.broadcast %272 : vector<34x1xf32> to vector<34x32xf32>
    %281 = arith.subf %264, %280 : vector<34x32xf32>
    %cst_116 = arith.constant 9.99999974E-6 : f32
    %282 = vector.broadcast %cst_116 : f32 to vector<34x1xf32>
    %283 = arith.addf %279, %282 : vector<34x1xf32>
    %284 = math.rsqrt %283 : vector<34x1xf32>
    %285 = vector.broadcast %284 : vector<34x1xf32> to vector<34x32xf32>
    %286 = arith.mulf %281, %285 : vector<34x32xf32>
    %287 = vector.broadcast %266 : vector<1x32xf32> to vector<34x32xf32>
    %288 = arith.mulf %286, %287 : vector<34x32xf32>
    %289 = vector.broadcast %268 : vector<1x32xf32> to vector<34x32xf32>
    %290 = arith.addf %288, %289 : vector<34x32xf32>
    %c1_117 = arith.constant 1 : index
    %c0_118 = arith.constant 0 : index
    %c0_119 = arith.constant 0 : index
    %291 = vector.load %arg7[%c1_117, %c0_118, %c0_119] : memref<2x32x96xf32, #tpu.memory_space<vmem>>, vector<1x32x96xf32>
    %292 = vector.shape_cast %291 : vector<1x32x96xf32> to vector<32x96xf32>
    %cst_120 = arith.constant dense<0.000000e+00> : vector<34x96xf32>
    %293 = tpu.matmul %290, %292, %cst_120 {dimension_numbers = #tpu.dot_dimension_numbers<[1], [0], [0], [1], [0, 0, 1, 1], [], []>} : vector<34x32xf32>, vector<32x96xf32>, vector<34x96xf32> -> vector<34x96xf32>
    %c1_121 = arith.constant 1 : index
    %c0_122 = arith.constant 0 : index
    %c0_123 = arith.constant 0 : index
    %294 = vector.load %arg8[%c1_121, %c0_122, %c0_123] : memref<2x1x96xf32, #tpu.memory_space<vmem>>, vector<1x1x96xf32>
    %295 = vector.shape_cast %294 : vector<1x1x96xf32> to vector<1x96xf32>
    %296 = vector.broadcast %295 : vector<1x96xf32> to vector<34x96xf32>
    %297 = arith.addf %293, %296 : vector<34x96xf32>
    %298 = vector.extract_strided_slice %297 {offsets = [0, 0], sizes = [34, 32], strides = [1, 1]} : vector<34x96xf32> to vector<34x32xf32>
    %cst_124 = arith.constant 0.353553385 : f32
    %299 = vector.broadcast %cst_124 : f32 to vector<34x32xf32>
    %300 = arith.mulf %298, %299 : vector<34x32xf32>
    %301 = vector.extract_strided_slice %297 {offsets = [0, 32], sizes = [34, 32], strides = [1, 1]} : vector<34x96xf32> to vector<34x32xf32>
    %302 = vector.extract_strided_slice %297 {offsets = [0, 64], sizes = [34, 32], strides = [1, 1]} : vector<34x96xf32> to vector<34x32xf32>
    %303 = vector.extract_strided_slice %300 {offsets = [0, 0], sizes = [17, 8], strides = [1, 1]} : vector<34x32xf32> to vector<17x8xf32>
    %304 = vector.extract_strided_slice %301 {offsets = [0, 0], sizes = [17, 8], strides = [1, 1]} : vector<34x32xf32> to vector<17x8xf32>
    %305 = vector.extract_strided_slice %302 {offsets = [0, 0], sizes = [17, 8], strides = [1, 1]} : vector<34x32xf32> to vector<17x8xf32>
    "tpu.trace_start"() <{level = 10 : i32, message = "qd,kd->qk"}> : () -> ()
    %cst_125 = arith.constant dense<0.000000e+00> : vector<17x17xf32>
    %306 = tpu.matmul %303, %304, %cst_125 {dimension_numbers = #tpu.dot_dimension_numbers<[1], [1], [0], [0], [0, 0, 1, 0], [], []>} : vector<17x8xf32>, vector<17x8xf32>, vector<17x17xf32> -> vector<17x17xf32>
    "tpu.trace_stop"() : () -> ()
    %cst_126 = arith.constant dense<0xFF800000> : vector<17xf32>
    %307 = vector.multi_reduction <maximumf>, %306, %cst_126 [1] : vector<17x17xf32> to vector<17xf32>
    %308 = vector.shape_cast %307 : vector<17xf32> to vector<17x1xf32>
    %309 = vector.broadcast %308 : vector<17x1xf32> to vector<17x17xf32>
    %310 = arith.subf %306, %309 : vector<17x17xf32>
    %311 = math.exp %310 : vector<17x17xf32>
    %cst_127 = arith.constant dense<0.000000e+00> : vector<17xf32>
    %312 = vector.multi_reduction <add>, %311, %cst_127 [1] : vector<17x17xf32> to vector<17xf32>
    %313 = vector.shape_cast %312 : vector<17xf32> to vector<17x1xf32>
    %314 = tpu.reciprocal %313 {approx = true} : vector<17x1xf32> -> vector<17x1xf32>
    %315 = vector.broadcast %314 : vector<17x1xf32> to vector<17x17xf32>
    %316 = arith.mulf %311, %315 : vector<17x17xf32>
    %cst_128 = arith.constant dense<0.000000e+00> : vector<17x8xf32>
    %317 = tpu.matmul %316, %305, %cst_128 {dimension_numbers = #tpu.dot_dimension_numbers<[1], [0], [0], [1], [0, 0, 1, 1], [], []>} : vector<17x17xf32>, vector<17x8xf32>, vector<17x8xf32> -> vector<17x8xf32>
    %318 = vector.extract_strided_slice %300 {offsets = [0, 8], sizes = [17, 8], strides = [1, 1]} : vector<34x32xf32> to vector<17x8xf32>
    %319 = vector.extract_strided_slice %301 {offsets = [0, 8], sizes = [17, 8], strides = [1, 1]} : vector<34x32xf32> to vector<17x8xf32>
    %320 = vector.extract_strided_slice %302 {offsets = [0, 8], sizes = [17, 8], strides = [1, 1]} : vector<34x32xf32> to vector<17x8xf32>
    "tpu.trace_start"() <{level = 10 : i32, message = "qd,kd->qk"}> : () -> ()
    %cst_129 = arith.constant dense<0.000000e+00> : vector<17x17xf32>
    %321 = tpu.matmul %318, %319, %cst_129 {dimension_numbers = #tpu.dot_dimension_numbers<[1], [1], [0], [0], [0, 0, 1, 0], [], []>} : vector<17x8xf32>, vector<17x8xf32>, vector<17x17xf32> -> vector<17x17xf32>
    "tpu.trace_stop"() : () -> ()
    %cst_130 = arith.constant dense<0xFF800000> : vector<17xf32>
    %322 = vector.multi_reduction <maximumf>, %321, %cst_130 [1] : vector<17x17xf32> to vector<17xf32>
    %323 = vector.shape_cast %322 : vector<17xf32> to vector<17x1xf32>
    %324 = vector.broadcast %323 : vector<17x1xf32> to vector<17x17xf32>
    %325 = arith.subf %321, %324 : vector<17x17xf32>
    %326 = math.exp %325 : vector<17x17xf32>
    %cst_131 = arith.constant dense<0.000000e+00> : vector<17xf32>
    %327 = vector.multi_reduction <add>, %326, %cst_131 [1] : vector<17x17xf32> to vector<17xf32>
    %328 = vector.shape_cast %327 : vector<17xf32> to vector<17x1xf32>
    %329 = tpu.reciprocal %328 {approx = true} : vector<17x1xf32> -> vector<17x1xf32>
    %330 = vector.broadcast %329 : vector<17x1xf32> to vector<17x17xf32>
    %331 = arith.mulf %326, %330 : vector<17x17xf32>
    %cst_132 = arith.constant dense<0.000000e+00> : vector<17x8xf32>
    %332 = tpu.matmul %331, %320, %cst_132 {dimension_numbers = #tpu.dot_dimension_numbers<[1], [0], [0], [1], [0, 0, 1, 1], [], []>} : vector<17x17xf32>, vector<17x8xf32>, vector<17x8xf32> -> vector<17x8xf32>
    %333 = vector.extract_strided_slice %300 {offsets = [0, 16], sizes = [17, 8], strides = [1, 1]} : vector<34x32xf32> to vector<17x8xf32>
    %334 = vector.extract_strided_slice %301 {offsets = [0, 16], sizes = [17, 8], strides = [1, 1]} : vector<34x32xf32> to vector<17x8xf32>
    %335 = vector.extract_strided_slice %302 {offsets = [0, 16], sizes = [17, 8], strides = [1, 1]} : vector<34x32xf32> to vector<17x8xf32>
    "tpu.trace_start"() <{level = 10 : i32, message = "qd,kd->qk"}> : () -> ()
    %cst_133 = arith.constant dense<0.000000e+00> : vector<17x17xf32>
    %336 = tpu.matmul %333, %334, %cst_133 {dimension_numbers = #tpu.dot_dimension_numbers<[1], [1], [0], [0], [0, 0, 1, 0], [], []>} : vector<17x8xf32>, vector<17x8xf32>, vector<17x17xf32> -> vector<17x17xf32>
    "tpu.trace_stop"() : () -> ()
    %cst_134 = arith.constant dense<0xFF800000> : vector<17xf32>
    %337 = vector.multi_reduction <maximumf>, %336, %cst_134 [1] : vector<17x17xf32> to vector<17xf32>
    %338 = vector.shape_cast %337 : vector<17xf32> to vector<17x1xf32>
    %339 = vector.broadcast %338 : vector<17x1xf32> to vector<17x17xf32>
    %340 = arith.subf %336, %339 : vector<17x17xf32>
    %341 = math.exp %340 : vector<17x17xf32>
    %cst_135 = arith.constant dense<0.000000e+00> : vector<17xf32>
    %342 = vector.multi_reduction <add>, %341, %cst_135 [1] : vector<17x17xf32> to vector<17xf32>
    %343 = vector.shape_cast %342 : vector<17xf32> to vector<17x1xf32>
    %344 = tpu.reciprocal %343 {approx = true} : vector<17x1xf32> -> vector<17x1xf32>
    %345 = vector.broadcast %344 : vector<17x1xf32> to vector<17x17xf32>
    %346 = arith.mulf %341, %345 : vector<17x17xf32>
    %cst_136 = arith.constant dense<0.000000e+00> : vector<17x8xf32>
    %347 = tpu.matmul %346, %335, %cst_136 {dimension_numbers = #tpu.dot_dimension_numbers<[1], [0], [0], [1], [0, 0, 1, 1], [], []>} : vector<17x17xf32>, vector<17x8xf32>, vector<17x8xf32> -> vector<17x8xf32>
    %348 = vector.extract_strided_slice %300 {offsets = [0, 24], sizes = [17, 8], strides = [1, 1]} : vector<34x32xf32> to vector<17x8xf32>
    %349 = vector.extract_strided_slice %301 {offsets = [0, 24], sizes = [17, 8], strides = [1, 1]} : vector<34x32xf32> to vector<17x8xf32>
    %350 = vector.extract_strided_slice %302 {offsets = [0, 24], sizes = [17, 8], strides = [1, 1]} : vector<34x32xf32> to vector<17x8xf32>
    "tpu.trace_start"() <{level = 10 : i32, message = "qd,kd->qk"}> : () -> ()
    %cst_137 = arith.constant dense<0.000000e+00> : vector<17x17xf32>
    %351 = tpu.matmul %348, %349, %cst_137 {dimension_numbers = #tpu.dot_dimension_numbers<[1], [1], [0], [0], [0, 0, 1, 0], [], []>} : vector<17x8xf32>, vector<17x8xf32>, vector<17x17xf32> -> vector<17x17xf32>
    "tpu.trace_stop"() : () -> ()
    %cst_138 = arith.constant dense<0xFF800000> : vector<17xf32>
    %352 = vector.multi_reduction <maximumf>, %351, %cst_138 [1] : vector<17x17xf32> to vector<17xf32>
    %353 = vector.shape_cast %352 : vector<17xf32> to vector<17x1xf32>
    %354 = vector.broadcast %353 : vector<17x1xf32> to vector<17x17xf32>
    %355 = arith.subf %351, %354 : vector<17x17xf32>
    %356 = math.exp %355 : vector<17x17xf32>
    %cst_139 = arith.constant dense<0.000000e+00> : vector<17xf32>
    %357 = vector.multi_reduction <add>, %356, %cst_139 [1] : vector<17x17xf32> to vector<17xf32>
    %358 = vector.shape_cast %357 : vector<17xf32> to vector<17x1xf32>
    %359 = tpu.reciprocal %358 {approx = true} : vector<17x1xf32> -> vector<17x1xf32>
    %360 = vector.broadcast %359 : vector<17x1xf32> to vector<17x17xf32>
    %361 = arith.mulf %356, %360 : vector<17x17xf32>
    %cst_140 = arith.constant dense<0.000000e+00> : vector<17x8xf32>
    %362 = tpu.matmul %361, %350, %cst_140 {dimension_numbers = #tpu.dot_dimension_numbers<[1], [0], [0], [1], [0, 0, 1, 1], [], []>} : vector<17x17xf32>, vector<17x8xf32>, vector<17x8xf32> -> vector<17x8xf32>
    %363 = tpu.concatenate %317, %332, %347, %362 in 1 : vector<17x8xf32>, vector<17x8xf32>, vector<17x8xf32>, vector<17x8xf32> -> vector<17x32xf32>
    %364 = vector.extract_strided_slice %300 {offsets = [17, 0], sizes = [17, 8], strides = [1, 1]} : vector<34x32xf32> to vector<17x8xf32>
    %365 = vector.extract_strided_slice %301 {offsets = [17, 0], sizes = [17, 8], strides = [1, 1]} : vector<34x32xf32> to vector<17x8xf32>
    %366 = vector.extract_strided_slice %302 {offsets = [17, 0], sizes = [17, 8], strides = [1, 1]} : vector<34x32xf32> to vector<17x8xf32>
    "tpu.trace_start"() <{level = 10 : i32, message = "qd,kd->qk"}> : () -> ()
    %cst_141 = arith.constant dense<0.000000e+00> : vector<17x17xf32>
    %367 = tpu.matmul %364, %365, %cst_141 {dimension_numbers = #tpu.dot_dimension_numbers<[1], [1], [0], [0], [0, 0, 1, 0], [], []>} : vector<17x8xf32>, vector<17x8xf32>, vector<17x17xf32> -> vector<17x17xf32>
    "tpu.trace_stop"() : () -> ()
    %cst_142 = arith.constant dense<0xFF800000> : vector<17xf32>
    %368 = vector.multi_reduction <maximumf>, %367, %cst_142 [1] : vector<17x17xf32> to vector<17xf32>
    %369 = vector.shape_cast %368 : vector<17xf32> to vector<17x1xf32>
    %370 = vector.broadcast %369 : vector<17x1xf32> to vector<17x17xf32>
    %371 = arith.subf %367, %370 : vector<17x17xf32>
    %372 = math.exp %371 : vector<17x17xf32>
    %cst_143 = arith.constant dense<0.000000e+00> : vector<17xf32>
    %373 = vector.multi_reduction <add>, %372, %cst_143 [1] : vector<17x17xf32> to vector<17xf32>
    %374 = vector.shape_cast %373 : vector<17xf32> to vector<17x1xf32>
    %375 = tpu.reciprocal %374 {approx = true} : vector<17x1xf32> -> vector<17x1xf32>
    %376 = vector.broadcast %375 : vector<17x1xf32> to vector<17x17xf32>
    %377 = arith.mulf %372, %376 : vector<17x17xf32>
    %cst_144 = arith.constant dense<0.000000e+00> : vector<17x8xf32>
    %378 = tpu.matmul %377, %366, %cst_144 {dimension_numbers = #tpu.dot_dimension_numbers<[1], [0], [0], [1], [0, 0, 1, 1], [], []>} : vector<17x17xf32>, vector<17x8xf32>, vector<17x8xf32> -> vector<17x8xf32>
    %379 = vector.extract_strided_slice %300 {offsets = [17, 8], sizes = [17, 8], strides = [1, 1]} : vector<34x32xf32> to vector<17x8xf32>
    %380 = vector.extract_strided_slice %301 {offsets = [17, 8], sizes = [17, 8], strides = [1, 1]} : vector<34x32xf32> to vector<17x8xf32>
    %381 = vector.extract_strided_slice %302 {offsets = [17, 8], sizes = [17, 8], strides = [1, 1]} : vector<34x32xf32> to vector<17x8xf32>
    "tpu.trace_start"() <{level = 10 : i32, message = "qd,kd->qk"}> : () -> ()
    %cst_145 = arith.constant dense<0.000000e+00> : vector<17x17xf32>
    %382 = tpu.matmul %379, %380, %cst_145 {dimension_numbers = #tpu.dot_dimension_numbers<[1], [1], [0], [0], [0, 0, 1, 0], [], []>} : vector<17x8xf32>, vector<17x8xf32>, vector<17x17xf32> -> vector<17x17xf32>
    "tpu.trace_stop"() : () -> ()
    %cst_146 = arith.constant dense<0xFF800000> : vector<17xf32>
    %383 = vector.multi_reduction <maximumf>, %382, %cst_146 [1] : vector<17x17xf32> to vector<17xf32>
    %384 = vector.shape_cast %383 : vector<17xf32> to vector<17x1xf32>
    %385 = vector.broadcast %384 : vector<17x1xf32> to vector<17x17xf32>
    %386 = arith.subf %382, %385 : vector<17x17xf32>
    %387 = math.exp %386 : vector<17x17xf32>
    %cst_147 = arith.constant dense<0.000000e+00> : vector<17xf32>
    %388 = vector.multi_reduction <add>, %387, %cst_147 [1] : vector<17x17xf32> to vector<17xf32>
    %389 = vector.shape_cast %388 : vector<17xf32> to vector<17x1xf32>
    %390 = tpu.reciprocal %389 {approx = true} : vector<17x1xf32> -> vector<17x1xf32>
    %391 = vector.broadcast %390 : vector<17x1xf32> to vector<17x17xf32>
    %392 = arith.mulf %387, %391 : vector<17x17xf32>
    %cst_148 = arith.constant dense<0.000000e+00> : vector<17x8xf32>
    %393 = tpu.matmul %392, %381, %cst_148 {dimension_numbers = #tpu.dot_dimension_numbers<[1], [0], [0], [1], [0, 0, 1, 1], [], []>} : vector<17x17xf32>, vector<17x8xf32>, vector<17x8xf32> -> vector<17x8xf32>
    %394 = vector.extract_strided_slice %300 {offsets = [17, 16], sizes = [17, 8], strides = [1, 1]} : vector<34x32xf32> to vector<17x8xf32>
    %395 = vector.extract_strided_slice %301 {offsets = [17, 16], sizes = [17, 8], strides = [1, 1]} : vector<34x32xf32> to vector<17x8xf32>
    %396 = vector.extract_strided_slice %302 {offsets = [17, 16], sizes = [17, 8], strides = [1, 1]} : vector<34x32xf32> to vector<17x8xf32>
    "tpu.trace_start"() <{level = 10 : i32, message = "qd,kd->qk"}> : () -> ()
    %cst_149 = arith.constant dense<0.000000e+00> : vector<17x17xf32>
    %397 = tpu.matmul %394, %395, %cst_149 {dimension_numbers = #tpu.dot_dimension_numbers<[1], [1], [0], [0], [0, 0, 1, 0], [], []>} : vector<17x8xf32>, vector<17x8xf32>, vector<17x17xf32> -> vector<17x17xf32>
    "tpu.trace_stop"() : () -> ()
    %cst_150 = arith.constant dense<0xFF800000> : vector<17xf32>
    %398 = vector.multi_reduction <maximumf>, %397, %cst_150 [1] : vector<17x17xf32> to vector<17xf32>
    %399 = vector.shape_cast %398 : vector<17xf32> to vector<17x1xf32>
    %400 = vector.broadcast %399 : vector<17x1xf32> to vector<17x17xf32>
    %401 = arith.subf %397, %400 : vector<17x17xf32>
    %402 = math.exp %401 : vector<17x17xf32>
    %cst_151 = arith.constant dense<0.000000e+00> : vector<17xf32>
    %403 = vector.multi_reduction <add>, %402, %cst_151 [1] : vector<17x17xf32> to vector<17xf32>
    %404 = vector.shape_cast %403 : vector<17xf32> to vector<17x1xf32>
    %405 = tpu.reciprocal %404 {approx = true} : vector<17x1xf32> -> vector<17x1xf32>
    %406 = vector.broadcast %405 : vector<17x1xf32> to vector<17x17xf32>
    %407 = arith.mulf %402, %406 : vector<17x17xf32>
    %cst_152 = arith.constant dense<0.000000e+00> : vector<17x8xf32>
    %408 = tpu.matmul %407, %396, %cst_152 {dimension_numbers = #tpu.dot_dimension_numbers<[1], [0], [0], [1], [0, 0, 1, 1], [], []>} : vector<17x17xf32>, vector<17x8xf32>, vector<17x8xf32> -> vector<17x8xf32>
    %409 = vector.extract_strided_slice %300 {offsets = [17, 24], sizes = [17, 8], strides = [1, 1]} : vector<34x32xf32> to vector<17x8xf32>
    %410 = vector.extract_strided_slice %301 {offsets = [17, 24], sizes = [17, 8], strides = [1, 1]} : vector<34x32xf32> to vector<17x8xf32>
    %411 = vector.extract_strided_slice %302 {offsets = [17, 24], sizes = [17, 8], strides = [1, 1]} : vector<34x32xf32> to vector<17x8xf32>
    "tpu.trace_start"() <{level = 10 : i32, message = "qd,kd->qk"}> : () -> ()
    %cst_153 = arith.constant dense<0.000000e+00> : vector<17x17xf32>
    %412 = tpu.matmul %409, %410, %cst_153 {dimension_numbers = #tpu.dot_dimension_numbers<[1], [1], [0], [0], [0, 0, 1, 0], [], []>} : vector<17x8xf32>, vector<17x8xf32>, vector<17x17xf32> -> vector<17x17xf32>
    "tpu.trace_stop"() : () -> ()
    %cst_154 = arith.constant dense<0xFF800000> : vector<17xf32>
    %413 = vector.multi_reduction <maximumf>, %412, %cst_154 [1] : vector<17x17xf32> to vector<17xf32>
    %414 = vector.shape_cast %413 : vector<17xf32> to vector<17x1xf32>
    %415 = vector.broadcast %414 : vector<17x1xf32> to vector<17x17xf32>
    %416 = arith.subf %412, %415 : vector<17x17xf32>
    %417 = math.exp %416 : vector<17x17xf32>
    %cst_155 = arith.constant dense<0.000000e+00> : vector<17xf32>
    %418 = vector.multi_reduction <add>, %417, %cst_155 [1] : vector<17x17xf32> to vector<17xf32>
    %419 = vector.shape_cast %418 : vector<17xf32> to vector<17x1xf32>
    %420 = tpu.reciprocal %419 {approx = true} : vector<17x1xf32> -> vector<17x1xf32>
    %421 = vector.broadcast %420 : vector<17x1xf32> to vector<17x17xf32>
    %422 = arith.mulf %417, %421 : vector<17x17xf32>
    %cst_156 = arith.constant dense<0.000000e+00> : vector<17x8xf32>
    %423 = tpu.matmul %422, %411, %cst_156 {dimension_numbers = #tpu.dot_dimension_numbers<[1], [0], [0], [1], [0, 0, 1, 1], [], []>} : vector<17x17xf32>, vector<17x8xf32>, vector<17x8xf32> -> vector<17x8xf32>
    %424 = tpu.concatenate %378, %393, %408, %423 in 1 : vector<17x8xf32>, vector<17x8xf32>, vector<17x8xf32>, vector<17x8xf32> -> vector<17x32xf32>
    %425 = tpu.concatenate %363, %424 in 0 : vector<17x32xf32>, vector<17x32xf32> -> vector<34x32xf32>
    %c1_157 = arith.constant 1 : index
    %c0_158 = arith.constant 0 : index
    %c0_159 = arith.constant 0 : index
    %426 = vector.load %arg9[%c1_157, %c0_158, %c0_159] : memref<2x32x32xf32, #tpu.memory_space<vmem>>, vector<1x32x32xf32>
    %427 = vector.shape_cast %426 : vector<1x32x32xf32> to vector<32x32xf32>
    %cst_160 = arith.constant dense<0.000000e+00> : vector<34x32xf32>
    %428 = tpu.matmul %425, %427, %cst_160 {dimension_numbers = #tpu.dot_dimension_numbers<[1], [0], [0], [1], [0, 0, 1, 1], [], []>} : vector<34x32xf32>, vector<32x32xf32>, vector<34x32xf32> -> vector<34x32xf32>
    %c1_161 = arith.constant 1 : index
    %c0_162 = arith.constant 0 : index
    %c0_163 = arith.constant 0 : index
    %429 = vector.load %arg10[%c1_161, %c0_162, %c0_163] : memref<2x1x32xf32, #tpu.memory_space<vmem>>, vector<1x1x32xf32>
    %430 = vector.shape_cast %429 : vector<1x1x32xf32> to vector<1x32xf32>
    %431 = vector.broadcast %430 : vector<1x32xf32> to vector<34x32xf32>
    %432 = arith.addf %428, %431 : vector<34x32xf32>
    %433 = arith.addf %264, %432 : vector<34x32xf32>
    %c1_164 = arith.constant 1 : index
    %c0_165 = arith.constant 0 : index
    %c0_166 = arith.constant 0 : index
    %434 = vector.load %arg11[%c1_164, %c0_165, %c0_166] : memref<2x1x32xf32, #tpu.memory_space<vmem>>, vector<1x1x32xf32>
    %435 = vector.shape_cast %434 : vector<1x1x32xf32> to vector<1x32xf32>
    %c1_167 = arith.constant 1 : index
    %c0_168 = arith.constant 0 : index
    %c0_169 = arith.constant 0 : index
    %436 = vector.load %arg12[%c1_167, %c0_168, %c0_169] : memref<2x1x32xf32, #tpu.memory_space<vmem>>, vector<1x1x32xf32>
    %437 = vector.shape_cast %436 : vector<1x1x32xf32> to vector<1x32xf32>
    %cst_170 = arith.constant dense<0.000000e+00> : vector<34xf32>
    %438 = vector.multi_reduction <add>, %433, %cst_170 [1] : vector<34x32xf32> to vector<34xf32>
    %439 = vector.shape_cast %438 : vector<34xf32> to vector<34x1xf32>
    %cst_171 = arith.constant 3.200000e+01 : f32
    %440 = vector.broadcast %cst_171 : f32 to vector<34x1xf32>
    %441 = arith.divf %439, %440 : vector<34x1xf32>
    %442 = vector.broadcast %441 : vector<34x1xf32> to vector<34x32xf32>
    %443 = arith.subf %433, %442 : vector<34x32xf32>
    %444 = arith.mulf %443, %443 : vector<34x32xf32>
    %cst_172 = arith.constant dense<0.000000e+00> : vector<34xf32>
    %445 = vector.multi_reduction <add>, %444, %cst_172 [1] : vector<34x32xf32> to vector<34xf32>
    %446 = vector.shape_cast %445 : vector<34xf32> to vector<34x1xf32>
    %cst_173 = arith.constant 3.200000e+01 : f32
    %447 = vector.broadcast %cst_173 : f32 to vector<34x1xf32>
    %448 = arith.divf %446, %447 : vector<34x1xf32>
    %449 = vector.broadcast %441 : vector<34x1xf32> to vector<34x32xf32>
    %450 = arith.subf %433, %449 : vector<34x32xf32>
    %cst_174 = arith.constant 9.99999974E-6 : f32
    %451 = vector.broadcast %cst_174 : f32 to vector<34x1xf32>
    %452 = arith.addf %448, %451 : vector<34x1xf32>
    %453 = math.rsqrt %452 : vector<34x1xf32>
    %454 = vector.broadcast %453 : vector<34x1xf32> to vector<34x32xf32>
    %455 = arith.mulf %450, %454 : vector<34x32xf32>
    %456 = vector.broadcast %435 : vector<1x32xf32> to vector<34x32xf32>
    %457 = arith.mulf %455, %456 : vector<34x32xf32>
    %458 = vector.broadcast %437 : vector<1x32xf32> to vector<34x32xf32>
    %459 = arith.addf %457, %458 : vector<34x32xf32>
    %c1_175 = arith.constant 1 : index
    %c0_176 = arith.constant 0 : index
    %c0_177 = arith.constant 0 : index
    %460 = vector.load %arg13[%c1_175, %c0_176, %c0_177] : memref<2x32x64xf32, #tpu.memory_space<vmem>>, vector<1x32x64xf32>
    %461 = vector.shape_cast %460 : vector<1x32x64xf32> to vector<32x64xf32>
    %cst_178 = arith.constant dense<0.000000e+00> : vector<34x64xf32>
    %462 = tpu.matmul %459, %461, %cst_178 {dimension_numbers = #tpu.dot_dimension_numbers<[1], [0], [0], [1], [0, 0, 1, 1], [], []>} : vector<34x32xf32>, vector<32x64xf32>, vector<34x64xf32> -> vector<34x64xf32>
    %c1_179 = arith.constant 1 : index
    %c0_180 = arith.constant 0 : index
    %c0_181 = arith.constant 0 : index
    %463 = vector.load %arg14[%c1_179, %c0_180, %c0_181] : memref<2x1x64xf32, #tpu.memory_space<vmem>>, vector<1x1x64xf32>
    %464 = vector.shape_cast %463 : vector<1x1x64xf32> to vector<1x64xf32>
    %465 = vector.broadcast %464 : vector<1x64xf32> to vector<34x64xf32>
    %466 = arith.addf %462, %465 : vector<34x64xf32>
    %cst_182 = arith.constant 5.000000e-01 : f32
    %467 = vector.broadcast %cst_182 : f32 to vector<34x64xf32>
    %468 = arith.mulf %467, %466 : vector<34x64xf32>
    %cst_183 = arith.constant 0.707106769 : f32
    %469 = vector.broadcast %cst_183 : f32 to vector<34x64xf32>
    %470 = arith.mulf %466, %469 : vector<34x64xf32>
    %471 = math.absf %470 : vector<34x64xf32>
    %cst_184 = arith.constant 0.327591091 : f32
    %472 = vector.broadcast %cst_184 : f32 to vector<34x64xf32>
    %473 = arith.mulf %472, %471 : vector<34x64xf32>
    %cst_185 = arith.constant 1.000000e+00 : f32
    %474 = vector.broadcast %cst_185 : f32 to vector<34x64xf32>
    %475 = arith.addf %474, %473 : vector<34x64xf32>
    %cst_186 = arith.constant 1.000000e+00 : f32
    %476 = vector.broadcast %cst_186 : f32 to vector<34x64xf32>
    %477 = arith.divf %476, %475 : vector<34x64xf32>
    %cst_187 = arith.constant 1.06140542 : f32
    %478 = vector.broadcast %cst_187 : f32 to vector<34x64xf32>
    %479 = arith.mulf %478, %477 : vector<34x64xf32>
    %cst_188 = arith.constant -1.45315206 : f32
    %480 = vector.broadcast %cst_188 : f32 to vector<34x64xf32>
    %481 = arith.addf %479, %480 : vector<34x64xf32>
    %482 = arith.mulf %481, %477 : vector<34x64xf32>
    %cst_189 = arith.constant 1.42141378 : f32
    %483 = vector.broadcast %cst_189 : f32 to vector<34x64xf32>
    %484 = arith.addf %482, %483 : vector<34x64xf32>
    %485 = arith.mulf %484, %477 : vector<34x64xf32>
    %cst_190 = arith.constant -0.284496725 : f32
    %486 = vector.broadcast %cst_190 : f32 to vector<34x64xf32>
    %487 = arith.addf %485, %486 : vector<34x64xf32>
    %488 = arith.mulf %487, %477 : vector<34x64xf32>
    %cst_191 = arith.constant 0.254829586 : f32
    %489 = vector.broadcast %cst_191 : f32 to vector<34x64xf32>
    %490 = arith.addf %488, %489 : vector<34x64xf32>
    %491 = arith.mulf %490, %477 : vector<34x64xf32>
    %cst_192 = arith.constant 0.000000e+00 : f32
    %492 = vector.broadcast %cst_192 : f32 to vector<34x64xf32>
    %493 = arith.subf %492, %471 : vector<34x64xf32>
    %494 = arith.mulf %493, %471 : vector<34x64xf32>
    %495 = math.exp %494 : vector<34x64xf32>
    %496 = arith.mulf %491, %495 : vector<34x64xf32>
    %cst_193 = arith.constant 1.000000e+00 : f32
    %497 = vector.broadcast %cst_193 : f32 to vector<34x64xf32>
    %498 = arith.subf %497, %496 : vector<34x64xf32>
    %cst_194 = arith.constant 0.000000e+00 : f32
    %499 = vector.broadcast %cst_194 : f32 to vector<34x64xf32>
    %500 = arith.cmpf oge, %470, %499 : vector<34x64xf32>
    %cst_195 = arith.constant 0.000000e+00 : f32
    %501 = vector.broadcast %cst_195 : f32 to vector<34x64xf32>
    %502 = arith.subf %501, %498 : vector<34x64xf32>
    %503 = arith.select %500, %498, %502 : vector<34x64xi1>, vector<34x64xf32>
    %cst_196 = arith.constant 1.000000e+00 : f32
    %504 = vector.broadcast %cst_196 : f32 to vector<34x64xf32>
    %505 = arith.addf %504, %503 : vector<34x64xf32>
    %506 = arith.mulf %468, %505 : vector<34x64xf32>
    %c1_197 = arith.constant 1 : index
    %c0_198 = arith.constant 0 : index
    %c0_199 = arith.constant 0 : index
    %507 = vector.load %arg15[%c1_197, %c0_198, %c0_199] : memref<2x64x32xf32, #tpu.memory_space<vmem>>, vector<1x64x32xf32>
    %508 = vector.shape_cast %507 : vector<1x64x32xf32> to vector<64x32xf32>
    %cst_200 = arith.constant dense<0.000000e+00> : vector<34x32xf32>
    %509 = tpu.matmul %506, %508, %cst_200 {dimension_numbers = #tpu.dot_dimension_numbers<[1], [0], [0], [1], [0, 0, 1, 1], [], []>} : vector<34x64xf32>, vector<64x32xf32>, vector<34x32xf32> -> vector<34x32xf32>
    %c1_201 = arith.constant 1 : index
    %c0_202 = arith.constant 0 : index
    %c0_203 = arith.constant 0 : index
    %510 = vector.load %arg16[%c1_201, %c0_202, %c0_203] : memref<2x1x32xf32, #tpu.memory_space<vmem>>, vector<1x1x32xf32>
    %511 = vector.shape_cast %510 : vector<1x1x32xf32> to vector<1x32xf32>
    %512 = vector.broadcast %511 : vector<1x32xf32> to vector<34x32xf32>
    %513 = arith.addf %509, %512 : vector<34x32xf32>
    %514 = arith.addf %433, %513 : vector<34x32xf32>
    %515 = vector.extract_strided_slice %514 {offsets = [0, 0], sizes = [1, 32], strides = [1, 1]} : vector<34x32xf32> to vector<1x32xf32>
    %516 = vector.extract_strided_slice %514 {offsets = [17, 0], sizes = [1, 32], strides = [1, 1]} : vector<34x32xf32> to vector<1x32xf32>
    %517 = tpu.concatenate %515, %516 in 0 : vector<1x32xf32>, vector<1x32xf32> -> vector<2x32xf32>
    %c0_204 = arith.constant 0 : index
    %c0_205 = arith.constant 0 : index
    %518 = vector.load %arg17[%c0_204, %c0_205] : memref<1x32xf32, #tpu.memory_space<vmem>>, vector<1x32xf32>
    %c0_206 = arith.constant 0 : index
    %c0_207 = arith.constant 0 : index
    %519 = vector.load %arg18[%c0_206, %c0_207] : memref<1x32xf32, #tpu.memory_space<vmem>>, vector<1x32xf32>
    %cst_208 = arith.constant dense<0.000000e+00> : vector<2xf32>
    %520 = vector.multi_reduction <add>, %517, %cst_208 [1] : vector<2x32xf32> to vector<2xf32>
    %521 = vector.shape_cast %520 : vector<2xf32> to vector<2x1xf32>
    %cst_209 = arith.constant 3.200000e+01 : f32
    %522 = vector.broadcast %cst_209 : f32 to vector<2x1xf32>
    %523 = arith.divf %521, %522 : vector<2x1xf32>
    %524 = vector.broadcast %523 : vector<2x1xf32> to vector<2x32xf32>
    %525 = arith.subf %517, %524 : vector<2x32xf32>
    %526 = arith.mulf %525, %525 : vector<2x32xf32>
    %cst_210 = arith.constant dense<0.000000e+00> : vector<2xf32>
    %527 = vector.multi_reduction <add>, %526, %cst_210 [1] : vector<2x32xf32> to vector<2xf32>
    %528 = vector.shape_cast %527 : vector<2xf32> to vector<2x1xf32>
    %cst_211 = arith.constant 3.200000e+01 : f32
    %529 = vector.broadcast %cst_211 : f32 to vector<2x1xf32>
    %530 = arith.divf %528, %529 : vector<2x1xf32>
    %531 = vector.broadcast %523 : vector<2x1xf32> to vector<2x32xf32>
    %532 = arith.subf %517, %531 : vector<2x32xf32>
    %cst_212 = arith.constant 9.99999974E-6 : f32
    %533 = vector.broadcast %cst_212 : f32 to vector<2x1xf32>
    %534 = arith.addf %530, %533 : vector<2x1xf32>
    %535 = math.rsqrt %534 : vector<2x1xf32>
    %536 = vector.broadcast %535 : vector<2x1xf32> to vector<2x32xf32>
    %537 = arith.mulf %532, %536 : vector<2x32xf32>
    %538 = vector.broadcast %518 : vector<1x32xf32> to vector<2x32xf32>
    %539 = arith.mulf %537, %538 : vector<2x32xf32>
    %540 = vector.broadcast %519 : vector<1x32xf32> to vector<2x32xf32>
    %541 = arith.addf %539, %540 : vector<2x32xf32>
    %c0_213 = arith.constant 0 : index
    %c0_214 = arith.constant 0 : index
    %542 = vector.load %arg19[%c0_213, %c0_214] : memref<32x10xf32, #tpu.memory_space<vmem>>, vector<32x10xf32>
    %cst_215 = arith.constant dense<0.000000e+00> : vector<2x10xf32>
    %543 = tpu.matmul %541, %542, %cst_215 {dimension_numbers = #tpu.dot_dimension_numbers<[1], [0], [0], [1], [0, 0, 1, 1], [], []>} : vector<2x32xf32>, vector<32x10xf32>, vector<2x10xf32> -> vector<2x10xf32>
    %c0_216 = arith.constant 0 : index
    %c0_217 = arith.constant 0 : index
    %544 = vector.load %arg20[%c0_216, %c0_217] : memref<1x10xf32, #tpu.memory_space<vmem>>, vector<1x10xf32>
    %545 = vector.broadcast %544 : vector<1x10xf32> to vector<2x10xf32>
    %546 = arith.addf %543, %545 : vector<2x10xf32>
    %c0_218 = arith.constant 0 : index
    %c0_219 = arith.constant 0 : index
    %547 = vector.load %arg21[%c0_218, %c0_219] : memref<2x10xf32, #tpu.memory_space<vmem>>, vector<2x10xf32>
    tpu.vector_store %arg21[%c0_218, %c0_219], %546 {strides = array<i32>} : memref<2x10xf32, #tpu.memory_space<vmem>>, vector<2x10xf32>,
    return
  }
}

</mosaic_0001>

<bundles_post_ra>
// kernel: vit_forward.1
= control target key start
LH: loop header
LB: loop body
LE: loop exit
PB: predicated region body
PF: predicated region fallthrough
CT: control target
= control target key end

     0   :  { %s6444_s0 = inlined_call_operand.vmem [shape: f32[32,64], index: 0, kind: input, shape index: {}]   ;;  %s6445_s1 = inlined_call_operand.vmem [shape: f32[64,32], index: 1, kind: input, shape index: {}]   ;;  %s6446_s2 = inlined_call_operand.vmem [shape: f32[1,32], index: 2, kind: input, shape index: {}]   ;;  %s6447_s3 = inlined_call_operand.vmem [shape: f32[1,32], index: 3, kind: input, shape index: {}]   ;;  %s6448_s4 = inlined_call_operand.vmem [shape: f32[17,32], index: 4, kind: input, shape index: {}]   ;;  %s6449_s5 = inlined_call_operand.vmem [shape: f32[2,1,32], index: 5, kind: input, shape index: {}]   ;;  %s6450_s6 = inlined_call_operand.vmem [shape: f32[2,1,32], index: 6, kind: input, shape index: {}]   ;;  %s6451_s7 = inlined_call_operand.vmem [shape: f32[2,32,96], index: 7, kind: input, shape index: {}]   ;;  %s6452_s8 = inlined_call_operand.vmem [shape: f32[2,1,96], index: 8, kind: input, shape index: {}]   ;;  %s6453_s9 = inlined_call_operand.vmem [shape: f32[2,32,32], index: 9, kind: input, shape index: {}]   ;;  %s6454_s10 = inlined_call_operand.vmem [shape: f32[2,1,32], index: 10, kind: input, shape index: {}]   ;;  %s6455_s11 = inlined_call_operand.vmem [shape: f32[2,1,32], index: 11, kind: input, shape index: {}]   ;;  %s6456_s12 = inlined_call_operand.vmem [shape: f32[2,1,32], index: 12, kind: input, shape index: {}]   ;;  %s6457_s13 = inlined_call_operand.vmem [shape: f32[2,32,64], index: 13, kind: input, shape index: {}]   ;;  %s6458_s14 = inlined_call_operand.vmem [shape: f32[2,1,64], index: 14, kind: input, shape index: {}]   ;;  %s6459_s15 = inlined_call_operand.vmem [shape: f32[2,64,32], index: 15, kind: input, shape index: {}]   ;;  %s6460_s16 = inlined_call_operand.vmem [shape: f32[2,1,32], index: 16, kind: input, shape index: {}]   ;;  %s6461_s17 = inlined_call_operand.vmem [shape: f32[1,32], index: 17, kind: input, shape index: {}]   ;;  %s6462_s18 = inlined_call_operand.vmem [shape: f32[1,32], index: 18, kind: input, shape index: {}]   ;;  %s6463_s19 = inlined_call_operand.vmem [shape: f32[32,10], index: 19, kind: input, shape index: {}]   ;;  %s6464_s20 = inlined_call_operand.vmem [shape: f32[1,10], index: 20, kind: input, shape index: {}]   ;;  %s6465_s21 = inlined_call_operand.hbm [shape: f32[2,10], index: 21, kind: output, shape index: {}]  }
   0x1   :  { %6487 = sst [smem:[#allocation5_spill]] %s6444_s0 }
   0x2   :  { %6488 = sst [smem:[#allocation6_spill]] %s6445_s1 }
   0x3   :  { %6489 = sst [smem:[#allocation7_spill]] %s6446_s2 }
   0x4   :  { %6490 = sst [smem:[#allocation8_spill]] %s6447_s3 }
   0x5   :  { %6491 = sst [smem:[#allocation9_spill]] %s6448_s4 }
   0x6   :  { %6492 = sst [smem:[#allocation10_spill]] %s6449_s5 }
   0x7   :  { %s6493_s26 = sld [smem:[#allocation6_spill]] }
   0xd   :  { %v80_v0 = vld [vmem:[%s6493_s26 + $0x38] sm:$0xff]  ;;  %v79_v1 = vld [vmem:[%s6493_s26 + $0x30] sm:$0xff]  ;;  %v78_v2 = vld [vmem:[%s6493_s26 + $0x28] sm:$0xff] }
   0xe   :  { %106 = vmatpush.msra.mxu0 %v80_v0  ;;  %v77_v3 = vld [vmem:[%s6493_s26 + $0x20] sm:$0xff]  ;;  %v76_v4 = vld [vmem:[%s6493_s26 + $0x18] sm:$0xff]  ;;  %v75_v5 = vld [vmem:[%s6493_s26 + $0x10] sm:$0xff] }
   0xf   :  { %v74_v6 = vld [vmem:[%s6493_s26 + $0x8] sm:$0xff] }
  0x10   :  { %107 = vmatpush.msra.mxu0 %v79_v1 }
  0x12   :  { %108 = vmatpush.msra.mxu0 %v78_v2 }
  0x14   :  { %109 = vmatpush.msra.mxu0 %v77_v3 }
  0x16   :  { %110 = vmatpush.msra.mxu0 %v76_v4 }
  0x18   :  { %111 = vmatpush.msra.mxu0 %v75_v5 }
  0x19   :  { %26 = vsyncpa [#allocation3], 0  ;;  %v73_v7 = vld [vmem:[%s6493_s26] sm:$0xff]  ;;  %s6494_s28 = sld [smem:[#allocation5_spill]]  ;;  %vm85_vm0 = vcmask 523264   ;;  %vm133_vm1 = vcmask 1040384  }
  0x1a   :  { %112 = vmatpush.msra.mxu0 %v74_v6  ;;  %s6495_s1 = sld [smem:[#allocation7_spill]]  ;;  %vm170_vm2 = vcmask 261120   ;;  %v4578_v48 = vmov 32.0   ;;  %v308_v6 = vld [vmem:[%s6451_s7 + $0x18] sm:$0xff]  ;;  %s4579_s26 = smov 96   ;;  %vm183_vm13 = vcmask 254976  }
  0x1b   :  { %s6496_s25 = sld [smem:[#allocation8_spill]]  ;;  %4276 = vrcp.f32 %v4578_v48  ;;  %340 = vmatpush.msra.mxu1 %v308_v6  ;;  %s4580_s5 = smov 88   ;;  %vm374_vm14 = vcmask 64512   ;;  %vm416_vm15 = vcmask 138240  }
  0x1c   :  { %113 = vmatpush.msra.mxu0 %v73_v7  ;;  %s6497_s29 = sld [smem:[#allocation9_spill]]  ;;  %v307_v7 = vld [vmem:[%s6451_s7 + $0x10] sm:$0xff]  ;;  %s4581_s22 = smov 72  }
  0x1d   :  { %341 = vmatpush.msra.mxu1 %v307_v7  ;;  %s6474_s23 = smov 64   ;;  %s6478_s24 = smov 104  }
  0x1e   :  { %s4585_s2 = smov 80   ;;  %s6480_s27 = smov 112  }
  0x1f   :  { %v69_v8 = vld [vmem:[%s6494_s28] sm:$0xff]  ;;  %v70_v9 = vld [vmem:[%s6494_s28 + $0x8] sm:$0xff]  ;;  %v71_v10 = vld [vmem:[%s6494_s28 + $0x10] sm:$0xff]  ;;  %s6470_s3 = smov 40   ;;  %s6484_s0 = smov 16  }
  0x20   :  { %3921 = vmatmul.msk.f32.vlgmr.msra.gmra.mxu0 %vm85_vm0, %v69_v8  ;;  %v72_v11 = vld [vmem:[%s6494_s28 + $0x18] sm:$0xff]  ;;  %v4256_v12 = vld [vmem:[%s6495_s1] ss:$0 sm:$0xff]  ;;  %v306_v8 = vld [vmem:[%s6451_s7 + $0x8] sm:$0xff]  ;;  %s4583_s1 = smov 120   ;;  %s6472_s28 = smov 48  }
  0x21   :  { %v127_v15 = vld [vmem:[%s6496_s25] sm:$0x1]  ;;  %v4277_v49 = vpop.eup %4276  ;;  %342 = vmatpush.msra.mxu1 %v306_v8  ;;  %s6476_s25 = smov 56   ;;  %s4591_s4 = smov 8  }
  0x22   :  { %v128_v17 = vld [vmem:[%s6497_s29] sm:$0xff]  ;;  %v129_v24 = vld [vmem:[%s6497_s29 + $0x8] sm:$0xff]  ;;  %v130_v31 = vld [vmem:[%s6497_s29 + $0x10] sm:$0x1]  ;;  %v188_v50 = vmul.f32 32.0, %v4277_v49  ;;  %vm192_vm3 = vweird.f32 %v4277_v49  ;;  %s6498_s29 = sld [smem:[#allocation10_spill]] }
  0x23   :  { %s6482_s30 = smov 24  }
  0x24   :  { %v189_v51 = vsub.f32 1.0, %v188_v50 }
  0x26   :  { %v190_v52 = vmul.f32 %v4277_v49, %v189_v51 }
  0x28   :  { %3922 = vmatmul.msk.f32.gmra.mxu0 %vm85_vm0, %v70_v9  ;;  %v191_v53 = vadd.f32 %v4277_v49, %v190_v52  ;;  %v305_v9 = vld [vmem:[%s6451_s7] sm:$0xff] }
  0x29   :  { %343 = vmatpush.msra.mxu1 %v305_v9 }
  0x2a   :  { %v4782_v54 = vsel %vm192_vm3, %v4277_v49, %v191_v53  ;;  %vm423_vm3 = vcmask 131072  }
  0x30   :  { %3923 = vmatmul.msk.f32.gmra.mxu0 %vm85_vm0, %v71_v10 }
  0x38   :  { %3924 = vmatmul.msk.f32.gmra.mxu0 %vm85_vm0, %v72_v11 }
  0x9d   :  { %v115_v13 = vpop.f32.mrf.mxu0 }
  0x9e   :  { %v116_v14 = vadd.f32 %v4256_v12, %v115_v13 }
  0xa0   :  { %v134_v16 = vrot.slane %v116_v14, 7 }
  0xa2   :  { %v140_v18 = vsel %vm133_vm1, %v127_v15, %v134_v16 }
  0xa3   :  { %v4754_v19 = vadd.f32 %v140_v18, %v128_v17 }
  0xa5   :  { %v118_v20 = vpop.f32.mrf.mxu0  ;;  %v171_v21 = vsel %vm170_vm2, %v4754_v19, 0.0 }
  0xa6   :  { %v119_v22 = vadd.f32 %v4256_v12, %v118_v20  ;;  %172 = vadd.xlane.f32.xlu0 %v171_v21 }
  0xa8   :  { %v135_v23 = vrot.slane %v119_v22, 7 }
  0xaa   :  { %v136_v25 = vsel %vm133_vm1, %v134_v16, %v135_v23  ;;  %v143_v34 = vadd.f32 %v135_v23, %v130_v31 }
  0xab   :  { %v4762_v26 = vadd.f32 %v136_v25, %v129_v24 }
  0xad   :  { %v121_v27 = vpop.f32.mrf.mxu0  ;;  %v174_v28 = vsel %vm170_vm2, %v4762_v26, 0.0 }
  0xae   :  { %v122_v29 = vadd.f32 %v4256_v12, %v121_v27  ;;  %175 = vadd.xlane.f32.xlu0 %v174_v28  ;;  %v4815_v28 = vld [vmem:[%s6498_s29] ss:$0 sm:$0xff] }
  0xb0   :  { %v146_v30 = vrot.slane %v122_v29, 7 }
  0xb2   :  { %v152_v32 = vsel %vm133_vm1, %v127_v15, %v146_v30 }
  0xb3   :  { %v153_v33 = vadd.f32 %v152_v32, %v128_v17 }
  0xb5   :  { %v124_v35 = vpop.f32.mrf.mxu0  ;;  %v159_v36 = vrot.slane %v153_v33, 7  ;;  %v4820_v33 = vld [vmem:[%s6450_s6] ss:$0 sm:$0xff] }
  0xb6   :  { %v125_v37 = vadd.f32 %v4256_v12, %v124_v35 }
  0xb7   :  { %v4771_v38 = vsel %vm133_vm1, %v143_v34, %v159_v36 }
  0xb8   :  { %v147_v39 = vrot.slane %v125_v37, 7  ;;  %v177_v40 = vsel %vm170_vm2, %v4771_v38, 0.0 }
  0xb9   :  { %178 = vadd.xlane.f32.xlu1 %v177_v40 }
  0xba   :  { %v148_v41 = vsel %vm133_vm1, %v146_v30, %v147_v39  ;;  %v155_v42 = vadd.f32 %v147_v39, %v130_v31 }
  0xbb   :  { %v154_v43 = vadd.f32 %v148_v41, %v129_v24 }
  0xbc   :  { %v162_v44 = vrot.slane %v155_v42, 7 }
  0xbd   :  { %v160_v45 = vrot.slane %v154_v43, 7 }
  0xbf   :  { %v4777_v46 = vsel %vm133_vm1, %v160_v45, %v162_v44  ;;  %v4780_v47 = vsel %vm133_vm1, %v159_v36, %v160_v45 }
 0x119   :  { %v173_v55 = vpop.xlane.xlu0 %172 }
 0x11a   :  { %v194_v56 = vmul.f32 %v4782_v54, %v173_v55 }
 0x11c   :  { %v199_v57 = vsub.f32 %v4754_v19, %v194_v56 }
 0x11e   :  { %v204_v58 = vmul.f32 %v199_v57, %v199_v57 }
 0x120   :  { %v209_v59 = vsel %vm170_vm2, %v204_v58, 0.0 }
 0x121   :  { %210 = vadd.xlane.f32.xlu1 %v209_v59  ;;  %v176_v60 = vpop.xlane.xlu0 %175 }
 0x122   :  { %v195_v61 = vmul.f32 %v4782_v54, %v176_v60 }
 0x124   :  { %v200_v62 = vsub.f32 %v4762_v26, %v195_v61 }
 0x126   :  { %v205_v63 = vmul.f32 %v200_v62, %v200_v62 }
 0x128   :  { %v212_v0 = vsel %vm170_vm2, %v205_v63, 0.0 }
 0x129   :  { %213 = vadd.xlane.f32.xlu2 %v212_v0  ;;  %v184_v0 = vsel %vm183_vm13, %v4777_v46, 0.0 }
 0x12c   :  { %v179_v1 = vpop.xlane.xlu1 %178 }
 0x12d   :  { %v196_v2 = vmul.f32 %v4782_v54, %v179_v1 }
 0x12f   :  { %v4792_v3 = vsub.f32 %v4771_v38, %v196_v2 }
 0x131   :  { %v206_v4 = vmul.f32 %v4792_v3, %v4792_v3 }
 0x133   :  { %v215_v5 = vsel %vm170_vm2, %v206_v4, 0.0 }
 0x134   :  { %216 = vadd.xlane.f32.xlu2 %v215_v5 }
 0x194   :  { %v211_v10 = vpop.xlane.xlu1 %210 }
 0x195   :  { %v224_v11 = vmul.f32 %v211_v10, %v4782_v54 }
 0x197   :  { %v229_v12 = vadd.f32 1e-05, %v224_v11 }
 0x199   :  { %4278 = vrsqrt.f32 %v229_v12  ;;  %vm240_vm5 = vweird.f32 %v229_v12 }
 0x19c   :  { %v214_v13 = vpop.xlane.xlu2 %213 }
 0x19d   :  { %v225_v14 = vmul.f32 %v214_v13, %v4782_v54 }
 0x19f   :  { %v4279_v15 = vpop.eup %4278  ;;  %v230_v16 = vadd.f32 1e-05, %v225_v14 }
 0x1a0   :  { %v235_v17 = vmul.f32 %v4279_v15, %v229_v12  ;;  %vm241_vm4 = vweird.f32 %v4279_v15 }
 0x1a1   :  { %4280 = vrsqrt.f32 %v230_v16  ;;  %vm242_vm6 = vmor %vm240_vm5, %vm241_vm4  ;;  %vm250_vm8 = vweird.f32 %v230_v16 }
 0x1a2   :  { %v236_v18 = vmul.f32 %v4279_v15, %v235_v17  ;;  %v180_v17 = vsel %vm170_vm2, %v4780_v47, 0.0 }
 0x1a4   :  { %v237_v20 = vmul.f32 0.5, %v236_v18 }
 0x1a6   :  { %v238_v21 = vsub.f32 1.5, %v237_v20 }
 0x1a7   :  { %v4281_v22 = vpop.eup %4280  ;;  %v217_v23 = vpop.xlane.xlu2 %216 }
 0x1a8   :  { %v239_v24 = vmul.f32 %v4279_v15, %v238_v21  ;;  %v245_v25 = vmul.f32 %v4281_v22, %v230_v16  ;;  %v226_v27 = vmul.f32 %v217_v23, %v4782_v54  ;;  %vm251_vm7 = vweird.f32 %v4281_v22 }
 0x1a9   :  { %vm252_vm9 = vmor %vm250_vm8, %vm251_vm7 }
 0x1aa   :  { %v246_v29 = vmul.f32 %v4281_v22, %v245_v25  ;;  %v231_v30 = vadd.f32 1e-05, %v226_v27  ;;  %v243_v31 = vsel %vm242_vm6, %v4279_v15, %v239_v24 }
 0x1ab   :  { %v284_v32 = vmul.f32 %v243_v31, %v199_v57  ;;  %v4835_v57 = vld [vmem:[%s6452_s8] ss:$0 sm:$0xff] }
 0x1ac   :  { %v247_v34 = vmul.f32 0.5, %v246_v29  ;;  %4282 = vrsqrt.f32 %v231_v30  ;;  %vm260_vm11 = vweird.f32 %v231_v30 }
 0x1ad   :  { %v292_v35 = vmul.f32 %v4815_v28, %v284_v32 }
 0x1ae   :  { %v248_v36 = vsub.f32 1.5, %v247_v34 }
 0x1af   :  { %v300_v37 = vadd.f32 %v4820_v33, %v292_v35 }
 0x1b0   :  { %v249_v39 = vmul.f32 %v4281_v22, %v248_v36 }
 0x1b1   :  { %3925 = vmatmul.msk.f32.vlgmr.msra.gmra.mxu1 %vm170_vm2, %v300_v37 }
 0x1b2   :  { %v4283_v40 = vpop.eup %4282  ;;  %v253_v41 = vsel %vm252_vm9, %v4281_v22, %v249_v39 }
 0x1b3   :  { %v255_v42 = vmul.f32 %v4283_v40, %v231_v30  ;;  %v285_v43 = vmul.f32 %v253_v41, %v200_v62  ;;  %vm261_vm10 = vweird.f32 %v4283_v40 }
 0x1b4   :  { %vm262_vm12 = vmor %vm260_vm11, %vm261_vm10  ;;  %vm929_vm10 = vcmask 1046528   ;;  %vm919_vm11 = vcmask 130048  }
 0x1b5   :  { %v256_v44 = vmul.f32 %v4283_v40, %v255_v42  ;;  %v293_v45 = vmul.f32 %v4815_v28, %v285_v43 }
 0x1b7   :  { %v257_v48 = vmul.f32 0.5, %v256_v44  ;;  %v301_v49 = vadd.f32 %v4820_v33, %v293_v45 }
 0x1b9   :  { %v258_v50 = vsub.f32 1.5, %v257_v48  ;;  %3926 = vmatmul.msk.f32.gmra.mxu1 %vm170_vm2, %v301_v49 }
 0x1bb   :  { %v259_v51 = vmul.f32 %v4283_v40, %v258_v50 }
 0x1bd   :  { %v263_v52 = vsel %vm262_vm12, %v4283_v40, %v259_v51  ;;  %vm6486_vm12 = vcmask 195584  }
 0x1be   :  { %v286_v53 = vmul.f32 %v263_v52, %v4792_v3 }
 0x1c0   :  { %v294_v55 = vmul.f32 %v4815_v28, %v286_v53 }
 0x1c2   :  { %v302_v56 = vadd.f32 %v4820_v33, %v294_v55 }
 0x1c4   :  { %3927 = vmatmul.msk.f32.gmra.mxu1 %vm170_vm2, %v302_v56 }
 0x22e   :  { %v345_v58 = vpop.f32.mrf.mxu1 }
 0x22f   :  { %v4838_v59 = vadd.f32 %v4835_v57, %v345_v58 }
 0x231   :  { %368 = vrot.lane.b32.xlu2 %v4838_v59, %s4579_s26  ;;  %v4862_v4 = vmul.f32 0.35355338, %v4838_v59 }
 0x236   :  { %v348_v60 = vpop.f32.mrf.mxu1 }
 0x237   :  { %v4843_v61 = vadd.f32 %v4835_v57, %v348_v60 }
 0x239   :  { %370 = vrot.lane.b32.xlu1 %v4843_v61, %s4579_s26  ;;  %v4867_v5 = vmul.f32 0.35355338, %v4843_v61  ;;  %v4886_v12 = vpack.i.bf16 %v4838_v59, %v4843_v61 }
 0x241   :  { %v351_v62 = vpop.f32.mrf.mxu1 }
 0x242   :  { %v4848_v63 = vadd.f32 %v4835_v57, %v351_v62 }
 0x244   :  { %506 = vrot.lane.b32.xlu1 %v4848_v63, %s4580_s5  ;;  %372 = vrot.lane.b32.xlu0 %v4848_v63, %s4579_s26  ;;  %v4872_v6 = vmul.f32 0.35355338, %v4848_v63 }
 0x26e   :  { %185 = vadd.xlane.f32.xlu1 %v184_v0 }
 0x287   :  { %760 = vrot.lane.b32.xlu1 %v4843_v61, %s4581_s22 }
 0x28b   :  { %v369_v3 = vpop.permute.xlu2 %368 }
 0x2ab   :  { %v371_v2 = vpop.permute.xlu1 %370 }
 0x2b6   :  { %v373_v1 = vpop.permute.xlu0 %372  ;;  %v507_v13 = vpop.permute.xlu1 %506 }
 0x2b7   :  { %3930 = vmatpush.xpose.msk.msra.mxu2 %vm374_vm14, %v373_v1 }
 0x2bb   :  { %3931 = vmatpush.xpose.msk.msra.mxu2 %vm374_vm14, %v371_v2 }
 0x2bf   :  { %3932 = vmatpush.xpose.msk.msra.mxu2 %vm374_vm14, %v369_v3 }
 0x2c2   :  { %3933 = vmatmul.msk.f32.vlgmr.msra.gmra.mxu2 %vm374_vm14, %v4862_v4 }
 0x2ca   :  { %3934 = vmatmul.msk.f32.gmra.mxu2 %vm374_vm14, %v4867_v5 }
 0x2d2   :  { %3935 = vmatmul.msk.f32.gmra.mxu2 %vm374_vm14, %v4872_v6 }
 0x2e1   :  { %v186_v14 = vpop.xlane.xlu1 %185 }
 0x2e2   :  { %v198_v15 = vmul.f32 %v4782_v54, %v186_v14 }
 0x2e4   :  { %v4900_v16 = vsub.f32 %v4777_v46, %v198_v15 }
 0x2e6   :  { %v208_v18 = vmul.f32 %v4900_v16, %v4900_v16 }
 0x2e8   :  { %v221_v20 = vsel %vm183_vm13, %v208_v18, 0.0 }
 0x2f9   :  { %v761_v56 = vpop.permute.xlu1 %760 }
 0x345   :  { %v4876_v7 = vpop.f32.mrf.mxu2 }
 0x346   :  { %v417_v21 = vsel %vm416_vm15, %v4876_v7, -inf }
 0x34d   :  { %v410_v8 = vpop.f32.mrf.mxu2 }
 0x34e   :  { %v420_v9 = vsel %vm416_vm15, %v410_v8, -inf }
 0x34f   :  { %421 = vmax.xlane.f32.xlu0 %v420_v9 }
 0x355   :  { %v413_v10 = vpop.f32.mrf.mxu2 }
 0x356   :  { %v424_v11 = vsel %vm423_vm3, %v413_v10, -inf }
 0x357   :  { %425 = vmax.xlane.f32.xlu2 %v424_v11 }
 0x363   :  { %455 = vrot.lane.b32.xlu0 %v4848_v63, %s6474_s23 }
 0x36b   :  { %504 = vrot.lane.b32.xlu0 %v4843_v61, %s4580_s5 }
 0x36f   :  { %4177 = vrot.lane.b32.xlu2 %v4886_v12, %s6474_s23 }
 0x373   :  { %502 = vrot.lane.b32.xlu0 %v4838_v59, %s4580_s5 }
 0x37b   :  { %496 = vrot.lane.b32.xlu0 %v4862_v4, %s4583_s1 }
 0x383   :  { %498 = vrot.lane.b32.xlu0 %v4867_v5, %s4583_s1 }
 0x38b   :  { %500 = vrot.lane.b32.xlu0 %v4872_v6, %s4583_s1 }
 0x398   :  { %181 = vadd.xlane.f32.xlu2 %v180_v17 }
 0x3a0   :  { %222 = vadd.xlane.f32.xlu2 %v221_v20 }
 0x3a8   :  { %418 = vmax.xlane.f32.xlu2 %v417_v21 }
 0x3c0   :  { %762 = vrot.lane.b32.xlu2 %v4848_v63, %s4581_s22 }
 0x3c2   :  { %v422_v22 = vpop.xlane.xlu0 %421 }
 0x3c3   :  { %v428_v23 = vsub.f32 %v410_v8, %v422_v22 }
 0x3c5   :  { %v432_v24 = vmul.f32 1.442695, %v428_v23 }
 0x3c7   :  { %4284 = vpow2.f32 %v432_v24 }
 0x3ca   :  { %v426_v25 = vpop.xlane.xlu2 %425 }
 0x3cb   :  { %v429_v27 = vsub.f32 %v413_v10, %v426_v25 }
 0x3cd   :  { %v4285_v29 = vpop.eup %4284  ;;  %v434_v30 = vmul.f32 1.442695, %v429_v27 }
 0x3ce   :  { %v439_v31 = vsel %vm416_vm15, %v4285_v29, 0.0 }
 0x3cf   :  { %4286 = vpow2.f32 %v434_v30  ;;  %440 = vadd.xlane.f32.xlu1 %v439_v31 }
 0x3d2   :  { %v4178_v32 = vpop.permute.xlu2 %4177 }
 0x3d3   :  { %v4179_v37 = vunpack.i.l.bf16 %v4178_v32  ;;  %v4180_v39 = vunpack.i.h.bf16 %v4178_v32 }
 0x3d5   :  { %v4287_v34 = vpop.eup %4286  ;;  %v456_v35 = vpop.permute.xlu0 %455 }
 0x3d6   :  { %3936 = vmatpush.msk.msrb.mxu2 %vm133_vm1, %v456_v35  ;;  %4154 = vmatpush.msk.msra.mxu3 %vm133_vm1, %v456_v35  ;;  %v442_v36 = vsel %vm423_vm3, %v4287_v34, 0.0 }
 0x3d7   :  { %443 = vadd.xlane.f32.xlu1 %v442_v36 }
 0x3d8   :  { %484 = vmatpush.msrb.mxu2 %v4179_v37  ;;  %4155 = vmatpush.msra.mxu3 %v4179_v37 }
 0x3da   :  { %485 = vmatpush.msrb.mxu2 %v4180_v39  ;;  %4156 = vmatpush.msra.mxu3 %v4180_v39 }
 0x3dc   :  { %3940 = vmatpush.xpose.msk.msrb.mxu3 %vm374_vm14, %v507_v13 }
 0x3dd   :  { %v505_v40 = vpop.permute.xlu0 %504 }
 0x3e0   :  { %3941 = vmatpush.xpose.msk.msrb.mxu3 %vm374_vm14, %v505_v40 }
 0x3e5   :  { %v503_v41 = vpop.permute.xlu0 %502 }
 0x3e6   :  { %3942 = vmatpush.xpose.msk.msrb.mxu3 %vm374_vm14, %v503_v41 }
 0x3ed   :  { %v497_v2 = vpop.permute.xlu0 %496 }
 0x3f0   :  { %758 = vrot.lane.b32.xlu1 %v4838_v59, %s4581_s22 }
 0x3f5   :  { %v499_v3 = vpop.permute.xlu0 %498 }
 0x3f8   :  { %752 = vrot.lane.b32.xlu1 %v4862_v4, %s6478_s24 }
 0x3fd   :  { %v501_v8 = vpop.permute.xlu0 %500 }
 0x400   :  { %632 = vrot.lane.b32.xlu1 %v4843_v61, %s4585_s2 }
 0x408   :  { %630 = vrot.lane.b32.xlu1 %v4838_v59, %s4585_s2 }
 0x40b   :  { %v182_v42 = vpop.xlane.xlu2 %181 }
 0x40c   :  { %v197_v43 = vmul.f32 %v4782_v54, %v182_v42 }
 0x40e   :  { %v4928_v44 = vsub.f32 %v4780_v47, %v197_v43 }
 0x410   :  { %754 = vrot.lane.b32.xlu1 %v4867_v5, %s6478_s24  ;;  %v207_v45 = vmul.f32 %v4928_v44, %v4928_v44 }
 0x412   :  { %v218_v48 = vsel %vm170_vm2, %v207_v45, 0.0 }
 0x413   :  { %219 = vadd.xlane.f32.xlu0 %v218_v48  ;;  %v223_v49 = vpop.xlane.xlu2 %222 }
 0x414   :  { %v228_v10 = vmul.f32 %v223_v49, %v4782_v54 }
 0x416   :  { %v233_v13 = vadd.f32 1e-05, %v228_v10 }
 0x418   :  { %vm280_vm8 = vweird.f32 %v233_v13 }
 0x41b   :  { %v419_v50 = vpop.xlane.xlu2 %418 }
 0x41c   :  { %v427_v51 = vsub.f32 %v4876_v7, %v419_v50 }
 0x41e   :  { %v430_v52 = vmul.f32 1.442695, %v427_v51 }
 0x420   :  { %4288 = vpow2.f32 %v430_v52 }
 0x423   :  { %v763_v62 = vpop.permute.xlu2 %762 }
 0x426   :  { %v4936_v53 = vpop.eup %4288 }
 0x427   :  { %583 = vrot.lane.b32.xlu0 %v4848_v63, %s6476_s25  ;;  %v436_v55 = vsel %vm416_vm15, %v4936_v53, 0.0 }
 0x428   :  { %437 = vadd.xlane.f32.xlu2 %v436_v55 }
 0x42f   :  { %4182 = vrot.lane.b32.xlu0 %v4886_v12, %s6476_s25 }
 0x437   :  { %634 = vrot.lane.b32.xlu0 %v4848_v63, %s4585_s2 }
 0x440   :  { %624 = vrot.lane.b32.xlu2 %v4862_v4, %s6480_s27 }
 0x442   :  { %v441_v58 = vpop.xlane.xlu1 %440 }
 0x443   :  { %4290 = vrcp.f32 %v441_v58 }
 0x448   :  { %628 = vrot.lane.b32.xlu2 %v4872_v6, %s6480_s27 }
 0x449   :  { %v4291_v59 = vpop.eup %4290 }
 0x44a   :  { %v444_v60 = vpop.xlane.xlu1 %443  ;;  %v449_v61 = vmul.f32 %v4291_v59, %v4285_v29 }
 0x44b   :  { %4292 = vrcp.f32 %v444_v60 }
 0x44c   :  { %3938 = vmatmul.msk.f32.vlgmr.msra.gmra.mxu3 %vm416_vm15, %v449_v61  ;;  %4294 = vrsqrt.f32 %v233_v13 }
 0x44d   :  { %3960 = vmatpush.xpose.msk.msra.mxu3 %vm374_vm14, %v763_v62 }
 0x451   :  { %v4293_v0 = vpop.eup %4292  ;;  %3961 = vmatpush.xpose.msk.msra.mxu3 %vm374_vm14, %v761_v56 }
 0x452   :  { %v450_v1 = vmul.f32 %v4293_v0, %v4287_v34  ;;  %v4295_v17 = vpop.eup %4294  ;;  %v930_v0 = vrot.slane %v4872_v6, 1 }
 0x453   :  { %v275_v21 = vmul.f32 %v4295_v17, %v233_v13  ;;  %vm281_vm5 = vweird.f32 %v4295_v17 }
 0x454   :  { %3939 = vmatmul.msk.f32.gmra.mxu3 %vm416_vm15, %v450_v1  ;;  %vm282_vm9 = vmor %vm280_vm8, %vm281_vm5 }
 0x455   :  { %v276_v22 = vmul.f32 %v4295_v17, %v275_v21 }
 0x457   :  { %v277_v24 = vmul.f32 0.5, %v276_v22 }
 0x459   :  { %v278_v29 = vsub.f32 1.5, %v277_v24 }
 0x45b   :  { %v279_v34 = vmul.f32 %v4295_v17, %v278_v29 }
 0x45c   :  { %3943 = vmatmul.msk.f32.vlgmr.msrb.gmra.mxu3 %vm374_vm14, %v497_v2 }
 0x45d   :  { %v283_v40 = vsel %vm282_vm9, %v4295_v17, %v279_v34 }
 0x45e   :  { %v288_v45 = vmul.f32 %v283_v40, %v4900_v16 }
 0x462   :  { %v759_v4 = vpop.permute.xlu1 %758 }
 0x463   :  { %3962 = vmatpush.xpose.msk.msra.mxu3 %vm374_vm14, %v759_v4 }
 0x464   :  { %3944 = vmatmul.msk.f32.gmra.mxu3 %vm374_vm14, %v499_v3 }
 0x46a   :  { %v753_v7 = vpop.permute.xlu1 %752 }
 0x46c   :  { %3945 = vmatmul.msk.f32.gmra.mxu3 %vm374_vm14, %v501_v8 }
 0x472   :  { %v633_v9 = vpop.permute.xlu1 %632 }
 0x474   :  { %3963 = vmatmul.msk.f32.vlgmr.msra.gmra.mxu3 %vm374_vm14, %v753_v7 }
 0x47a   :  { %v631_v11 = vpop.permute.xlu1 %630 }
 0x482   :  { %v755_v14 = vpop.permute.xlu1 %754 }
 0x483   :  { %3964 = vmatmul.msk.f32.gmra.mxu3 %vm374_vm14, %v755_v14 }
 0x486   :  { %v220_v15 = vpop.xlane.xlu0 %219 }
 0x487   :  { %v227_v18 = vmul.f32 %v220_v15, %v4782_v54 }
 0x489   :  { %v232_v20 = vadd.f32 1e-05, %v227_v18 }
 0x48b   :  { %4296 = vrsqrt.f32 %v232_v20  ;;  %vm270_vm6 = vweird.f32 %v232_v20 }
 0x491   :  { %v4297_v23 = vpop.eup %4296 }
 0x492   :  { %v265_v25 = vmul.f32 %v4297_v23, %v232_v20  ;;  %vm271_vm4 = vweird.f32 %v4297_v23 }
 0x493   :  { %vm272_vm7 = vmor %vm270_vm6, %vm271_vm4 }
 0x494   :  { %v266_v27 = vmul.f32 %v4297_v23, %v265_v25 }
 0x496   :  { %v267_v30 = vmul.f32 0.5, %v266_v27 }
 0x498   :  { %v268_v31 = vsub.f32 1.5, %v267_v30 }
 0x499   :  { %v584_v32 = vpop.permute.xlu0 %583 }
 0x49a   :  { %v269_v35 = vmul.f32 %v4297_v23, %v268_v31  ;;  %3946 = vmatpush.msk.msra.mxu2 %vm133_vm1, %v584_v32 }
 0x49b   :  { %v438_v36 = vpop.xlane.xlu2 %437 }
 0x49c   :  { %4298 = vrcp.f32 %v438_v36  ;;  %v273_v37 = vsel %vm272_vm7, %v4297_v23, %v269_v35 }
 0x49d   :  { %v287_v39 = vmul.f32 %v273_v37, %v4928_v44  ;;  %v296_v44 = vmul.f32 %v4815_v28, %v288_v45 }
 0x49f   :  { %v295_v41 = vmul.f32 %v4815_v28, %v287_v39  ;;  %v304_v55 = vadd.f32 %v4820_v33, %v296_v44 }
 0x4a1   :  { %v4183_v42 = vpop.permute.xlu0 %4182  ;;  %v303_v43 = vadd.f32 %v4820_v33, %v295_v41 }
 0x4a2   :  { %v4299_v48 = vpop.eup %4298  ;;  %v4184_v49 = vunpack.i.l.bf16 %v4183_v42  ;;  %v4185_v51 = vunpack.i.h.bf16 %v4183_v42 }
 0x4a3   :  { %3928 = vmatmul.msk.f32.gmra.mxu1 %vm170_vm2, %v303_v43  ;;  %v448_v50 = vmul.f32 %v4299_v48, %v4936_v53  ;;  %v625_v16 = vpop.permute.xlu2 %624 }
 0x4a4   :  { %612 = vmatpush.msra.mxu2 %v4184_v49 }
 0x4a5   :  { %3937 = vmatmul.msk.f32.vlgmr.msrb.gmra.mxu2 %vm416_vm15, %v448_v50 }
 0x4a6   :  { %613 = vmatpush.msra.mxu2 %v4185_v51 }
 0x4a9   :  { %v635_v52 = vpop.permute.xlu0 %634 }
 0x4aa   :  { %3950 = vmatpush.xpose.msk.msrb.mxu0 %vm374_vm14, %v635_v52  ;;  %4157 = vmatpush.xpose.msk.msrb.mxu2 %vm374_vm14, %v635_v52 }
 0x4ab   :  { %3929 = vmatmul.msk.f32.gmra.mxu1 %vm170_vm2, %v304_v55 }
 0x4ae   :  { %3951 = vmatpush.xpose.msk.msrb.mxu0 %vm374_vm14, %v633_v9  ;;  %4158 = vmatpush.xpose.msk.msrb.mxu2 %vm374_vm14, %v633_v9 }
 0x4b2   :  { %3952 = vmatpush.xpose.msk.msrb.mxu0 %vm374_vm14, %v631_v11  ;;  %4159 = vmatpush.xpose.msk.msrb.mxu2 %vm374_vm14, %v631_v11  ;;  %v5040_v11 = vpop.permute.xlu2 %628 }
 0x4b5   :  { %3953 = vmatmul.msk.f32.vlgmr.msrb.gmra.mxu0 %vm374_vm14, %v625_v16 }
 0x520   :  { %v354_v28 = vpop.f32.mrf.mxu1 }
 0x521   :  { %v355_v33 = vadd.f32 %v4835_v57, %v354_v28 }
 0x523   :  { %v938_v58 = vrot.slane %v355_v33, 1  ;;  %v363_v60 = vmul.f32 0.35355338, %v355_v33 }
 0x525   :  { %v931_v62 = vrot.slane %v363_v60, 1 }
 0x527   :  { %v932_v3 = vsel %vm929_vm10, %v930_v0, %v931_v62 }
 0x528   :  { %v357_v53 = vpop.f32.mrf.mxu1 }
 0x529   :  { %v358_v56 = vadd.f32 %v4835_v57, %v357_v53  ;;  %v937_v57 = vrot.slane %v4848_v63, 1 }
 0x52b   :  { %v4982_v59 = vrot.slane %v358_v56, 1  ;;  %v4997_v1 = vsel %vm929_vm10, %v937_v57, %v938_v58  ;;  %v364_v2 = vmul.f32 0.35355338, %v358_v56 }
 0x52d   :  { %1074 = vrot.lane.b32.xlu1 %v4982_v59, %s4580_s5  ;;  %946 = vrot.lane.b32.xlu2 %v4982_v59, %s4579_s26  ;;  %v4990_v61 = vsel %vm929_vm10, %v938_v58, %v4982_v59  ;;  %v5005_v4 = vrot.slane %v364_v2, 1 }
 0x52e   :  { %1072 = vrot.lane.b32.xlu0 %v4990_v61, %s4580_s5 }
 0x52f   :  { %v5013_v7 = vsel %vm929_vm10, %v931_v62, %v5005_v4 }
 0x532   :  { %v5093_v60 = vpop.f32.mrf.mxu0 }
 0x535   :  { %756 = vrot.lane.b32.xlu1 %v4872_v6, %s6478_s24  ;;  %942 = vrot.lane.b32.xlu2 %v4997_v1, %s4579_s26 }
 0x536   :  { %1064 = vrot.lane.b32.xlu0 %v932_v3, %s4583_s1 }
 0x53d   :  { %626 = vrot.lane.b32.xlu1 %v4867_v5, %s6480_s27  ;;  %1068 = vrot.lane.b32.xlu2 %v5005_v4, %s4583_s1  ;;  %v5023_v5 = vpop.f32.mrf.mxu3 }
 0x53e   :  { %1066 = vrot.lane.b32.xlu0 %v5013_v7, %s4583_s1 }
 0x545   :  { %1070 = vrot.lane.b32.xlu1 %v4997_v1, %s4580_s5  ;;  %1202 = vrot.lane.b32.xlu2 %v4982_v59, %s4585_s2  ;;  %v5030_v6 = vpop.f32.mrf.mxu3 }
 0x546   :  { %1328 = vrot.lane.b32.xlu0 %v4990_v61, %s4581_s22 }
 0x54d   :  { %944 = vrot.lane.b32.xlu1 %v4990_v61, %s4579_s26  ;;  %v5035_v8 = vpop.f32.mrf.mxu3 }
 0x54e   :  { %1320 = vrot.lane.b32.xlu0 %v932_v3, %s6478_s24  ;;  %v546_v14 = vsel %vm416_vm15, %v5035_v8, -inf }
 0x555   :  { %1330 = vrot.lane.b32.xlu1 %v4982_v59, %s4581_s22  ;;  %v540_v9 = vpop.f32.mrf.mxu3 }
 0x556   :  { %1192 = vrot.lane.b32.xlu0 %v932_v3, %s6480_s27  ;;  %v549_v10 = vsel %vm416_vm15, %v540_v9, -inf }
 0x55d   :  { %1326 = vrot.lane.b32.xlu1 %v4997_v1, %s4581_s22  ;;  %v543_v15 = vpop.f32.mrf.mxu3 }
 0x55e   :  { %v552_v17 = vsel %vm423_vm3, %v543_v15, -inf }
 0x565   :  { %1200 = vrot.lane.b32.xlu1 %v4990_v61, %s4585_s2  ;;  %v5089_v58 = vpop.f32.mrf.mxu3 }
 0x566   :  { %v802_v57 = vsel %vm416_vm15, %v5089_v58, -inf }
 0x56d   :  { %v5097_v62 = vpop.f32.mrf.mxu3 }
 0x56e   :  { %550 = vmax.xlane.f32.xlu2 %v549_v10 }
 0x586   :  { %1198 = vrot.lane.b32.xlu2 %v4997_v1, %s4585_s2 }
 0x587   :  { %v947_v13 = vpop.permute.xlu2 %946 }
 0x588   :  { %3970 = vmatpush.xpose.msk.msra.mxu0 %vm374_vm14, %v947_v13 }
 0x58f   :  { %547 = vmax.xlane.f32.xlu1 %v546_v14  ;;  %v943_v23 = vpop.permute.xlu2 %942 }
 0x597   :  { %553 = vmax.xlane.f32.xlu1 %v552_v17  ;;  %v1069_v27 = vpop.permute.xlu2 %1068  ;;  %v674_v17 = vsel %vm416_vm15, %v5093_v60, -inf }
 0x59f   :  { %v1075_v18 = vpop.permute.xlu1 %1074  ;;  %v1203_v31 = vpop.permute.xlu2 %1202 }
 0x5a0   :  { %3980 = vmatpush.xpose.msk.msrb.mxu3 %vm374_vm14, %v1075_v18  ;;  %v1073_v20 = vpop.permute.xlu0 %1072 }
 0x5a4   :  { %3981 = vmatpush.xpose.msk.msrb.mxu3 %vm374_vm14, %v1073_v20 }
 0x5a7   :  { %v757_v21 = vpop.permute.xlu1 %756 }
 0x5a8   :  { %3965 = vmatmul.msk.f32.gmra.mxu3 %vm374_vm14, %v757_v21  ;;  %v1065_v24 = vpop.permute.xlu0 %1064 }
 0x5af   :  { %v627_v22 = vpop.permute.xlu1 %626 }
 0x5b0   :  { %3954 = vmatmul.msk.f32.gmra.mxu0 %vm374_vm14, %v627_v22  ;;  %1322 = vrot.lane.b32.xlu1 %v5013_v7, %s6478_s24  ;;  %v1067_v29 = vpop.permute.xlu0 %1066 }
 0x5b7   :  { %v1071_v25 = vpop.permute.xlu1 %1070 }
 0x5b8   :  { %3982 = vmatpush.xpose.msk.msrb.mxu3 %vm374_vm14, %v1071_v25  ;;  %v1329_v34 = vpop.permute.xlu0 %1328 }
 0x5bb   :  { %3983 = vmatmul.msk.f32.vlgmr.msrb.gmra.mxu3 %vm374_vm14, %v1065_v24 }
 0x5bf   :  { %v945_v30 = vpop.permute.xlu1 %944 }
 0x5c0   :  { %3971 = vmatpush.xpose.msk.msra.mxu0 %vm374_vm14, %v945_v30  ;;  %v1321_v36 = vpop.permute.xlu0 %1320 }
 0x5c3   :  { %3984 = vmatmul.msk.f32.gmra.mxu3 %vm374_vm14, %v1067_v29 }
 0x5c4   :  { %3972 = vmatpush.xpose.msk.msra.mxu0 %vm374_vm14, %v943_v23 }
 0x5c7   :  { %v1331_v32 = vpop.permute.xlu1 %1330  ;;  %3973 = vmatmul.msk.f32.vlgmr.msra.gmra.mxu0 %vm374_vm14, %v932_v3 }
 0x5c8   :  { %3990 = vmatpush.xpose.msk.msrb.mxu0 %vm374_vm14, %v1203_v31  ;;  %4000 = vmatpush.xpose.msk.msra.mxu3 %vm374_vm14, %v1331_v32  ;;  %v1193_v45 = vpop.permute.xlu0 %1192 }
 0x5cb   :  { %3985 = vmatmul.msk.f32.gmra.mxu3 %vm374_vm14, %v1069_v27 }
 0x5cc   :  { %4001 = vmatpush.xpose.msk.msra.mxu3 %vm374_vm14, %v1329_v34 }
 0x5cf   :  { %v1327_v35 = vpop.permute.xlu1 %1326  ;;  %3974 = vmatmul.msk.f32.gmra.mxu0 %vm374_vm14, %v5013_v7 }
 0x5d0   :  { %4002 = vmatpush.xpose.msk.msra.mxu3 %vm374_vm14, %v1327_v35 }
 0x5d3   :  { %4003 = vmatmul.msk.f32.vlgmr.msra.gmra.mxu3 %vm374_vm14, %v1321_v36 }
 0x5d7   :  { %v1201_v37 = vpop.permute.xlu1 %1200  ;;  %3975 = vmatmul.msk.f32.gmra.mxu0 %vm374_vm14, %v5005_v4 }
 0x5d8   :  { %3991 = vmatpush.xpose.msk.msrb.mxu0 %vm374_vm14, %v1201_v37 }
 0x5e1   :  { %v551_v39 = vpop.xlane.xlu2 %550 }
 0x5e2   :  { %v556_v40 = vsub.f32 %v540_v9, %v551_v39 }
 0x5e4   :  { %v560_v41 = vmul.f32 1.442695, %v556_v40 }
 0x5e6   :  { %4300 = vpow2.f32 %v560_v41 }
 0x5e9   :  { %v1199_v42 = vpop.permute.xlu2 %1198 }
 0x5ea   :  { %3992 = vmatpush.xpose.msk.msrb.mxu0 %vm374_vm14, %v1199_v42 }
 0x5ec   :  { %v5072_v43 = vpop.eup %4300 }
 0x5ed   :  { %3993 = vmatmul.msk.f32.vlgmr.msrb.gmra.mxu0 %vm374_vm14, %v1193_v45  ;;  %v567_v48 = vsel %vm416_vm15, %v5072_v43, 0.0 }
 0x5ee   :  { %568 = vadd.xlane.f32.xlu2 %v567_v48 }
 0x602   :  { %v548_v49 = vpop.xlane.xlu1 %547 }
 0x603   :  { %v555_v50 = vsub.f32 %v5035_v8, %v548_v49 }
 0x605   :  { %v558_v51 = vmul.f32 1.442695, %v555_v50 }
 0x606   :  { %1324 = vrot.lane.b32.xlu2 %v5005_v4, %s6478_s24 }
 0x607   :  { %4302 = vpow2.f32 %v558_v51 }
 0x60a   :  { %v554_v44 = vpop.xlane.xlu1 %553 }
 0x60b   :  { %v557_v52 = vsub.f32 %v543_v15, %v554_v44  ;;  %v805_v15 = vsel %vm416_vm15, %v5097_v62, -inf }
 0x60d   :  { %v5080_v55 = vpop.eup %4302  ;;  %v562_v16 = vmul.f32 1.442695, %v557_v52 }
 0x60e   :  { %v564_v28 = vsel %vm416_vm15, %v5080_v55, 0.0 }
 0x60f   :  { %4304 = vpow2.f32 %v562_v16  ;;  %565 = vadd.xlane.f32.xlu1 %v564_v28 }
 0x615   :  { %v5084_v33 = vpop.eup %4304 }
 0x616   :  { %v570_v53 = vsel %vm423_vm3, %v5084_v33, 0.0 }
 0x617   :  { %571 = vadd.xlane.f32.xlu0 %v570_v53 }
 0x622   :  { %v1323_v56 = vpop.permute.xlu1 %1322 }
 0x623   :  { %4004 = vmatmul.msk.f32.gmra.mxu3 %vm374_vm14, %v1323_v56 }
 0x628   :  { %1196 = vrot.lane.b32.xlu1 %v5005_v4, %s6480_s27 }
 0x62b   :  { %1194 = vrot.lane.b32.xlu0 %v5013_v7, %s6480_s27  ;;  %v5103_v2 = vpop.f32.mrf.mxu3 }
 0x62c   :  { %v808_v22 = vsel %vm423_vm3, %v5103_v2, -inf }
 0x62d   :  { %v5101_v0 = vpop.f32.mrf.mxu0 }
 0x62e   :  { %v677_v3 = vsel %vm416_vm15, %v5101_v0, -inf }
 0x62f   :  { %803 = vmax.xlane.f32.xlu2 %v802_v57 }
 0x637   :  { %678 = vmax.xlane.f32.xlu2 %v677_v3 }
 0x63e   :  { %v5107_v4 = vpop.f32.mrf.mxu3 }
 0x63f   :  { %v1114_v8 = vsel %vm416_vm15, %v5107_v4, -inf }
 0x640   :  { %1115 = vmax.xlane.f32.xlu2 %v1114_v8 }
 0x644   :  { %v5111_v7 = vpop.f32.mrf.mxu0 }
 0x645   :  { %v986_v27 = vsel %vm416_vm15, %v5111_v7, -inf }
 0x646   :  { %v5113_v9 = vpop.f32.mrf.mxu3 }
 0x647   :  { %v1117_v21 = vsel %vm416_vm15, %v5113_v9, -inf }
 0x64c   :  { %v5115_v10 = vpop.f32.mrf.mxu0 }
 0x64d   :  { %v989_v13 = vsel %vm416_vm15, %v5115_v10, -inf }
 0x64e   :  { %990 = vmax.xlane.f32.xlu2 %v989_v13  ;;  %v5119_v14 = vpop.f32.mrf.mxu3 }
 0x64f   :  { %v1120_v32 = vsel %vm423_vm3, %v5119_v14, -inf }
 0x652   :  { %806 = vmax.xlane.f32.xlu1 %v805_v15 }
 0x654   :  { %v5133_v23 = vpop.f32.mrf.mxu0 }
 0x655   :  { %675 = vmax.xlane.f32.xlu0 %v674_v17  ;;  %v992_v25 = vsel %vm423_vm3, %v5133_v23, -inf }
 0x656   :  { %v5125_v18 = vpop.f32.mrf.mxu3 }
 0x657   :  { %v1370_v20 = vsel %vm416_vm15, %v5125_v18, -inf }
 0x658   :  { %1371 = vmax.xlane.f32.xlu2 %v1370_v20 }
 0x65a   :  { %1118 = vmax.xlane.f32.xlu1 %v1117_v21 }
 0x65d   :  { %809 = vmax.xlane.f32.xlu0 %v808_v22 }
 0x661   :  { %v569_v24 = vpop.xlane.xlu2 %568 }
 0x662   :  { %993 = vmax.xlane.f32.xlu1 %v992_v25 }
 0x665   :  { %987 = vmax.xlane.f32.xlu0 %v986_v27 }
 0x669   :  { %v1325_v29 = vpop.permute.xlu2 %1324 }
 0x66a   :  { %v5139_v30 = vpop.f32.mrf.mxu0  ;;  %4005 = vmatmul.msk.f32.gmra.mxu3 %vm374_vm14, %v1325_v29 }
 0x66b   :  { %v1242_v31 = vsel %vm416_vm15, %v5139_v30, -inf }
 0x66c   :  { %1243 = vmax.xlane.f32.xlu1 %v1242_v31 }
 0x66d   :  { %1121 = vmax.xlane.f32.xlu0 %v1120_v32 }
 0x681   :  { %839 = vrot.lane.b32.xlu0 %v4848_v63, %s6470_s3 }
 0x682   :  { %v566_v34 = vpop.xlane.xlu1 %565 }
 0x683   :  { %4306 = vrcp.f32 %v566_v34 }
 0x684   :  { %4308 = vrcp.f32 %v569_v24 }
 0x685   :  { %4187 = vrot.lane.b32.xlu1 %v4886_v12, %s6470_s3 }
 0x689   :  { %v4307_v35 = vpop.eup %4306  ;;  %4192 = vrot.lane.b32.xlu0 %v4886_v12, %s6472_s28 }
 0x68a   :  { %v576_v36 = vmul.f32 %v4307_v35, %v5080_v55  ;;  %v572_v37 = vpop.xlane.xlu0 %571  ;;  %v4309_v39 = vpop.eup %4308 }
 0x68b   :  { %4310 = vrcp.f32 %v572_v37  ;;  %v577_v40 = vmul.f32 %v4309_v39, %v5072_v43 }
 0x68c   :  { %3947 = vmatmul.msk.f32.vlgmr.msra.gmra.mxu2 %vm416_vm15, %v576_v36 }
 0x691   :  { %v4311_v41 = vpop.eup %4310 }
 0x692   :  { %v578_v42 = vmul.f32 %v4311_v41, %v5084_v33 }
 0x694   :  { %3948 = vmatmul.msk.f32.gmra.mxu2 %vm416_vm15, %v577_v40 }
 0x69a   :  { %v1197_v48 = vpop.permute.xlu1 %1196 }
 0x69c   :  { %3949 = vmatmul.msk.f32.gmra.mxu2 %vm416_vm15, %v578_v42  ;;  %v5207_v42 = vpop.f32.mrf.mxu2 }
 0x69d   :  { %v1195_v45 = vpop.permute.xlu0 %1194 }
 0x69e   :  { %3994 = vmatmul.msk.f32.gmra.mxu0 %vm374_vm14, %v1195_v45 }
 0x6a2   :  { %v804_v12 = vpop.xlane.xlu2 %803 }
 0x6a3   :  { %v811_v15 = vsub.f32 %v5089_v58, %v804_v12 }
 0x6a4   :  { %3955 = vmatmul.msk.f32.vlgmr.msrb.gmra.mxu2 %vm374_vm14, %v5040_v11 }
 0x6a5   :  { %v814_v21 = vmul.f32 1.442695, %v811_v15 }
 0x6a6   :  { %3995 = vmatmul.msk.f32.gmra.mxu0 %vm374_vm14, %v1197_v48 }
 0x6aa   :  { %v679_v49 = vpop.xlane.xlu2 %678 }
 0x6ab   :  { %v684_v43 = vsub.f32 %v5101_v0, %v679_v49 }
 0x6ad   :  { %v688_v50 = vmul.f32 1.442695, %v684_v43 }
 0x6af   :  { %4312 = vpow2.f32 %v688_v50 }
 0x6b3   :  { %v1116_v51 = vpop.xlane.xlu2 %1115 }
 0x6b4   :  { %v1123_v44 = vsub.f32 %v5107_v4, %v1116_v51 }
 0x6b5   :  { %v5164_v52 = vpop.eup %4312 }
 0x6b6   :  { %v1126_v55 = vmul.f32 1.442695, %v1123_v44  ;;  %v695_v16 = vsel %vm416_vm15, %v5164_v52, 0.0 }
 0x6b7   :  { %696 = vadd.xlane.f32.xlu1 %v695_v16  ;;  %v4196_v16 = vpack.i.bf16 %v4997_v1, %v4990_v61 }
 0x6b8   :  { %4314 = vpow2.f32 %v1126_v55 }
 0x6be   :  { %v5168_v11 = vpop.eup %4314 }
 0x6bf   :  { %v1132_v28 = vsel %vm416_vm15, %v5168_v11, 0.0 }
 0x6c0   :  { %1133 = vadd.xlane.f32.xlu1 %v1132_v28 }
 0x6c5   :  { %v807_v3 = vpop.xlane.xlu1 %806 }
 0x6c6   :  { %v812_v41 = vsub.f32 %v5097_v62, %v807_v3  ;;  %v991_v62 = vpop.xlane.xlu2 %990 }
 0x6c7   :  { %v996_v55 = vsub.f32 %v5115_v10, %v991_v62 }
 0x6c8   :  { %v676_v33 = vpop.xlane.xlu0 %675  ;;  %v816_v45 = vmul.f32 1.442695, %v812_v41 }
 0x6c9   :  { %v683_v53 = vsub.f32 %v5093_v60, %v676_v33  ;;  %v1000_v28 = vmul.f32 1.442695, %v996_v55 }
 0x6cb   :  { %v686_v56 = vmul.f32 1.442695, %v683_v53 }
 0x6cd   :  { %4316 = vpow2.f32 %v686_v56  ;;  %v1119_v20 = vpop.xlane.xlu1 %1118  ;;  %v5232_v56 = vpop.f32.mrf.mxu3 }
 0x6ce   :  { %v1124_v58 = vsub.f32 %v5113_v9, %v1119_v20  ;;  %v1372_v33 = vpop.xlane.xlu2 %1371 }
 0x6d0   :  { %v810_v57 = vpop.xlane.xlu0 %809 }
 0x6d1   :  { %v813_v22 = vsub.f32 %v5103_v2, %v810_v57  ;;  %v1128_v2 = vmul.f32 1.442695, %v1124_v58  ;;  %v1379_v57 = vsub.f32 %v5125_v18, %v1372_v33 }
 0x6d3   :  { %v5173_v0 = vpop.eup %4316  ;;  %v818_v25 = vmul.f32 1.442695, %v813_v22  ;;  %v1382_v3 = vmul.f32 1.442695, %v1379_v57 }
 0x6d4   :  { %v692_v4 = vsel %vm416_vm15, %v5173_v0, 0.0 }
 0x6d5   :  { %693 = vadd.xlane.f32.xlu2 %v692_v4  ;;  %v5184_v27 = vpop.xlane.xlu1 %993 }
 0x6d8   :  { %v988_v8 = vpop.xlane.xlu0 %987 }
 0x6d9   :  { %v995_v13 = vsub.f32 %v5111_v7, %v988_v8 }
 0x6db   :  { %v998_v17 = vmul.f32 1.442695, %v995_v13 }
 0x6dd   :  { %4318 = vpow2.f32 %v998_v17 }
 0x6de   :  { %4320 = vpow2.f32 %v814_v21 }
 0x6df   :  { %4322 = vpow2.f32 %v818_v25  ;;  %v5195_v32 = vpop.xlane.xlu1 %1243  ;;  %v997_v25 = vsub.f32 %v5133_v23, %v5184_v27 }
 0x6e0   :  { %v5189_v7 = vpop.xlane.xlu0 %1121  ;;  %4324 = vpow2.f32 %v1128_v2 }
 0x6e1   :  { %4326 = vpow2.f32 %v816_v45  ;;  %v1002_v2 = vmul.f32 1.442695, %v997_v25 }
 0x6e2   :  { %4328 = vpow2.f32 %v1000_v28 }
 0x6e3   :  { %v5179_v60 = vpop.eup %4318  ;;  %4330 = vpow2.f32 %v1382_v3 }
 0x6e4   :  { %v1004_v24 = vsel %vm416_vm15, %v5179_v60, 0.0  ;;  %v5186_v29 = vpop.eup %4320 }
 0x6e5   :  { %1005 = vadd.xlane.f32.xlu0 %v1004_v24  ;;  %v820_v31 = vsel %vm416_vm15, %v5186_v29, 0.0  ;;  %v5197_v34 = vpop.eup %4322 }
 0x6e6   :  { %v826_v9 = vsel %vm423_vm3, %v5197_v34, 0.0  ;;  %v5202_v39 = vpop.eup %4324 }
 0x6e7   :  { %v5213_v48 = vpop.eup %4326 }
 0x6e8   :  { %v823_v49 = vsel %vm416_vm15, %v5213_v48, 0.0  ;;  %v5230_v53 = vpop.eup %4328 }
 0x6e9   :  { %v1007_v10 = vsel %vm416_vm15, %v5230_v53, 0.0  ;;  %v5243_v1 = vpop.eup %4330 }
 0x6ea   :  { %v1388_v18 = vsel %vm416_vm15, %v5243_v1, 0.0 }
 0x6ed   :  { %711 = vrot.lane.b32.xlu2 %v4848_v63, %s6472_s28  ;;  %821 = vadd.xlane.f32.xlu0 %v820_v31  ;;  %v1135_v63 = vsel %vm416_vm15, %v5202_v39, 0.0  ;;  %v5237_v4 = vpop.f32.mrf.mxu3 }
 0x6ee   :  { %v1376_v61 = vsel %vm423_vm3, %v5237_v4, -inf }
 0x6f3   :  { %v840_v35 = vpop.permute.xlu0 %839 }
 0x6f4   :  { %3966 = vmatpush.msk.msra.mxu2 %vm133_vm1, %v840_v35 }
 0x6f5   :  { %827 = vadd.xlane.f32.xlu0 %v826_v9 }
 0x6f7   :  { %v4188_v36 = vpop.permute.xlu1 %4187 }
 0x6f8   :  { %v4189_v37 = vunpack.i.l.bf16 %v4188_v36  ;;  %v4190_v40 = vunpack.i.h.bf16 %v4188_v36  ;;  %v1251_v36 = vsub.f32 %v5139_v30, %v5195_v32 }
 0x6fa   :  { %868 = vmatpush.msra.mxu2 %v4189_v37  ;;  %v1254_v27 = vmul.f32 1.442695, %v1251_v36  ;;  %v1125_v37 = vsub.f32 %v5119_v14, %v5189_v7  ;;  %v1373_v14 = vsel %vm416_vm15, %v5232_v56, -inf }
 0x6fb   :  { %v4193_v13 = vpop.permute.xlu0 %4192 }
 0x6fc   :  { %869 = vmatpush.msra.mxu2 %v4190_v40  ;;  %v4194_v21 = vunpack.i.l.bf16 %v4193_v13  ;;  %v4195_v22 = vunpack.i.h.bf16 %v4193_v13 }
 0x6fd   :  { %1136 = vadd.xlane.f32.xlu0 %v1135_v63 }
 0x70f   :  { %v5209_v12 = vpop.f32.mrf.mxu2 }
 0x711   :  { %1023 = vrot.lane.b32.xlu0 %v4982_v59, %s6474_s23 }
 0x716   :  { %824 = vadd.xlane.f32.xlu2 %v823_v49 }
 0x717   :  { %v5217_v43 = vpop.f32.mrf.mxu2 }
 0x71b   :  { %v5254_v35 = vpop.f32.mrf.mxu0 }
 0x71c   :  { %v1245_v23 = vsel %vm416_vm15, %v5254_v35, -inf }
 0x71f   :  { %v5219_v50 = vpop.f32.mrf.mxu2 }
 0x727   :  { %v5221_v51 = vpop.f32.mrf.mxu2 }
 0x728   :  { %v680_v44 = vsel %vm423_vm3, %v5221_v51, -inf }
 0x729   :  { %681 = vmax.xlane.f32.xlu1 %v680_v44 }
 0x72a   :  { %v697_v15 = vpop.xlane.xlu1 %696 }
 0x72e   :  { %4197 = vrot.lane.b32.xlu2 %v4196_v16, %s6476_s25 }
 0x733   :  { %v1134_v3 = vpop.xlane.xlu1 %1133 }
 0x736   :  { %4202 = vrot.lane.b32.xlu2 %v4196_v16, %s6474_s23  ;;  %s6506_s23 = smov 24  }
 0x73b   :  { %1008 = vadd.xlane.f32.xlu0 %v1007_v10 }
 0x742   :  { %1151 = vrot.lane.b32.xlu1 %v4982_v59, %s6476_s25 }
 0x743   :  { %1377 = vmax.xlane.f32.xlu0 %v1376_v61 }
 0x748   :  { %v694_v8 = vpop.xlane.xlu2 %693 }
 0x749   :  { %4332 = vrcp.f32 %v694_v8 }
 0x74a   :  { %4334 = vrcp.f32 %v697_v15 }
 0x74b   :  { %1389 = vadd.xlane.f32.xlu0 %v1388_v18  ;;  %4336 = vpow2.f32 %v1002_v2 }
 0x74f   :  { %v4333_v20 = vpop.eup %4332 }
 0x750   :  { %v712_v17 = vpop.permute.xlu2 %711  ;;  %v704_v24 = vmul.f32 %v4333_v20, %v5173_v0  ;;  %v4335_v31 = vpop.eup %4334 }
 0x751   :  { %3956 = vmatpush.msk.msrb.mxu1 %vm133_vm1, %v712_v17  ;;  %v705_v9 = vmul.f32 %v4335_v31, %v5164_v52  ;;  %v5265_v40 = vpop.eup %4336  ;;  %v1130_v52 = vmul.f32 1.442695, %v1125_v37 }
 0x752   :  { %v1010_v30 = vsel %vm423_vm3, %v5265_v40, 0.0 }
 0x753   :  { %740 = vmatpush.msrb.mxu1 %v4194_v21 }
 0x755   :  { %741 = vmatpush.msrb.mxu1 %v4195_v22 }
 0x756   :  { %3957 = vmatmul.msk.f32.vlgmr.msrb.gmra.mxu1 %vm416_vm15, %v704_v24 }
 0x758   :  { %v5252_v58 = vpop.xlane.xlu0 %1005 }
 0x75e   :  { %3958 = vmatmul.msk.f32.gmra.mxu1 %vm416_vm15, %v705_v9 }
 0x75f   :  { %1246 = vmax.xlane.f32.xlu2 %v1245_v23  ;;  %4207 = vrot.lane.b32.xlu0 %v4196_v16, %s6470_s3 }
 0x760   :  { %v822_v0 = vpop.xlane.xlu0 %821 }
 0x761   :  { %4338 = vrcp.f32 %v822_v0 }
 0x762   :  { %4340 = vpow2.f32 %v1254_v27 }
 0x763   :  { %4342 = vpow2.f32 %v1130_v52 }
 0x767   :  { %v4339_v32 = vpop.eup %4338  ;;  %4212 = vrot.lane.b32.xlu0 %v4196_v16, %s6472_s28  ;;  %1011 = vadd.xlane.f32.xlu2 %v1010_v30 }
 0x768   :  { %v832_v63 = vmul.f32 %v4339_v32, %v5186_v29  ;;  %v5272_v41 = vpop.eup %4340  ;;  %v828_v49 = vpop.xlane.xlu0 %827 }
 0x769   :  { %v1260_v7 = vsel %vm416_vm15, %v5272_v41, 0.0  ;;  %v5278_v45 = vpop.eup %4342  ;;  %v5282_v29 = vpop.f32.mrf.mxu0 }
 0x76a   :  { %3967 = vmatmul.msk.f32.vlgmr.msra.gmra.mxu2 %vm416_vm15, %v832_v63  ;;  %v1138_v62 = vsel %vm423_vm3, %v5278_v45, 0.0  ;;  %v1248_v55 = vsel %vm423_vm3, %v5282_v29, -inf }
 0x76c   :  { %1374 = vmax.xlane.f32.xlu1 %v1373_v14 }
 0x76f   :  { %1261 = vadd.xlane.f32.xlu2 %v1260_v7 }
 0x770   :  { %v1137_v44 = vpop.xlane.xlu0 %1136 }
 0x774   :  { %1139 = vadd.xlane.f32.xlu1 %v1138_v62 }
 0x77c   :  { %1249 = vmax.xlane.f32.xlu1 %v1248_v55 }
 0x783   :  { %v1024_v16 = vpop.permute.xlu0 %1023 }
 0x784   :  { %3976 = vmatpush.msk.msra.mxu1 %vm133_vm1, %v1024_v16 }
 0x789   :  { %v825_v28 = vpop.xlane.xlu2 %824 }
 0x78a   :  { %4344 = vrcp.f32 %v825_v28 }
 0x78b   :  { %4346 = vrcp.f32 %v828_v49 }
 0x790   :  { %v4345_v33 = vpop.eup %4344 }
 0x791   :  { %v4198_v57 = vpop.permute.xlu2 %4197  ;;  %v833_v10 = vmul.f32 %v4345_v33, %v5213_v48  ;;  %v4347_v61 = vpop.eup %4346 }
 0x792   :  { %v834_v18 = vmul.f32 %v4347_v61, %v5197_v34  ;;  %v4199_v31 = vunpack.i.l.bf16 %v4198_v57 }
 0x793   :  { %3968 = vmatmul.msk.f32.gmra.mxu2 %vm416_vm15, %v833_v10 }
 0x795   :  { %1407 = vrot.lane.b32.xlu1 %v4982_v59, %s6470_s3 }
 0x799   :  { %v4203_v8 = vpop.permute.xlu2 %4202 }
 0x79a   :  { %v4204_v13 = vunpack.i.l.bf16 %v4203_v8  ;;  %v4205_v15 = vunpack.i.h.bf16 %v4203_v8 }
 0x79b   :  { %3969 = vmatmul.msk.f32.gmra.mxu2 %vm416_vm15, %v834_v18 }
 0x79c   :  { %1052 = vmatpush.msra.mxu1 %v4204_v13  ;;  %v682_v17 = vpop.xlane.xlu1 %681 }
 0x79d   :  { %v685_v20 = vsub.f32 %v5221_v51, %v682_v17  ;;  %v4200_v51 = vunpack.i.h.bf16 %v4198_v57 }
 0x79e   :  { %1053 = vmatpush.msra.mxu1 %v4205_v15 }
 0x79f   :  { %v690_v48 = vmul.f32 1.442695, %v685_v20 }
 0x7a1   :  { %4348 = vpow2.f32 %v690_v48 }
 0x7a2   :  { %4350 = vrcp.f32 %v1134_v3 }
 0x7a3   :  { %4352 = vrcp.f32 %v1137_v44 }
 0x7a7   :  { %v5294_v21 = vpop.eup %4348 }
 0x7a8   :  { %v698_v22 = vsel %vm423_vm3, %v5294_v21, 0.0  ;;  %v4351_v25 = vpop.eup %4350 }
 0x7a9   :  { %699 = vadd.xlane.f32.xlu2 %v698_v22  ;;  %v1144_v36 = vmul.f32 %v4351_v25, %v5168_v11  ;;  %v4353_v0 = vpop.eup %4352 }
 0x7aa   :  { %v1145_v27 = vmul.f32 %v4353_v0, %v5202_v39  ;;  %v1505_v0 = vld [vmem:[%s6453_s9 + $0x10] sm:$0xff] }
 0x7ae   :  { %v5298_v24 = vpop.xlane.xlu0 %1008 }
 0x7b4   :  { %v1152_v34 = vpop.permute.xlu1 %1151 }
 0x7b5   :  { %3986 = vmatpush.msk.msrb.mxu2 %vm133_vm1, %v1152_v34 }
 0x7b6   :  { %v1378_v2 = vpop.xlane.xlu0 %1377 }
 0x7b7   :  { %v1381_v9 = vsub.f32 %v5237_v4, %v1378_v2  ;;  %1180 = vmatpush.msrb.mxu2 %v4199_v31 }
 0x7b9   :  { %v1386_v23 = vmul.f32 1.442695, %v1381_v9  ;;  %1181 = vmatpush.msrb.mxu2 %v4200_v51 }
 0x7ba   :  { %3987 = vmatmul.msk.f32.vlgmr.msrb.gmra.mxu2 %vm416_vm15, %v1144_v36 }
 0x7bb   :  { %4354 = vpow2.f32 %v1386_v23 }
 0x7be   :  { %v1390_v57 = vpop.xlane.xlu0 %1389 }
 0x7c1   :  { %v5305_v37 = vpop.eup %4354  ;;  %1279 = vrot.lane.b32.xlu2 %v4982_v59, %s6472_s28 }
 0x7c2   :  { %3988 = vmatmul.msk.f32.gmra.mxu2 %vm416_vm15, %v1145_v27  ;;  %v1394_v4 = vsel %vm423_vm3, %v5305_v37, 0.0 }
 0x7c3   :  { %1395 = vadd.xlane.f32.xlu0 %v1394_v4 }
 0x7d1   :  { %v4208_v10 = vpop.permute.xlu0 %4207 }
 0x7d2   :  { %v1247_v11 = vpop.xlane.xlu2 %1246  ;;  %v4209_v61 = vunpack.i.l.bf16 %v4208_v10  ;;  %v4210_v8 = vunpack.i.h.bf16 %v4208_v10 }
 0x7d3   :  { %v743_v52 = vpop.f32.mrf.mxu1  ;;  %v1252_v30 = vsub.f32 %v5254_v35, %v1247_v11 }
 0x7d5   :  { %v1256_v32 = vmul.f32 1.442695, %v1252_v30 }
 0x7d7   :  { %895 = vrot.lane.b32.xlu0 %v743_v52, %s6484_s0  ;;  %4356 = vpow2.f32 %v1256_v32 }
 0x7d9   :  { %v4213_v48 = vpop.permute.xlu0 %4212 }
 0x7da   :  { %v1012_v18 = vpop.xlane.xlu2 %1011  ;;  %v4214_v25 = vunpack.i.l.bf16 %v4213_v48  ;;  %v4215_v31 = vunpack.i.h.bf16 %v4213_v48 }
 0x7dd   :  { %v5317_v14 = vpop.eup %4356 }
 0x7de   :  { %v1263_v49 = vsel %vm416_vm15, %v5317_v14, 0.0 }
 0x7df   :  { %885 = vrot.lane.b32.xlu0 %v5217_v43, %s4591_s4  ;;  %v1375_v39 = vpop.xlane.xlu1 %1374 }
 0x7e0   :  { %v1380_v59 = vsub.f32 %v5232_v56, %v1375_v39  ;;  %v1503_v39 = vld [vmem:[%s6453_s9] sm:$0xff] }
 0x7e2   :  { %v1384_v63 = vmul.f32 1.442695, %v1380_v59  ;;  %v1262_v15 = vpop.xlane.xlu2 %1261 }
 0x7e4   :  { %4358 = vpow2.f32 %v1384_v63 }
 0x7e7   :  { %v1140_v7 = vpop.xlane.xlu1 %1139 }
 0x7e8   :  { %4360 = vrcp.f32 %v1140_v7 }
 0x7ea   :  { %v5321_v62 = vpop.eup %4358  ;;  %1264 = vadd.xlane.f32.xlu2 %v1263_v49 }
 0x7eb   :  { %v1391_v35 = vsel %vm416_vm15, %v5321_v62, 0.0 }
 0x7ec   :  { %1392 = vadd.xlane.f32.xlu1 %v1391_v35 }
 0x7ed   :  { %v871_v17 = vpop.f32.mrf.mxu2 }
 0x7ee   :  { %v4361_v43 = vpop.eup %4360 }
 0x7ef   :  { %v1250_v44 = vpop.xlane.xlu1 %1249  ;;  %v1146_v56 = vmul.f32 %v4361_v43, %v5278_v45 }
 0x7f0   :  { %v1253_v55 = vsub.f32 %v5282_v29, %v1250_v44  ;;  %v746_v29 = vpop.f32.mrf.mxu1 }
 0x7f1   :  { %3989 = vmatmul.msk.f32.gmra.mxu2 %vm416_vm15, %v1146_v56 }
 0x7f2   :  { %v1258_v16 = vmul.f32 1.442695, %v1253_v55 }
 0x7f4   :  { %4362 = vpow2.f32 %v1258_v16 }
 0x7f5   :  { %4364 = vrcp.f32 %v1390_v57 }
 0x7fa   :  { %v5328_v28 = vpop.eup %4362 }
 0x7fb   :  { %v1266_v33 = vsel %vm423_vm3, %v5328_v28, 0.0  ;;  %v4365_v45 = vpop.eup %4364 }
 0x7fc   :  { %1267 = vadd.xlane.f32.xlu1 %v1266_v33  ;;  %v1400_v13 = vmul.f32 %v4365_v45, %v5243_v1 }
 0x802   :  { %883 = vrot.lane.b32.xlu2 %v5209_v12, %s4591_s4 }
 0x807   :  { %v1408_v3 = vpop.permute.xlu1 %1407 }
 0x808   :  { %4006 = vmatpush.msk.msra.mxu2 %vm133_vm1, %v1408_v3 }
 0x80a   :  { %897 = vrot.lane.b32.xlu2 %v746_v29, %s6484_s0  ;;  %1436 = vmatpush.msra.mxu2 %v4209_v61 }
 0x80c   :  { %1437 = vmatpush.msra.mxu2 %v4210_v8 }
 0x80d   :  { %4007 = vmatmul.msk.f32.vlgmr.msra.gmra.mxu2 %vm416_vm15, %v1400_v13 }
 0x815   :  { %907 = vrot.lane.b32.xlu1 %v871_v17, %s6482_s30 }
 0x816   :  { %v874_v12 = vpop.f32.mrf.mxu2 }
 0x81c   :  { %v700_v20 = vpop.xlane.xlu2 %699 }
 0x81d   :  { %4366 = vrcp.f32 %v700_v20  ;;  %909 = vrot.lane.b32.xlu1 %v874_v12, %s6482_s30  ;;  %v5399_v20 = vld [vmem:[%s6454_s10] ss:$0 sm:$0xff] }
 0x81e   :  { %4368 = vrcp.f32 %v5252_v58  ;;  %v877_v58 = vpop.f32.mrf.mxu2 }
 0x81f   :  { %4370 = vrcp.f32 %v5298_v24 }
 0x820   :  { %4372 = vrcp.f32 %v1012_v18 }
 0x821   :  { %4374 = vrcp.f32 %v1262_v15 }
 0x823   :  { %v4367_v22 = vpop.eup %4366 }
 0x824   :  { %v1280_v34 = vpop.permute.xlu2 %1279  ;;  %v706_v1 = vmul.f32 %v4367_v22, %v5294_v21  ;;  %v4369_v2 = vpop.eup %4368 }
 0x825   :  { %3996 = vmatpush.msk.msrb.mxu1 %vm133_vm1, %v1280_v34  ;;  %887 = vrot.lane.b32.xlu1 %v5219_v50, %s4591_s4  ;;  %v1016_v51 = vmul.f32 %v4369_v2, %v5179_v60  ;;  %v4371_v21 = vpop.eup %4370 }
 0x826   :  { %3959 = vmatmul.msk.f32.gmra.mxu1 %vm416_vm15, %v706_v1  ;;  %v1017_v9 = vmul.f32 %v4371_v21, %v5230_v53  ;;  %v4373_v50 = vpop.eup %4372  ;;  %v1506_v53 = vld [vmem:[%s6453_s9 + $0x18] sm:$0xff] }
 0x827   :  { %1308 = vmatpush.msrb.mxu1 %v4214_v25  ;;  %v1018_v36 = vmul.f32 %v4373_v50, %v5265_v40  ;;  %v4375_v60 = vpop.eup %4374  ;;  %1536 = vmatpush.msra.mxu0 %v1506_v53  ;;  %v1504_v40 = vld [vmem:[%s6453_s9 + $0x8] sm:$0xff] }
 0x828   :  { %v1272_v24 = vmul.f32 %v4375_v60, %v5272_v41 }
 0x829   :  { %1309 = vmatpush.msrb.mxu1 %v4215_v31  ;;  %1537 = vmatpush.msra.mxu0 %v1505_v0 }
 0x82b   :  { %1538 = vmatpush.msra.mxu0 %v1504_v40 }
 0x82d   :  { %911 = vrot.lane.b32.xlu1 %v877_v58, %s6482_s30  ;;  %1539 = vmatpush.msra.mxu0 %v1503_v39 }
 0x82e   :  { %3977 = vmatmul.msk.f32.vlgmr.msra.gmra.mxu1 %vm416_vm15, %v1016_v51 }
 0x836   :  { %3978 = vmatmul.msk.f32.gmra.mxu1 %vm416_vm15, %v1017_v9  ;;  %v1396_v4 = vpop.xlane.xlu0 %1395 }
 0x83d   :  { %v1183_v23 = vpop.f32.mrf.mxu2 }
 0x83e   :  { %3979 = vmatmul.msk.f32.gmra.mxu1 %vm416_vm15, %v1018_v36  ;;  %1451 = vrot.lane.b32.xlu0 %v1183_v23, %s4591_s4 }
 0x846   :  { %3997 = vmatmul.msk.f32.vlgmr.msrb.gmra.mxu1 %vm416_vm15, %v1272_v24 }
 0x849   :  { %v896_v35 = vpop.permute.xlu0 %895 }
 0x851   :  { %v886_v33 = vpop.permute.xlu0 %885 }
 0x852   :  { %v917_v57 = vsel %vm374_vm14, %v5023_v5, %v886_v33 }
 0x85d   :  { %v1265_v27 = vpop.xlane.xlu2 %1264 }
 0x85e   :  { %4376 = vrcp.f32 %v1265_v27 }
 0x85f   :  { %v1393_v41 = vpop.xlane.xlu1 %1392 }
 0x860   :  { %4378 = vrcp.f32 %v1393_v41 }
 0x861   :  { %4380 = vrcp.f32 %v1396_v4 }
 0x864   :  { %v4377_v11 = vpop.eup %4376 }
 0x865   :  { %v1273_v52 = vmul.f32 %v4377_v11, %v5317_v14  ;;  %v884_v43 = vpop.permute.xlu2 %883 }
 0x866   :  { %v4379_v30 = vpop.eup %4378  ;;  %v916_v44 = vsel %vm374_vm14, %v5207_v42, %v884_v43 }
 0x867   :  { %3998 = vmatmul.msk.f32.gmra.mxu1 %vm416_vm15, %v1273_v52  ;;  %v1401_v32 = vmul.f32 %v4379_v30, %v5321_v62  ;;  %v4381_v59 = vpop.eup %4380  ;;  %v1186_v62 = vpop.f32.mrf.mxu2  ;;  %v920_v56 = vsel %vm919_vm11, %v916_v44, %v896_v35 }
 0x868   :  { %v1402_v7 = vmul.f32 %v4381_v59, %v5305_v37 }
 0x869   :  { %4008 = vmatmul.msk.f32.gmra.mxu2 %vm416_vm15, %v1401_v32 }
 0x86f   :  { %v1268_v63 = vpop.xlane.xlu1 %1267 }
 0x870   :  { %4382 = vrcp.f32 %v1268_v63 }
 0x871   :  { %4009 = vmatmul.msk.f32.gmra.mxu2 %vm416_vm15, %v1402_v7 }
 0x874   :  { %v1189_v37 = vpop.f32.mrf.mxu2 }
 0x876   :  { %v4383_v14 = vpop.eup %4382 }
 0x877   :  { %v1274_v49 = vmul.f32 %v4383_v14, %v5328_v28  ;;  %v898_v28 = vpop.permute.xlu2 %897 }
 0x878   :  { %v921_v10 = vsel %vm919_vm11, %v917_v57, %v898_v28 }
 0x879   :  { %3999 = vmatmul.msk.f32.gmra.mxu1 %vm416_vm15, %v1274_v49 }
 0x887   :  { %v908_v55 = vpop.permute.xlu1 %907 }
 0x888   :  { %v924_v16 = vsel %vm6486_vm12, %v920_v56, %v908_v55 }
 0x889   :  { %4010 = vmatmul.msk.f32.vlgmr.msra.gmra.mxu0 %vm170_vm2, %v924_v16 }
 0x88f   :  { %v910_v3 = vpop.permute.xlu1 %909 }
 0x890   :  { %v1439_v45 = vpop.f32.mrf.mxu2  ;;  %v925_v42 = vsel %vm6486_vm12, %v921_v10, %v910_v3 }
 0x891   :  { %1475 = vrot.lane.b32.xlu0 %v1439_v45, %s6482_s30  ;;  %4011 = vmatmul.msk.f32.gmra.mxu0 %vm170_vm2, %v925_v42 }
 0x897   :  { %v888_v58 = vpop.permute.xlu1 %887 }
 0x898   :  { %v918_v60 = vsel %vm374_vm14, %v5030_v6, %v888_v58 }
 0x899   :  { %1453 = vrot.lane.b32.xlu0 %v1186_v62, %s4591_s4 }
 0x89f   :  { %v912_v53 = vpop.permute.xlu1 %911 }
 0x8a1   :  { %1455 = vrot.lane.b32.xlu0 %v1189_v37, %s4591_s4 }
 0x8a3   :  { %v749_v61 = vpop.f32.mrf.mxu1 }
 0x8ab   :  { %v1055_v29 = vpop.f32.mrf.mxu1 }
 0x8b0   :  { %v1452_v2 = vpop.permute.xlu0 %1451 }
 0x8b1   :  { %v1484_v50 = vsel %vm374_vm14, %v1055_v29, %v1452_v2 }
 0x8b3   :  { %v1058_v8 = vpop.f32.mrf.mxu1 }
 0x8bb   :  { %v1061_v18 = vpop.f32.mrf.mxu1 }
 0x8c3   :  { %v1311_v13 = vpop.f32.mrf.mxu1 }
 0x8c4   :  { %1463 = vrot.lane.b32.xlu2 %v1311_v13, %s6484_s0 }
 0x8cc   :  { %899 = vrot.lane.b32.xlu2 %v749_v61, %s6484_s0 }
 0x8e4   :  { %v1314_v5 = vpop.f32.mrf.mxu1 }
 0x8e5   :  { %1465 = vrot.lane.b32.xlu2 %v1314_v5, %s6484_s0 }
 0x8ec   :  { %v1442_v15 = vpop.f32.mrf.mxu2 }
 0x8ed   :  { %1477 = vrot.lane.b32.xlu1 %v1442_v15, %s6482_s30 }
 0x8f4   :  { %v1445_v17 = vpop.f32.mrf.mxu2 }
 0x8f5   :  { %1479 = vrot.lane.b32.xlu1 %v1445_v17, %s6482_s30  ;;  %s6500_s30 = smov 104  }
 0x8f6   :  { %v1317_v12 = vpop.f32.mrf.mxu1 }
 0x8f7   :  { %1467 = vrot.lane.b32.xlu2 %v1317_v12, %s6484_s0 }
 0x903   :  { %v1476_v36 = vpop.permute.xlu0 %1475 }
 0x906   :  { %v1541_v48 = vpop.f32.mrf.mxu0 }
 0x907   :  { %v1542_v22 = vadd.f32 %v5399_v20, %v1541_v48  ;;  %v1692_v48 = vld [vmem:[%s6457_s13 + $0x18] sm:$0xff] }
 0x908   :  { %1724 = vmatpush.msra.mxu1 %v1692_v48  ;;  %v1950_v48 = vld [vmem:[%s6459_s15 + $0x30] sm:$0xff] }
 0x909   :  { %v5403_v34 = vadd.f32 %v1542_v22, %v4754_v19 }
 0x90b   :  { %v1563_v1 = vsel %vm170_vm2, %v5403_v34, 0.0  ;;  %v1454_v41 = vpop.permute.xlu0 %1453 }
 0x90c   :  { %1564 = vadd.xlane.f32.xlu0 %v1563_v1  ;;  %v1485_v11 = vsel %vm374_vm14, %v1058_v8, %v1454_v41 }
 0x90e   :  { %v1544_v25 = vpop.f32.mrf.mxu0 }
 0x90f   :  { %v1545_v31 = vadd.f32 %v5399_v20, %v1544_v25 }
 0x911   :  { %v5409_v51 = vadd.f32 %v1545_v31, %v4762_v26 }
 0x913   :  { %v1566_v9 = vsel %vm170_vm2, %v5409_v51, 0.0  ;;  %v1456_v39 = vpop.permute.xlu0 %1455 }
 0x914   :  { %v1486_v7 = vsel %vm374_vm14, %v1061_v18, %v1456_v39 }
 0x91e   :  { %v1464_v21 = vpop.permute.xlu2 %1463 }
 0x91f   :  { %v1487_v19 = vsel %vm919_vm11, %v1484_v50, %v1464_v21 }
 0x920   :  { %1567 = vadd.xlane.f32.xlu2 %v1566_v9  ;;  %v1490_v23 = vsel %vm6486_vm12, %v1487_v19, %v1476_v36  ;;  %v5476_v19 = vld [vmem:[%s6455_s11] ss:$0 sm:$0xff] }
 0x921   :  { %v1496_v26 = vrot.slane %v1490_v23, 7 }
 0x926   :  { %v900_v24 = vpop.permute.xlu2 %899 }
 0x927   :  { %v922_v0 = vsel %vm919_vm11, %v918_v60, %v900_v24  ;;  %v5481_v60 = vld [vmem:[%s6456_s12] ss:$0 sm:$0xff] }
 0x928   :  { %v926_v40 = vsel %vm6486_vm12, %v922_v0, %v912_v53 }
 0x929   :  { %v1502_v27 = vsel %vm133_vm1, %v926_v40, %v1496_v26 }
 0x92a   :  { %4012 = vmatmul.msk.f32.gmra.mxu0 %vm170_vm2, %v1502_v27 }
 0x93f   :  { %v1466_v4 = vpop.permute.xlu2 %1465 }
 0x940   :  { %v1488_v52 = vsel %vm919_vm11, %v1485_v11, %v1466_v4 }
 0x951   :  { %v1468_v63 = vpop.permute.xlu2 %1467 }
 0x952   :  { %v1489_v14 = vsel %vm919_vm11, %v1486_v7, %v1468_v63 }
 0x95f   :  { %v1478_v30 = vpop.permute.xlu1 %1477 }
 0x960   :  { %v1491_v6 = vsel %vm6486_vm12, %v1488_v52, %v1478_v30 }
 0x961   :  { %v1497_v32 = vrot.slane %v1491_v6, 7 }
 0x963   :  { %v1498_v59 = vsel %vm133_vm1, %v1496_v26, %v1497_v32 }
 0x964   :  { %4013 = vmatmul.msk.f32.gmra.mxu0 %vm170_vm2, %v1498_v59 }
 0x967   :  { %v1480_v49 = vpop.permute.xlu1 %1479 }
 0x968   :  { %v1492_v62 = vsel %vm6486_vm12, %v1489_v14, %v1480_v49 }
 0x969   :  { %v1499_v35 = vrot.slane %v1492_v62, 7 }
 0x96b   :  { %v1500_v43 = vsel %vm133_vm1, %v1497_v32, %v1499_v35 }
 0x96c   :  { %4014 = vmatmul.msk.f32.gmra.mxu0 %vm170_vm2, %v1500_v43 }
 0x97f   :  { %v1565_v44 = vpop.xlane.xlu0 %1564 }
 0x980   :  { %v1578_v56 = vmul.f32 %v1565_v44, %v4782_v54 }
 0x982   :  { %v1583_v55 = vsub.f32 %v5403_v34, %v1578_v56 }
 0x984   :  { %v1588_v37 = vmul.f32 %v1583_v55, %v1583_v55 }
 0x986   :  { %v1593_v16 = vsel %vm170_vm2, %v1588_v37, 0.0 }
 0x987   :  { %1594 = vadd.xlane.f32.xlu0 %v1593_v16 }
 0x993   :  { %v1568_v33 = vpop.xlane.xlu2 %1567 }
 0x994   :  { %v1579_v57 = vmul.f32 %v1568_v33, %v4782_v54 }
 0x996   :  { %v5441_v45 = vsub.f32 %v5409_v51, %v1579_v57 }
 0x998   :  { %v1589_v61 = vmul.f32 %v5441_v45, %v5441_v45 }
 0x99a   :  { %v1596_v29 = vsel %vm170_vm2, %v1589_v61, 0.0 }
 0x9a7   :  { %v1547_v28 = vpop.f32.mrf.mxu0 }
 0x9a8   :  { %v1548_v10 = vadd.f32 %v5399_v20, %v1547_v28 }
 0x9aa   :  { %v5438_v3 = vadd.f32 %v1548_v10, %v4771_v38  ;;  %v5515_v10 = vld [vmem:[%s6458_s14] ss:$0 sm:$0xff] }
 0x9ac   :  { %v1569_v42 = vsel %vm170_vm2, %v5438_v3, 0.0 }
 0x9ad   :  { %1570 = vadd.xlane.f32.xlu1 %v1569_v42 }
 0x9b5   :  { %1597 = vadd.xlane.f32.xlu1 %v1596_v29 }
 0x9e1   :  { %v1550_v8 = vpop.f32.mrf.mxu0 }
 0x9e2   :  { %v1551_v18 = vadd.f32 %v5399_v20, %v1550_v8 }
 0x9e4   :  { %v5450_v13 = vadd.f32 %v1551_v18, %v4780_v47  ;;  %v1691_v47 = vld [vmem:[%s6457_s13 + $0x10] sm:$0xff] }
 0x9e5   :  { %1725 = vmatpush.msra.mxu1 %v1691_v47  ;;  %v1949_v47 = vld [vmem:[%s6459_s15 + $0x28] sm:$0xff] }
 0x9e6   :  { %v1572_v38 = vsel %vm170_vm2, %v5450_v13, 0.0 }
 0x9e7   :  { %1573 = vadd.xlane.f32.xlu2 %v1572_v38 }
 0x9e9   :  { %v1553_v5 = vpop.f32.mrf.mxu0 }
 0x9ea   :  { %v1554_v15 = vadd.f32 %v5399_v20, %v1553_v5  ;;  %v1690_v20 = vld [vmem:[%s6457_s13 + $0x8] sm:$0xff] }
 0x9eb   :  { %1726 = vmatpush.msra.mxu1 %v1690_v20  ;;  %v1948_v20 = vld [vmem:[%s6459_s15 + $0x20] sm:$0xff] }
 0x9ec   :  { %v5456_v17 = vadd.f32 %v1554_v15, %v4777_v46  ;;  %v1689_v46 = vld [vmem:[%s6457_s13] sm:$0xff] }
 0x9ed   :  { %1727 = vmatpush.msra.mxu1 %v1689_v46 }
 0x9ee   :  { %v1575_v12 = vsel %vm183_vm13, %v5456_v17, 0.0 }
 0x9ef   :  { %1576 = vadd.xlane.f32.xlu0 %v1575_v12  ;;  %v1951_v12 = vld [vmem:[%s6459_s15 + $0x38] sm:$0xff] }
 0x9f0   :  { %1979 = vmatpush.msrb.mxu3 %v1951_v12 }
 0x9f2   :  { %1980 = vmatpush.msrb.mxu3 %v1950_v48 }
 0x9f4   :  { %1981 = vmatpush.msrb.mxu3 %v1949_v47 }
 0x9f6   :  { %1982 = vmatpush.msrb.mxu3 %v1948_v20 }
 0x9fa   :  { %v1595_v22 = vpop.xlane.xlu0 %1594 }
 0x9fb   :  { %v1608_v1 = vmul.f32 %v1595_v22, %v4782_v54 }
 0x9fd   :  { %v1613_v25 = vadd.f32 1e-05, %v1608_v1 }
 0x9ff   :  { %4384 = vrsqrt.f32 %v1613_v25  ;;  %vm1624_vm5 = vweird.f32 %v1613_v25 }
 0xa05   :  { %v4385_v31 = vpop.eup %4384 }
 0xa06   :  { %v1619_v2 = vmul.f32 %v4385_v31, %v1613_v25  ;;  %vm1625_vm4 = vweird.f32 %v4385_v31  ;;  %v1947_v25 = vld [vmem:[%s6459_s15 + $0x18] sm:$0xff] }
 0xa07   :  { %vm1626_vm6 = vmor %vm1624_vm5, %vm1625_vm4  ;;  %1983 = vmatpush.msrb.mxu3 %v1947_v25 }
 0xa08   :  { %v1620_v58 = vmul.f32 %v4385_v31, %v1619_v2 }
 0xa0a   :  { %v1621_v21 = vmul.f32 0.5, %v1620_v58  ;;  %v1946_v58 = vld [vmem:[%s6459_s15 + $0x10] sm:$0xff] }
 0xa0b   :  { %1984 = vmatpush.msrb.mxu3 %v1946_v58 }
 0xa0c   :  { %v1622_v9 = vsub.f32 1.5, %v1621_v21 }
 0xa0e   :  { %v1623_v50 = vmul.f32 %v4385_v31, %v1622_v9 }
 0xa10   :  { %v1627_v36 = vsel %vm1626_vm6, %v4385_v31, %v1623_v50 }
 0xa11   :  { %v1668_v23 = vmul.f32 %v1627_v36, %v1583_v55 }
 0xa13   :  { %v1676_v24 = vmul.f32 %v5476_v19, %v1668_v23  ;;  %v1945_v23 = vld [vmem:[%s6459_s15 + $0x8] sm:$0xff] }
 0xa14   :  { %1985 = vmatpush.msrb.mxu3 %v1945_v23 }
 0xa15   :  { %v1684_v53 = vadd.f32 %v5481_v60, %v1676_v24 }
 0xa17   :  { %4015 = vmatmul.msk.f32.vlgmr.msra.gmra.mxu1 %vm170_vm2, %v1684_v53 }
 0xa20   :  { %v1571_v26 = vpop.xlane.xlu1 %1570 }
 0xa21   :  { %v1580_v0 = vmul.f32 %v1571_v26, %v4782_v54  ;;  %v1944_v26 = vld [vmem:[%s6459_s15] sm:$0xff] }
 0xa22   :  { %1986 = vmatpush.msrb.mxu3 %v1944_v26 }
 0xa23   :  { %v5488_v40 = vsub.f32 %v5438_v3, %v1580_v0 }
 0xa25   :  { %v1590_v27 = vmul.f32 %v5488_v40, %v5488_v40 }
 0xa27   :  { %v1599_v41 = vsel %vm170_vm2, %v1590_v27, 0.0 }
 0xa28   :  { %1600 = vadd.xlane.f32.xlu2 %v1599_v41  ;;  %v1598_v4 = vpop.xlane.xlu1 %1597 }
 0xa29   :  { %v1609_v11 = vmul.f32 %v1598_v4, %v4782_v54 }
 0xa2b   :  { %v1614_v52 = vadd.f32 1e-05, %v1609_v11 }
 0xa2d   :  { %4386 = vrsqrt.f32 %v1614_v52  ;;  %vm1634_vm8 = vweird.f32 %v1614_v52 }
 0xa33   :  { %v4387_v30 = vpop.eup %4386 }
 0xa34   :  { %v1629_v6 = vmul.f32 %v4387_v30, %v1614_v52  ;;  %vm1635_vm7 = vweird.f32 %v4387_v30 }
 0xa35   :  { %vm1636_vm9 = vmor %vm1634_vm8, %vm1635_vm7 }
 0xa36   :  { %v1630_v32 = vmul.f32 %v4387_v30, %v1629_v6 }
 0xa38   :  { %v1631_v39 = vmul.f32 0.5, %v1630_v32 }
 0xa3a   :  { %v1632_v59 = vsub.f32 1.5, %v1631_v39 }
 0xa3c   :  { %v1633_v63 = vmul.f32 %v4387_v30, %v1632_v59 }
 0xa3e   :  { %v1637_v7 = vsel %vm1636_vm9, %v4387_v30, %v1633_v63 }
 0xa3f   :  { %v1669_v14 = vmul.f32 %v1637_v7, %v5441_v45 }
 0xa41   :  { %v1677_v49 = vmul.f32 %v5476_v19, %v1669_v14 }
 0xa43   :  { %v1685_v62 = vadd.f32 %v5481_v60, %v1677_v49 }
 0xa45   :  { %4016 = vmatmul.msk.f32.gmra.mxu1 %vm170_vm2, %v1685_v62 }
 0xa5a   :  { %v1574_v35 = vpop.xlane.xlu2 %1573 }
 0xa5b   :  { %v1581_v43 = vmul.f32 %v1574_v35, %v4782_v54 }
 0xa5d   :  { %v5500_v44 = vsub.f32 %v5450_v13, %v1581_v43 }
 0xa5f   :  { %v1591_v56 = vmul.f32 %v5500_v44, %v5500_v44 }
 0xa61   :  { %v1602_v55 = vsel %vm170_vm2, %v1591_v56, 0.0 }
 0xa62   :  { %1603 = vadd.xlane.f32.xlu1 %v1602_v55  ;;  %v1577_v37 = vpop.xlane.xlu0 %1576 }
 0xa63   :  { %v1582_v16 = vmul.f32 %v1577_v37, %v4782_v54 }
 0xa65   :  { %v5507_v33 = vsub.f32 %v5456_v17, %v1582_v16 }
 0xa67   :  { %v1592_v28 = vmul.f32 %v5507_v33, %v5507_v33 }
 0xa69   :  { %v1605_v57 = vsel %vm183_vm13, %v1592_v28, 0.0 }
 0xa6a   :  { %1606 = vadd.xlane.f32.xlu0 %v1605_v57 }
 0xa94   :  { %v1729_v45 = vpop.f32.mrf.mxu1 }
 0xa95   :  { %v5518_v42 = vadd.f32 %v5515_v10, %v1729_v45 }
 0xa97   :  { %v5521_v61 = vmul.f32 0.70710677, %v5518_v42 }
 0xa99   :  { %v1754_v29 = vand.u32 2147483647, %v5521_v61 }
 0xa9b   :  { %v1759_v8 = vmul.f32 0.3275911, %v1754_v29  ;;  %v1601_v18 = vpop.xlane.xlu2 %1600  ;;  %v1889_v11 = vsub.f32 0.0, %v1754_v29 }
 0xa9c   :  { %v1610_v38 = vmul.f32 %v1601_v18, %v4782_v54 }
 0xa9d   :  { %v1764_v5 = vadd.f32 1.0, %v1759_v8  ;;  %v1894_v59 = vmul.f32 %v1889_v11, %v1754_v29 }
 0xa9e   :  { %v1615_v15 = vadd.f32 1e-05, %v1610_v38 }
 0xa9f   :  { %4388 = vrcp.f32 %v1764_v5  ;;  %v1780_v21 = vand.u32 2147483648, %v1764_v5  ;;  %v1778_v36 = vand.u32 2147483647, %v1764_v5  ;;  %vm1774_vm5 = vweird.f32 %v1764_v5 }
 0xaa0   :  { %4390 = vrsqrt.f32 %v1615_v15  ;;  %vm1644_vm9 = vweird.f32 %v1615_v15  ;;  %v1899_v62 = vmul.f32 1.442695, %v1894_v59 }
 0xaa1   :  { %v1781_v0 = vor.u32 1.1754944e-38, %v1780_v21  ;;  %vm1779_vm8 = vcmp.eq.f32.partialorder %v1778_v36, 8.507059e+37 }
 0xaa2   :  { %4392 = vpow2.f32 %v1899_v62 }
 0xaa5   :  { %v4389_v46 = vpop.eup %4388 }
 0xaa6   :  { %v4391_v22 = vpop.eup %4390  ;;  %v1770_v1 = vmul.f32 %v4389_v46, %v1764_v5  ;;  %vm1775_vm4 = vweird.f32 %v4389_v46  ;;  %v1744_v5 = vmul.f32 0.5, %v5518_v42 }
 0xaa7   :  { %v1639_v31 = vmul.f32 %v4391_v22, %v1615_v15  ;;  %vm1776_vm6 = vmor %vm1774_vm5, %vm1775_vm4  ;;  %vm1645_vm7 = vweird.f32 %v4391_v22 }
 0xaa8   :  { %v1771_v2 = vsub.f32 1.0, %v1770_v1  ;;  %vm1646_vm12 = vmor %vm1644_vm9, %vm1645_vm7  ;;  %v4393_v16 = vpop.eup %4392 }
 0xaa9   :  { %v1640_v9 = vmul.f32 %v4391_v22, %v1639_v31 }
 0xaaa   :  { %v1772_v50 = vmul.f32 %v4389_v46, %v1771_v2 }
 0xaab   :  { %v1641_v24 = vmul.f32 0.5, %v1640_v9 }
 0xaac   :  { %v1773_v53 = vadd.f32 %v4389_v46, %v1772_v50 }
 0xaad   :  { %v1642_v27 = vsub.f32 1.5, %v1641_v24 }
 0xaae   :  { %v1777_v41 = vsel %vm1776_vm6, %v4389_v46, %v1773_v53 }
 0xaaf   :  { %v1782_v4 = vsel %vm1779_vm8, %v1781_v0, %v1777_v41  ;;  %v1643_v52 = vmul.f32 %v4391_v22, %v1642_v27 }
 0xab0   :  { %v1844_v30 = vmul.f32 1.0614054, %v1782_v4 }
 0xab1   :  { %v1647_v6 = vsel %vm1646_vm12, %v4391_v22, %v1643_v52  ;;  %vm1919_vm12 = vcmp.ge.f32.partialorder %v5521_v61, 0.0 }
 0xab2   :  { %v1849_v32 = vadd.f32 -1.4531521, %v1844_v30  ;;  %v1670_v39 = vmul.f32 %v1647_v6, %v5488_v40 }
 0xab4   :  { %v1854_v63 = vmul.f32 %v1849_v32, %v1782_v4  ;;  %v1678_v7 = vmul.f32 %v5476_v19, %v1670_v39 }
 0xab6   :  { %v1859_v14 = vadd.f32 1.4214138, %v1854_v63  ;;  %v1686_v49 = vadd.f32 %v5481_v60, %v1678_v7 }
 0xab8   :  { %v1864_v35 = vmul.f32 %v1859_v14, %v1782_v4  ;;  %4017 = vmatmul.msk.f32.gmra.mxu1 %vm170_vm2, %v1686_v49 }
 0xaba   :  { %v1869_v43 = vadd.f32 -0.28449672, %v1864_v35 }
 0xabc   :  { %v1874_v56 = vmul.f32 %v1869_v43, %v1782_v4 }
 0xabe   :  { %v1879_v55 = vadd.f32 0.2548296, %v1874_v56 }
 0xac0   :  { %v1884_v37 = vmul.f32 %v1879_v55, %v1782_v4 }
 0xac2   :  { %v1909_v28 = vmul.f32 %v4393_v16, %v1884_v37  ;;  %v1732_v57 = vpop.f32.mrf.mxu1 }
 0xac3   :  { %v5554_v40 = vadd.f32 %v5515_v10, %v1732_v57 }
 0xac4   :  { %v1914_v45 = vsub.f32 1.0, %v1909_v28 }
 0xac5   :  { %v5557_v29 = vmul.f32 0.70710677, %v5554_v40 }
 0xac6   :  { %v1924_v8 = vsub.f32 0.0, %v1914_v45 }
 0xac7   :  { %v1755_v18 = vand.u32 2147483647, %v5557_v29 }
 0xac8   :  { %v1929_v38 = vsel %vm1919_vm12, %v1914_v45, %v1924_v8 }
 0xac9   :  { %v1934_v15 = vadd.f32 1.0, %v1929_v38  ;;  %v1760_v12 = vmul.f32 0.3275911, %v1755_v18  ;;  %v1890_v50 = vsub.f32 0.0, %v1755_v18 }
 0xacb   :  { %v1939_v48 = vmul.f32 %v1934_v15, %v1744_v5  ;;  %v1765_v47 = vadd.f32 1.0, %v1760_v12  ;;  %v1895_v41 = vmul.f32 %v1890_v50, %v1755_v18 }
 0xacd   :  { %4394 = vrcp.f32 %v1765_v47  ;;  %4020 = vmatmul.msk.f32.vlgmr.msrb.gmra.mxu3 %vm85_vm0, %v1939_v48  ;;  %v1795_v31 = vand.u32 2147483648, %v1765_v47  ;;  %v1793_v2 = vand.u32 2147483647, %v1765_v47  ;;  %vm1789_vm5 = vweird.f32 %v1765_v47 }
 0xace   :  { %v1901_v6 = vmul.f32 1.442695, %v1895_v41 }
 0xacf   :  { %v1796_v21 = vor.u32 1.1754944e-38, %v1795_v31  ;;  %vm1794_vm7 = vcmp.eq.f32.partialorder %v1793_v2, 8.507059e+37 }
 0xad3   :  { %v4395_v20 = vpop.eup %4394 }
 0xad4   :  { %v1785_v46 = vmul.f32 %v4395_v20, %v1765_v47  ;;  %vm1790_vm4 = vweird.f32 %v4395_v20 }
 0xad5   :  { %v1604_v22 = vpop.xlane.xlu1 %1603  ;;  %vm1791_vm6 = vmor %vm1789_vm5, %vm1790_vm4 }
 0xad6   :  { %v1786_v1 = vsub.f32 1.0, %v1785_v46  ;;  %v1611_v25 = vmul.f32 %v1604_v22, %v4782_v54 }
 0xad8   :  { %v1787_v61 = vmul.f32 %v4395_v20, %v1786_v1  ;;  %v1616_v58 = vadd.f32 1e-05, %v1611_v25 }
 0xada   :  { %4396 = vrsqrt.f32 %v1616_v58  ;;  %v1788_v42 = vadd.f32 %v4395_v20, %v1787_v61  ;;  %vm1654_vm9 = vweird.f32 %v1616_v58 }
 0xadc   :  { %v1792_v9 = vsel %vm1791_vm6, %v4395_v20, %v1788_v42  ;;  %v1745_v20 = vmul.f32 0.5, %v5554_v40 }
 0xadd   :  { %v1607_v36 = vpop.xlane.xlu0 %1606  ;;  %v1797_v23 = vsel %vm1794_vm7, %v1796_v21, %v1792_v9  ;;  %vm1920_vm7 = vcmp.ge.f32.partialorder %v5557_v29, 0.0  ;;  %v5580_v9 = vld [vmem:[%s6460_s16] ss:$0 sm:$0xff] }
 0xade   :  { %v1612_v24 = vmul.f32 %v1607_v36, %v4782_v54  ;;  %v1845_v53 = vmul.f32 1.0614054, %v1797_v23 }
 0xae0   :  { %v4397_v26 = vpop.eup %4396  ;;  %v1617_v0 = vadd.f32 1e-05, %v1612_v24  ;;  %v1850_v27 = vadd.f32 -1.4531521, %v1845_v53 }
 0xae1   :  { %v1649_v4 = vmul.f32 %v4397_v26, %v1616_v58  ;;  %vm1655_vm8 = vweird.f32 %v4397_v26 }
 0xae2   :  { %4398 = vrsqrt.f32 %v1617_v0  ;;  %v1855_v11 = vmul.f32 %v1850_v27, %v1797_v23  ;;  %vm1656_vm12 = vmor %vm1654_vm9, %vm1655_vm8  ;;  %vm1664_vm5 = vweird.f32 %v1617_v0 }
 0xae3   :  { %v1650_v52 = vmul.f32 %v4397_v26, %v1649_v4  ;;  %4400 = vpow2.f32 %v1901_v6 }
 0xae4   :  { %v1860_v30 = vadd.f32 1.4214138, %v1855_v11 }
 0xae5   :  { %v1651_v32 = vmul.f32 0.5, %v1650_v52 }
 0xae6   :  { %v1865_v39 = vmul.f32 %v1860_v30, %v1797_v23 }
 0xae7   :  { %v1652_v59 = vsub.f32 1.5, %v1651_v32 }
 0xae8   :  { %v4399_v63 = vpop.eup %4398  ;;  %v1870_v7 = vadd.f32 -0.28449672, %v1865_v39 }
 0xae9   :  { %v1653_v14 = vmul.f32 %v4397_v26, %v1652_v59  ;;  %v1659_v49 = vmul.f32 %v4399_v63, %v1617_v0  ;;  %v4401_v57 = vpop.eup %4400  ;;  %vm1665_vm4 = vweird.f32 %v4399_v63 }
 0xaea   :  { %v1875_v62 = vmul.f32 %v1870_v7, %v1797_v23  ;;  %vm1666_vm6 = vmor %vm1664_vm5, %vm1665_vm4 }
 0xaeb   :  { %v1657_v35 = vsel %vm1656_vm12, %v4397_v26, %v1653_v14  ;;  %v1660_v43 = vmul.f32 %v4399_v63, %v1659_v49 }
 0xaec   :  { %v1671_v56 = vmul.f32 %v1657_v35, %v5500_v44  ;;  %v1880_v55 = vadd.f32 0.2548296, %v1875_v62 }
 0xaed   :  { %v1661_v37 = vmul.f32 0.5, %v1660_v43 }
 0xaee   :  { %v1679_v16 = vmul.f32 %v5476_v19, %v1671_v56  ;;  %v1885_v28 = vmul.f32 %v1880_v55, %v1797_v23 }
 0xaef   :  { %v1662_v45 = vsub.f32 1.5, %v1661_v37 }
 0xaf0   :  { %v1687_v8 = vadd.f32 %v5481_v60, %v1679_v16  ;;  %v1910_v18 = vmul.f32 %v4401_v57, %v1885_v28 }
 0xaf1   :  { %v1663_v38 = vmul.f32 %v4399_v63, %v1662_v45 }
 0xaf2   :  { %4018 = vmatmul.msk.f32.gmra.mxu1 %vm170_vm2, %v1687_v8  ;;  %v1915_v5 = vsub.f32 1.0, %v1910_v18 }
 0xaf3   :  { %v1667_v15 = vsel %vm1666_vm6, %v4399_v63, %v1663_v38 }
 0xaf4   :  { %v1672_v44 = vmul.f32 %v1667_v15, %v5507_v33  ;;  %v1925_v12 = vsub.f32 0.0, %v1915_v5 }
 0xaf6   :  { %v1680_v48 = vmul.f32 %v5476_v19, %v1672_v44  ;;  %v1930_v47 = vsel %vm1920_vm7, %v1915_v5, %v1925_v12 }
 0xaf7   :  { %v1935_v46 = vadd.f32 1.0, %v1930_v47 }
 0xaf8   :  { %v1688_v22 = vadd.f32 %v5481_v60, %v1680_v48 }
 0xaf9   :  { %v1940_v1 = vmul.f32 %v1935_v46, %v1745_v20 }
 0xafa   :  { %4019 = vmatmul.msk.f32.gmra.mxu1 %vm170_vm2, %v1688_v22 }
 0xafb   :  { %4021 = vmatmul.msk.f32.gmra.mxu3 %vm85_vm0, %v1940_v1 }
 0xb35   :  { %v1735_v25 = vpop.f32.mrf.mxu1 }
 0xb36   :  { %v1736_v31 = vadd.f32 %v5515_v10, %v1735_v25 }
 0xb38   :  { %v1751_v33 = vmul.f32 0.70710677, %v1736_v31  ;;  %v1746_v56 = vmul.f32 0.5, %v1736_v31 }
 0xb3a   :  { %v1756_v61 = vand.u32 2147483647, %v1751_v33  ;;  %vm1921_vm5 = vcmp.ge.f32.partialorder %v1751_v33, 0.0 }
 0xb3c   :  { %v1761_v2 = vmul.f32 0.3275911, %v1756_v61  ;;  %v1891_v24 = vsub.f32 0.0, %v1756_v61 }
 0xb3e   :  { %v1766_v29 = vadd.f32 1.0, %v1761_v2  ;;  %v1896_v11 = vmul.f32 %v1891_v24, %v1756_v61 }
 0xb40   :  { %4402 = vrcp.f32 %v1766_v29  ;;  %v1810_v40 = vand.u32 2147483648, %v1766_v29  ;;  %v1808_v60 = vand.u32 2147483647, %v1766_v29  ;;  %vm1804_vm9 = vweird.f32 %v1766_v29 }
 0xb41   :  { %v1903_v32 = vmul.f32 1.442695, %v1896_v11 }
 0xb42   :  { %v1811_v36 = vor.u32 1.1754944e-38, %v1810_v40  ;;  %vm1809_vm4 = vcmp.eq.f32.partialorder %v1808_v60, 8.507059e+37 }
 0xb43   :  { %4404 = vpow2.f32 %v1903_v32 }
 0xb46   :  { %v4403_v19 = vpop.eup %4402 }
 0xb47   :  { %v1800_v58 = vmul.f32 %v4403_v19, %v1766_v29  ;;  %vm1805_vm8 = vweird.f32 %v4403_v19 }
 0xb48   :  { %vm1806_vm12 = vmor %vm1804_vm9, %vm1805_vm8 }
 0xb49   :  { %v1801_v42 = vsub.f32 1.0, %v1800_v58  ;;  %v4405_v49 = vpop.eup %4404 }
 0xb4b   :  { %v1802_v21 = vmul.f32 %v4403_v19, %v1801_v42 }
 0xb4d   :  { %v1803_v50 = vadd.f32 %v4403_v19, %v1802_v21 }
 0xb4f   :  { %v1807_v23 = vsel %vm1806_vm12, %v4403_v19, %v1803_v50 }
 0xb50   :  { %v1988_v53 = vpop.f32.mrf.mxu3  ;;  %v1812_v26 = vsel %vm1809_vm4, %v1811_v36, %v1807_v23 }
 0xb51   :  { %v1989_v0 = vadd.f32 %v5580_v9, %v1988_v53  ;;  %v1846_v27 = vmul.f32 1.0614054, %v1812_v26 }
 0xb53   :  { %v5584_v41 = vadd.f32 %v1989_v0, %v5403_v34  ;;  %v1851_v4 = vadd.f32 -1.4531521, %v1846_v27 }
 0xb55   :  { %v2012_v52 = vsel %vm170_vm2, %v5584_v41, 0.0  ;;  %v1856_v30 = vmul.f32 %v1851_v4, %v1812_v26 }
 0xb56   :  { %2013 = vadd.xlane.f32.xlu2 %v2012_v52 }
 0xb57   :  { %v1861_v6 = vadd.f32 1.4214138, %v1856_v30 }
 0xb59   :  { %v1866_v39 = vmul.f32 %v1861_v6, %v1812_v26 }
 0xb5b   :  { %v1871_v59 = vadd.f32 -0.28449672, %v1866_v39 }
 0xb5d   :  { %v1876_v63 = vmul.f32 %v1871_v59, %v1812_v26 }
 0xb5f   :  { %v1881_v7 = vadd.f32 0.2548296, %v1876_v63 }
 0xb61   :  { %v1886_v14 = vmul.f32 %v1881_v7, %v1812_v26 }
 0xb63   :  { %v1911_v62 = vmul.f32 %v4405_v49, %v1886_v14 }
 0xb65   :  { %v1916_v35 = vsub.f32 1.0, %v1911_v62 }
 0xb67   :  { %v1926_v34 = vsub.f32 0.0, %v1916_v35 }
 0xb69   :  { %v1931_v43 = vsel %vm1921_vm5, %v1916_v35, %v1926_v34 }
 0xb6a   :  { %v1936_v55 = vadd.f32 1.0, %v1931_v43 }
 0xb6c   :  { %v1941_v37 = vmul.f32 %v1936_v55, %v1746_v56 }
 0xb6e   :  { %4022 = vmatmul.msk.f32.gmra.mxu3 %vm85_vm0, %v1941_v37 }
 0xb6f   :  { %v1738_v16 = vpop.f32.mrf.mxu1 }
 0xb70   :  { %v5590_v28 = vadd.f32 %v5515_v10, %v1738_v16 }
 0xb72   :  { %v5593_v57 = vmul.f32 0.70710677, %v5590_v28 }
 0xb74   :  { %v1757_v45 = vand.u32 2147483647, %v5593_v57 }
 0xb76   :  { %v1762_v8 = vmul.f32 0.3275911, %v1757_v45  ;;  %v1892_v42 = vsub.f32 0.0, %v1757_v45 }
 0xb77   :  { %v1741_v18 = vpop.f32.mrf.mxu1 }
 0xb78   :  { %v1767_v38 = vadd.f32 1.0, %v1762_v8  ;;  %v5597_v5 = vadd.f32 %v5515_v10, %v1741_v18  ;;  %v1897_v23 = vmul.f32 %v1892_v42, %v1757_v45 }
 0xb7a   :  { %4406 = vrcp.f32 %v1767_v38  ;;  %v5600_v15 = vmul.f32 0.70710677, %v5597_v5  ;;  %v1825_v10 = vand.u32 2147483648, %v1767_v38  ;;  %v1823_v61 = vand.u32 2147483647, %v1767_v38 }
 0xb7b   :  { %vm1819_vm7 = vweird.f32 %v1767_v38  ;;  %v1905_v11 = vmul.f32 1.442695, %v1897_v23 }
 0xb7c   :  { %v1758_v44 = vand.u32 2147483647, %v5600_v15  ;;  %v1826_v29 = vor.u32 1.1754944e-38, %v1825_v10  ;;  %vm1824_vm9 = vcmp.eq.f32.partialorder %v1823_v61, 8.507059e+37 }
 0xb7e   :  { %v1991_v12 = vpop.f32.mrf.mxu3  ;;  %v1763_v48 = vmul.f32 0.3275911, %v1758_v44  ;;  %v1893_v30 = vsub.f32 0.0, %v1758_v44 }
 0xb7f   :  { %v1992_v47 = vadd.f32 %v5580_v9, %v1991_v12 }
 0xb80   :  { %v4407_v20 = vpop.eup %4406  ;;  %v1768_v22 = vadd.f32 1.0, %v1763_v48  ;;  %v1898_v7 = vmul.f32 %v1893_v30, %v1758_v44  ;;  %v1747_v44 = vmul.f32 0.5, %v5590_v28 }
 0xb81   :  { %v1815_v46 = vmul.f32 %v4407_v20, %v1767_v38  ;;  %v5605_v1 = vadd.f32 %v1992_v47, %v5409_v51  ;;  %vm1820_vm6 = vweird.f32 %v4407_v20 }
 0xb82   :  { %4408 = vrcp.f32 %v1768_v22  ;;  %vm1821_vm8 = vmor %vm1819_vm7, %vm1820_vm6  ;;  %v1840_v50 = vand.u32 2147483648, %v1768_v22  ;;  %v1838_v53 = vand.u32 2147483647, %v1768_v22  ;;  %vm1834_vm4 = vweird.f32 %v1768_v22 }
 0xb83   :  { %v1816_v25 = vsub.f32 1.0, %v1815_v46  ;;  %v2015_v31 = vsel %vm170_vm2, %v5605_v1, 0.0  ;;  %4410 = vpow2.f32 %v1905_v11  ;;  %v1907_v34 = vmul.f32 1.442695, %v1898_v7  ;;  %v4030_v11 = vld [vmem:[%s6451_s7 + $0x38] sm:$0xff] }
 0xb84   :  { %2016 = vadd.xlane.f32.xlu1 %v2015_v31  ;;  %v1841_v27 = vor.u32 1.1754944e-38, %v1840_v50  ;;  %vm1839_vm6 = vcmp.eq.f32.partialorder %v1838_v53, 8.507059e+37  ;;  %vm1922_vm7 = vcmp.ge.f32.partialorder %v5593_v57, 0.0  ;;  %2175 = vmatpush.msrb.mxu2 %v4030_v11 }
 0xb85   :  { %v1817_v33 = vmul.f32 %v4407_v20, %v1816_v25  ;;  %4412 = vpow2.f32 %v1907_v34  ;;  %v5664_v34 = vld [vmem:[%s6450_s6 + $0x1] ss:$0 sm:$0xff] }
 0xb87   :  { %v1818_v2 = vadd.f32 %v4407_v20, %v1817_v33  ;;  %v1748_v33 = vmul.f32 0.5, %v5597_v5 }
 0xb88   :  { %v4409_v19 = vpop.eup %4408 }
 0xb89   :  { %v1822_v58 = vsel %vm1821_vm8, %v4407_v20, %v1818_v2  ;;  %v1830_v51 = vmul.f32 %v4409_v19, %v1768_v22  ;;  %vm1835_vm12 = vweird.f32 %v4409_v19  ;;  %v4411_v56 = vpop.eup %4410  ;;  %vm1923_vm8 = vcmp.ge.f32.partialorder %v5600_v15, 0.0 }
 0xb8a   :  { %v1827_v40 = vsel %vm1824_vm9, %v1826_v29, %v1822_v58  ;;  %vm1836_vm5 = vmor %vm1834_vm4, %vm1835_vm12 }
 0xb8b   :  { %v1847_v21 = vmul.f32 1.0614054, %v1827_v40  ;;  %v1831_v60 = vsub.f32 1.0, %v1830_v51  ;;  %v4413_v20 = vpop.eup %4412 }
 0xb8d   :  { %v1852_v36 = vadd.f32 -1.4531521, %v1847_v21  ;;  %v1832_v24 = vmul.f32 %v4409_v19, %v1831_v60 }
 0xb8f   :  { %v1857_v26 = vmul.f32 %v1852_v36, %v1827_v40  ;;  %v1833_v0 = vadd.f32 %v4409_v19, %v1832_v24 }
 0xb91   :  { %v1862_v4 = vadd.f32 1.4214138, %v1857_v26  ;;  %v1837_v52 = vsel %vm1836_vm5, %v4409_v19, %v1833_v0 }
 0xb92   :  { %v1842_v32 = vsel %vm1839_vm6, %v1841_v27, %v1837_v52 }
 0xb93   :  { %v1867_v6 = vmul.f32 %v1862_v4, %v1827_v40  ;;  %v1848_v39 = vmul.f32 1.0614054, %v1842_v32 }
 0xb95   :  { %v1872_v59 = vadd.f32 -0.28449672, %v1867_v6  ;;  %v1853_v63 = vadd.f32 -1.4531521, %v1848_v39 }
 0xb97   :  { %v1877_v14 = vmul.f32 %v1872_v59, %v1827_v40  ;;  %v1858_v49 = vmul.f32 %v1853_v63, %v1842_v32 }
 0xb99   :  { %v1882_v62 = vadd.f32 0.2548296, %v1877_v14  ;;  %v1863_v35 = vadd.f32 1.4214138, %v1858_v49  ;;  %v5659_v49 = vld [vmem:[%s6498_s29 + $0x1] ss:$0 sm:$0xff] }
 0xb9b   :  { %v1887_v43 = vmul.f32 %v1882_v62, %v1827_v40  ;;  %v1868_v55 = vmul.f32 %v1863_v35, %v1842_v32 }
 0xb9d   :  { %v1912_v37 = vmul.f32 %v4411_v56, %v1887_v43  ;;  %v1873_v16 = vadd.f32 -0.28449672, %v1868_v55 }
 0xb9f   :  { %v1917_v45 = vsub.f32 1.0, %v1912_v37  ;;  %v1878_v8 = vmul.f32 %v1873_v16, %v1842_v32 }
 0xba1   :  { %v1927_v18 = vsub.f32 0.0, %v1917_v45  ;;  %v1883_v38 = vadd.f32 0.2548296, %v1878_v8 }
 0xba3   :  { %v1932_v12 = vsel %vm1922_vm7, %v1917_v45, %v1927_v18  ;;  %v1888_v47 = vmul.f32 %v1883_v38, %v1842_v32 }
 0xba4   :  { %v1937_v48 = vadd.f32 1.0, %v1932_v12 }
 0xba5   :  { %v1913_v22 = vmul.f32 %v4413_v20, %v1888_v47 }
 0xba6   :  { %v1942_v46 = vmul.f32 %v1937_v48, %v1747_v44 }
 0xba7   :  { %v1918_v25 = vsub.f32 1.0, %v1913_v22 }
 0xba8   :  { %4023 = vmatmul.msk.f32.gmra.mxu3 %vm85_vm0, %v1942_v46 }
 0xba9   :  { %v1928_v10 = vsub.f32 0.0, %v1918_v25 }
 0xbab   :  { %v1933_v31 = vsel %vm1923_vm8, %v1918_v25, %v1928_v10 }
 0xbac   :  { %v1938_v61 = vadd.f32 1.0, %v1933_v31 }
 0xbae   :  { %v1943_v57 = vmul.f32 %v1938_v61, %v1748_v33 }
 0xbb0   :  { %4024 = vmatmul.msk.f32.gmra.mxu3 %vm85_vm0, %v1943_v57 }
 0xbc9   :  { %v2014_v2 = vpop.xlane.xlu2 %2013 }
 0xbca   :  { %v2027_v28 = vmul.f32 %v2014_v2, %v4782_v54 }
 0xbcc   :  { %v2032_v29 = vsub.f32 %v5584_v41, %v2027_v28 }
 0xbce   :  { %v2037_v19 = vmul.f32 %v2032_v29, %v2032_v29 }
 0xbd0   :  { %v2042_v58 = vsel %vm170_vm2, %v2037_v19, 0.0 }
 0xbd1   :  { %2043 = vadd.xlane.f32.xlu2 %v2042_v58 }
 0xbf1   :  { %v1994_v42 = vpop.f32.mrf.mxu3 }
 0xbf2   :  { %v1995_v51 = vadd.f32 %v5580_v9, %v1994_v42 }
 0xbf4   :  { %v5620_v15 = vadd.f32 %v1995_v51, %v5438_v3 }
 0xbf6   :  { %v2018_v5 = vsel %vm170_vm2, %v5620_v15, 0.0 }
 0xbf7   :  { %2019 = vadd.xlane.f32.xlu0 %v2018_v5  ;;  %v2017_v40 = vpop.xlane.xlu1 %2016 }
 0xbf8   :  { %v2028_v21 = vmul.f32 %v2017_v40, %v4782_v54  ;;  %v5690_v40 = vld [vmem:[%s6452_s8 + $0x1] ss:$0 sm:$0xff]  ;;  %s6499_s8 = smov 112  }
 0xbfa   :  { %v5626_v60 = vsub.f32 %v5605_v1, %v2028_v21 }
 0xbfc   :  { %v2038_v50 = vmul.f32 %v5626_v60, %v5626_v60 }
 0xbfe   :  { %v2045_v36 = vsel %vm170_vm2, %v2038_v50, 0.0 }
 0xbff   :  { %2046 = vadd.xlane.f32.xlu0 %v2045_v36 }
 0xc2b   :  { %v1997_v23 = vpop.f32.mrf.mxu3 }
 0xc2c   :  { %v1998_v3 = vadd.f32 %v5580_v9, %v1997_v23 }
 0xc2e   :  { %v5633_v24 = vadd.f32 %v1998_v3, %v5450_v13  ;;  %v4029_v13 = vld [vmem:[%s6451_s7 + $0x30] sm:$0xff] }
 0xc2f   :  { %2176 = vmatpush.msrb.mxu2 %v4029_v13 }
 0xc30   :  { %v2021_v53 = vsel %vm170_vm2, %v5633_v24, 0.0 }
 0xc31   :  { %2022 = vadd.xlane.f32.xlu1 %v2021_v53 }
 0xc33   :  { %v2000_v26 = vpop.f32.mrf.mxu3 }
 0xc34   :  { %v2001_v0 = vadd.f32 %v5580_v9, %v2000_v26  ;;  %v4028_v9 = vld [vmem:[%s6451_s7 + $0x28] sm:$0xff] }
 0xc35   :  { %2177 = vmatpush.msrb.mxu2 %v4028_v9 }
 0xc36   :  { %v5639_v27 = vadd.f32 %v2001_v0, %v5456_v17  ;;  %v4027_v17 = vld [vmem:[%s6451_s7 + $0x20] sm:$0xff]  ;;  %s4593_s7 = smov [#allocation2]  }
 0xc37   :  { %2178 = vmatpush.msrb.mxu2 %v4027_v17 }
 0xc38   :  { %v2024_v4 = vsel %vm183_vm13, %v5639_v27, 0.0 }
 0xc39   :  { %2025 = vadd.xlane.f32.xlu2 %v2024_v4 }
 0xc44   :  { %v2044_v52 = vpop.xlane.xlu2 %2043 }
 0xc45   :  { %v2057_v30 = vmul.f32 %v2044_v52, %v4782_v54 }
 0xc47   :  { %v2062_v6 = vadd.f32 1e-05, %v2057_v30 }
 0xc49   :  { %4414 = vrsqrt.f32 %v2062_v6  ;;  %vm2073_vm12 = vweird.f32 %v2062_v6 }
 0xc4f   :  { %v4415_v32 = vpop.eup %4414 }
 0xc50   :  { %v2068_v39 = vmul.f32 %v4415_v32, %v2062_v6  ;;  %vm2074_vm9 = vweird.f32 %v4415_v32 }
 0xc51   :  { %vm2075_vm4 = vmor %vm2073_vm12, %vm2074_vm9 }
 0xc52   :  { %v2069_v59 = vmul.f32 %v4415_v32, %v2068_v39 }
 0xc54   :  { %v2070_v63 = vmul.f32 0.5, %v2069_v59 }
 0xc56   :  { %v2071_v7 = vsub.f32 1.5, %v2070_v63 }
 0xc58   :  { %v2072_v14 = vmul.f32 %v4415_v32, %v2071_v7 }
 0xc5a   :  { %v2076_v62 = vsel %vm2075_vm4, %v4415_v32, %v2072_v14 }
 0xc5b   :  { %v2117_v35 = vmul.f32 %v2076_v62, %v2032_v29 }
 0xc5d   :  { %v2125_v43 = vmul.f32 %v5659_v49, %v2117_v35 }
 0xc5f   :  { %v2133_v56 = vadd.f32 %v5664_v34, %v2125_v43 }
 0xc61   :  { %4032 = vmatmul.msk.f32.vlgmr.msrb.gmra.mxu2 %vm170_vm2, %v2133_v56 }
 0xc6a   :  { %v2020_v55 = vpop.xlane.xlu0 %2019 }
 0xc6b   :  { %v2029_v37 = vmul.f32 %v2020_v55, %v4782_v54 }
 0xc6d   :  { %v2034_v16 = vsub.f32 %v5620_v15, %v2029_v37 }
 0xc6f   :  { %v2039_v45 = vmul.f32 %v2034_v16, %v2034_v16 }
 0xc71   :  { %v2048_v8 = vsel %vm170_vm2, %v2039_v45, 0.0 }
 0xc72   :  { %2049 = vadd.xlane.f32.xlu1 %v2048_v8  ;;  %v2047_v18 = vpop.xlane.xlu0 %2046 }
 0xc73   :  { %v2058_v38 = vmul.f32 %v2047_v18, %v4782_v54 }
 0xc75   :  { %v2063_v12 = vadd.f32 1e-05, %v2058_v38 }
 0xc77   :  { %4416 = vrsqrt.f32 %v2063_v12  ;;  %vm2083_vm6 = vweird.f32 %v2063_v12 }
 0xc7d   :  { %v4417_v44 = vpop.eup %4416 }
 0xc7e   :  { %v2078_v48 = vmul.f32 %v4417_v44, %v2063_v12  ;;  %vm2084_vm5 = vweird.f32 %v4417_v44 }
 0xc7f   :  { %vm2085_vm7 = vmor %vm2083_vm6, %vm2084_vm5 }
 0xc80   :  { %v2079_v47 = vmul.f32 %v4417_v44, %v2078_v48 }
 0xc82   :  { %v2080_v20 = vmul.f32 0.5, %v2079_v47 }
 0xc84   :  { %v2081_v46 = vsub.f32 1.5, %v2080_v20 }
 0xc86   :  { %v2082_v22 = vmul.f32 %v4417_v44, %v2081_v46 }
 0xc88   :  { %v2086_v25 = vsel %vm2085_vm7, %v4417_v44, %v2082_v22 }
 0xc89   :  { %v2118_v10 = vmul.f32 %v2086_v25, %v5626_v60 }
 0xc8b   :  { %v2126_v31 = vmul.f32 %v5659_v49, %v2118_v10 }
 0xc8d   :  { %v2134_v33 = vadd.f32 %v5664_v34, %v2126_v31 }
 0xc8f   :  { %4033 = vmatmul.msk.f32.gmra.mxu2 %vm170_vm2, %v2134_v33 }
 0xca4   :  { %v2023_v61 = vpop.xlane.xlu1 %2022 }
 0xca5   :  { %v2030_v57 = vmul.f32 %v2023_v61, %v4782_v54 }
 0xca7   :  { %v2035_v2 = vsub.f32 %v5633_v24, %v2030_v57 }
 0xca9   :  { %v2040_v28 = vmul.f32 %v2035_v2, %v2035_v2 }
 0xcab   :  { %v2051_v29 = vsel %vm170_vm2, %v2040_v28, 0.0 }
 0xcac   :  { %2052 = vadd.xlane.f32.xlu0 %v2051_v29  ;;  %v2026_v19 = vpop.xlane.xlu2 %2025 }
 0xcad   :  { %v2031_v58 = vmul.f32 %v2026_v19, %v4782_v54 }
 0xcaf   :  { %v5682_v42 = vsub.f32 %v5639_v27, %v2031_v58 }
 0xcb1   :  { %v2041_v51 = vmul.f32 %v5682_v42, %v5682_v42 }
 0xcb3   :  { %v2054_v5 = vsel %vm183_vm13, %v2041_v51, 0.0 }
 0xcb4   :  { %2055 = vadd.xlane.f32.xlu2 %v2054_v5 }
 0xce4   :  { %v2180_v21 = vpop.f32.mrf.mxu2 }
 0xce5   :  { %v5693_v60 = vadd.f32 %v5690_v40, %v2180_v21  ;;  %v2050_v50 = vpop.xlane.xlu1 %2049 }
 0xce6   :  { %v2059_v36 = vmul.f32 %v2050_v50, %v4782_v54 }
 0xce7   :  { %2334 = vrot.lane.b32.xlu2 %v5693_v60, %s4580_s5  ;;  %v5699_v23 = vmul.f32 0.35355338, %v5693_v60 }
 0xce8   :  { %v2064_v3 = vadd.f32 1e-05, %v2059_v36 }
 0xce9   :  { %2328 = vrot.lane.b32.xlu1 %v5699_v23, %s4583_s1 }
 0xcea   :  { %4418 = vrsqrt.f32 %v2064_v3  ;;  %vm2093_vm9 = vweird.f32 %v2064_v3 }
 0xcf0   :  { %v4419_v53 = vpop.eup %4418 }
 0xcf1   :  { %v2088_v26 = vmul.f32 %v4419_v53, %v2064_v3  ;;  %vm2094_vm8 = vweird.f32 %v4419_v53 }
 0xcf2   :  { %vm2095_vm12 = vmor %vm2093_vm9, %vm2094_vm8 }
 0xcf3   :  { %v2089_v0 = vmul.f32 %v4419_v53, %v2088_v26 }
 0xcf5   :  { %v2090_v4 = vmul.f32 0.5, %v2089_v0 }
 0xcf7   :  { %v2091_v11 = vsub.f32 1.5, %v2090_v4 }
 0xcf9   :  { %v2092_v13 = vmul.f32 %v4419_v53, %v2091_v11 }
 0xcfb   :  { %v2096_v9 = vsel %vm2095_vm12, %v4419_v53, %v2092_v13 }
 0xcfc   :  { %v2119_v17 = vmul.f32 %v2096_v9, %v2034_v16 }
 0xcfe   :  { %v2127_v52 = vmul.f32 %v5659_v49, %v2119_v17 }
 0xd00   :  { %v2135_v30 = vadd.f32 %v5664_v34, %v2127_v52 }
 0xd02   :  { %4034 = vmatmul.msk.f32.gmra.mxu2 %vm170_vm2, %v2135_v30 }
 0xd12   :  { %v2183_v6 = vpop.f32.mrf.mxu2 }
 0xd13   :  { %v5707_v32 = vadd.f32 %v5690_v40, %v2183_v6 }
 0xd15   :  { %2205 = vrot.lane.b32.xlu2 %v5707_v32, %s4579_s26  ;;  %2336 = vrot.lane.b32.xlu0 %v5707_v32, %s4580_s5  ;;  %v5736_v57 = vmul.f32 0.35355338, %v5707_v32  ;;  %v4221_v6 = vpack.i.bf16 %v5693_v60, %v5707_v32 }
 0xd1d   :  { %2590 = vrot.lane.b32.xlu2 %v5693_v60, %s4581_s22  ;;  %2203 = vrot.lane.b32.xlu0 %v5693_v60, %s4579_s26 }
 0xd1f   :  { %v2053_v39 = vpop.xlane.xlu0 %2052 }
 0xd20   :  { %v2060_v59 = vmul.f32 %v2053_v39, %v4782_v54 }
 0xd22   :  { %v2065_v63 = vadd.f32 1e-05, %v2060_v59 }
 0xd24   :  { %4420 = vrsqrt.f32 %v2065_v63  ;;  %vm2103_vm5 = vweird.f32 %v2065_v63 }
 0xd27   :  { %v2056_v7 = vpop.xlane.xlu2 %2055 }
 0xd28   :  { %v2061_v14 = vmul.f32 %v2056_v7, %v4782_v54 }
 0xd2a   :  { %v4421_v62 = vpop.eup %4420  ;;  %v2066_v43 = vadd.f32 1e-05, %v2061_v14 }
 0xd2b   :  { %v2098_v35 = vmul.f32 %v4421_v62, %v2065_v63  ;;  %vm2104_vm4 = vweird.f32 %v4421_v62 }
 0xd2c   :  { %4422 = vrsqrt.f32 %v2066_v43  ;;  %vm2105_vm6 = vmor %vm2103_vm5, %vm2104_vm4  ;;  %vm2113_vm8 = vweird.f32 %v2066_v43 }
 0xd2d   :  { %v2099_v56 = vmul.f32 %v4421_v62, %v2098_v35 }
 0xd2f   :  { %v2100_v55 = vmul.f32 0.5, %v2099_v56 }
 0xd31   :  { %v2101_v37 = vsub.f32 1.5, %v2100_v55 }
 0xd32   :  { %v4423_v16 = vpop.eup %4422 }
 0xd33   :  { %v2102_v45 = vmul.f32 %v4421_v62, %v2101_v37  ;;  %v2108_v8 = vmul.f32 %v4423_v16, %v2066_v43  ;;  %vm2114_vm7 = vweird.f32 %v4423_v16 }
 0xd34   :  { %vm2115_vm9 = vmor %vm2113_vm8, %vm2114_vm7 }
 0xd35   :  { %v2106_v18 = vsel %vm2105_vm6, %v4421_v62, %v2102_v45  ;;  %v2109_v38 = vmul.f32 %v4423_v16, %v2108_v8 }
 0xd36   :  { %v2120_v12 = vmul.f32 %v2106_v18, %v2035_v2 }
 0xd37   :  { %v2110_v44 = vmul.f32 0.5, %v2109_v38 }
 0xd38   :  { %v2128_v48 = vmul.f32 %v5659_v49, %v2120_v12 }
 0xd39   :  { %v2111_v47 = vsub.f32 1.5, %v2110_v44 }
 0xd3a   :  { %v2136_v20 = vadd.f32 %v5664_v34, %v2128_v48 }
 0xd3b   :  { %v2112_v46 = vmul.f32 %v4423_v16, %v2111_v47 }
 0xd3c   :  { %4035 = vmatmul.msk.f32.gmra.mxu2 %vm170_vm2, %v2136_v20 }
 0xd3d   :  { %v2116_v22 = vsel %vm2115_vm9, %v4423_v16, %v2112_v46 }
 0xd3e   :  { %v2121_v25 = vmul.f32 %v2116_v22, %v5682_v42 }
 0xd40   :  { %v2129_v10 = vmul.f32 %v5659_v49, %v2121_v25 }
 0xd41   :  { %v2335_v11 = vpop.permute.xlu2 %2334 }
 0xd42   :  { %v2137_v31 = vadd.f32 %v5664_v34, %v2129_v10 }
 0xd44   :  { %4036 = vmatmul.msk.f32.gmra.mxu2 %vm170_vm2, %v2137_v31 }
 0xd5b   :  { %v2329_v17 = vpop.permute.xlu1 %2328 }
 0xd6f   :  { %v2206_v13 = vpop.permute.xlu2 %2205 }
 0xd77   :  { %v2591_v39 = vpop.permute.xlu2 %2590 }
 0xd85   :  { %v2186_v33 = vpop.f32.mrf.mxu2 }
 0xd86   :  { %v5727_v61 = vadd.f32 %v5690_v40, %v2186_v33 }
 0xd87   :  { %v2337_v4 = vpop.permute.xlu0 %2336 }
 0xd88   :  { %2594 = vrot.lane.b32.xlu2 %v5727_v61, %s4581_s22  ;;  %2207 = vrot.lane.b32.xlu0 %v5727_v61, %s4579_s26  ;;  %v5751_v49 = vmul.f32 0.35355338, %v5727_v61  ;;  %v2766_v28 = vrot.slane %v5727_v61, 1 }
 0xd89   :  { %2338 = vrot.lane.b32.xlu1 %v5727_v61, %s4580_s5 }
 0xd8f   :  { %v2204_v9 = vpop.permute.xlu0 %2203 }
 0xd90   :  { %2464 = vrot.lane.b32.xlu2 %v5707_v32, %s4585_s2  ;;  %2462 = vrot.lane.b32.xlu0 %v5693_v60, %s4585_s2 }
 0xd91   :  { %2330 = vrot.lane.b32.xlu1 %v5736_v57, %s4583_s1 }
 0xd98   :  { %2456 = vrot.lane.b32.xlu2 %v5699_v23, %s6499_s8  ;;  %2466 = vrot.lane.b32.xlu0 %v5727_v61, %s4585_s2 }
 0xd99   :  { %2592 = vrot.lane.b32.xlu1 %v5707_v32, %s4581_s22 }
 0xda0   :  { %2332 = vrot.lane.b32.xlu0 %v5751_v49, %s4583_s1 }
 0xda1   :  { %2584 = vrot.lane.b32.xlu1 %v5699_v23, %s6500_s30 }
 0xda8   :  { %2458 = vrot.lane.b32.xlu0 %v5736_v57, %s6499_s8 }
 0xda9   :  { %2586 = vrot.lane.b32.xlu1 %v5736_v57, %s6500_s30 }
 0xdb1   :  { %2588 = vrot.lane.b32.xlu1 %v5751_v49, %s6500_s30 }
 0xdbf   :  { %v2189_v34 = vpop.f32.mrf.mxu2 }
 0xdc0   :  { %v2190_v2 = vadd.f32 %v5690_v40, %v2189_v34 }
 0xdc2   :  { %v2767_v29 = vrot.slane %v2190_v2, 1  ;;  %v2198_v5 = vmul.f32 0.35355338, %v2190_v2 }
 0xdc4   :  { %v2768_v19 = vsel %vm929_vm10, %v2766_v28, %v2767_v29  ;;  %v2760_v3 = vrot.slane %v2198_v5, 1 }
 0xdc5   :  { %2899 = vrot.lane.b32.xlu1 %v2768_v19, %s4580_s5 }
 0xdc7   :  { %v2192_v58 = vpop.f32.mrf.mxu2 }
 0xdc8   :  { %v2193_v42 = vadd.f32 %v5690_v40, %v2192_v58  ;;  %v2759_v40 = vrot.slane %v5751_v49, 1 }
 0xdca   :  { %v5768_v51 = vrot.slane %v2193_v42, 1  ;;  %v2199_v21 = vmul.f32 0.35355338, %v2193_v42  ;;  %v5783_v26 = vsel %vm929_vm10, %v2759_v40, %v2760_v3 }
 0xdcc   :  { %2903 = vrot.lane.b32.xlu0 %v5768_v51, %s4580_s5  ;;  %v2770_v50 = vsel %vm929_vm10, %v2767_v29, %v5768_v51  ;;  %v5779_v53 = vrot.slane %v2199_v21, 1 }
 0xdcd   :  { %2460 = vrot.lane.b32.xlu1 %v5751_v49, %s6499_s8  ;;  %2901 = vrot.lane.b32.xlu2 %v2770_v50, %s4580_s5  ;;  %v5777_v36 = vpack.i.bf16 %v2768_v19, %v2770_v50  ;;  %s6502_s5 = smov 64  }
 0xdce   :  { %v5787_v0 = vsel %vm929_vm10, %v2760_v3, %v5779_v53  ;;  %vm6507_vm10 = vcmask 195584  }
 0xdcf   :  { %vm6508_vm12 = vmmov %vm6507_vm10 }
 0xdd0   :  { %vm6509_vm4 = vmmov %vm6507_vm10 }
 0xdd1   :  { %vm6510_vm5 = vmmov %vm6509_vm4 }
 0xdd4   :  { %2893 = vrot.lane.b32.xlu0 %v5783_v26, %s4583_s1 }
 0xdd5   :  { %2895 = vrot.lane.b32.xlu1 %v5787_v0, %s4583_s1  ;;  %2775 = vrot.lane.b32.xlu2 %v5768_v51, %s4579_s26 }
 0xddc   :  { %2771 = vrot.lane.b32.xlu0 %v2768_v19, %s4579_s26 }
 0xddd   :  { %3157 = vrot.lane.b32.xlu1 %v2770_v50, %s4581_s22  ;;  %2773 = vrot.lane.b32.xlu2 %v2770_v50, %s4579_s26  ;;  %s6501_s26 = smov 56  }
 0xde2   :  { %v2595_v7 = vpop.permute.xlu2 %2594 }
 0xde4   :  { %2897 = vrot.lane.b32.xlu0 %v5779_v53, %s4583_s1  ;;  %s6504_s1 = smov 40  }
 0xde5   :  { %3149 = vrot.lane.b32.xlu1 %v5783_v26, %s6500_s30  ;;  %3159 = vrot.lane.b32.xlu2 %v5768_v51, %s4581_s22 }
 0xdea   :  { %v2465_v14 = vpop.permute.xlu2 %2464 }
 0xdec   :  { %3031 = vrot.lane.b32.xlu0 %v5768_v51, %s4585_s2 }
 0xded   :  { %3021 = vrot.lane.b32.xlu1 %v5783_v26, %s6499_s8  ;;  %3155 = vrot.lane.b32.xlu2 %v2768_v19, %s4581_s22  ;;  %s6503_s22 = smov 48  }
 0xdf2   :  { %v2457_v35 = vpop.permute.xlu2 %2456 }
 0xdf4   :  { %3027 = vrot.lane.b32.xlu0 %v2768_v19, %s4585_s2 }
 0xdf5   :  { %2415 = vrot.lane.b32.xlu1 %v5727_v61, %s6501_s26  ;;  %3029 = vrot.lane.b32.xlu2 %v2770_v50, %s4585_s2  ;;  %s6505_s2 = smov 16  }
 0xdfa   :  { %v2208_v52 = vpop.permute.xlu0 %2207 }
 0xdfb   :  { %v2339_v30 = vpop.permute.xlu1 %2338  ;;  %4037 = vmatpush.xpose.msk.msrb.mxu0 %vm374_vm14, %v2208_v52 }
 0xdfc   :  { %4047 = vmatpush.xpose.msk.msra.mxu3 %vm374_vm14, %v2339_v30  ;;  %2287 = vrot.lane.b32.xlu0 %v5727_v61, %s6502_s5 }
 0xdfd   :  { %4222 = vrot.lane.b32.xlu1 %v4221_v6, %s6502_s5  ;;  %4217 = vrot.lane.b32.xlu2 %v4221_v6, %s6501_s26 }
 0xdff   :  { %4038 = vmatpush.xpose.msk.msrb.mxu0 %vm374_vm14, %v2206_v13 }
 0xe00   :  { %4048 = vmatpush.xpose.msk.msra.mxu3 %vm374_vm14, %v2337_v4 }
 0xe02   :  { %v2463_v59 = vpop.permute.xlu0 %2462 }
 0xe03   :  { %v2331_v63 = vpop.permute.xlu1 %2330  ;;  %4039 = vmatpush.xpose.msk.msrb.mxu0 %vm374_vm14, %v2204_v9 }
 0xe04   :  { %4049 = vmatpush.xpose.msk.msra.mxu3 %vm374_vm14, %v2335_v11  ;;  %2543 = vrot.lane.b32.xlu0 %v5727_v61, %s6503_s22 }
 0xe05   :  { %2671 = vrot.lane.b32.xlu2 %v5727_v61, %s6504_s1  ;;  %4227 = vrot.lane.b32.xlu1 %v4221_v6, %s6504_s1 }
 0xe06   :  { %4040 = vmatmul.msk.f32.vlgmr.msrb.gmra.mxu0 %vm374_vm14, %v5699_v23 }
 0xe07   :  { %4050 = vmatmul.msk.f32.vlgmr.msra.gmra.mxu3 %vm374_vm14, %v2329_v17 }
 0xe08   :  { %4067 = vmatpush.xpose.msk.msrb.mxu3 %vm374_vm14, %v2595_v7 }
 0xe0a   :  { %v2467_v60 = vpop.permute.xlu0 %2466 }
 0xe0b   :  { %v2593_v32 = vpop.permute.xlu1 %2592  ;;  %4057 = vmatpush.xpose.msk.msra.mxu0 %vm374_vm14, %v2467_v60 }
 0xe0c   :  { %4068 = vmatpush.xpose.msk.msrb.mxu3 %vm374_vm14, %v2593_v32  ;;  %2852 = vrot.lane.b32.xlu0 %v5768_v51, %s6502_s5 }
 0xe0d   :  { %4232 = vrot.lane.b32.xlu2 %v4221_v6, %s6503_s22  ;;  %4237 = vrot.lane.b32.xlu1 %v5777_v36, %s6501_s26 }
 0xe0e   :  { %4041 = vmatmul.msk.f32.gmra.mxu0 %vm374_vm14, %v5736_v57 }
 0xe0f   :  { %4051 = vmatmul.msk.f32.gmra.mxu3 %vm374_vm14, %v2331_v63  ;;  %4058 = vmatpush.xpose.msk.msra.mxu0 %vm374_vm14, %v2465_v14 }
 0xe10   :  { %4069 = vmatpush.xpose.msk.msrb.mxu3 %vm374_vm14, %v2591_v39 }
 0xe12   :  { %v2333_v23 = vpop.permute.xlu0 %2332 }
 0xe13   :  { %4059 = vmatpush.xpose.msk.msra.mxu0 %vm374_vm14, %v2463_v59  ;;  %v2585_v62 = vpop.permute.xlu1 %2584 }
 0xe14   :  { %3236 = vrot.lane.b32.xlu0 %v5768_v51, %s6504_s1 }
 0xe15   :  { %2980 = vrot.lane.b32.xlu2 %v5768_v51, %s6501_s26 }
 0xe16   :  { %4042 = vmatmul.msk.f32.gmra.mxu0 %vm374_vm14, %v5751_v49 }
 0xe17   :  { %4052 = vmatmul.msk.f32.gmra.mxu3 %vm374_vm14, %v2333_v23 }
 0xe1a   :  { %v2459_v56 = vpop.permute.xlu0 %2458 }
 0xe1b   :  { %v2587_v43 = vpop.permute.xlu1 %2586 }
 0xe1d   :  { %4242 = vrot.lane.b32.xlu2 %v5777_v36, %s6502_s5 }
 0xe1e   :  { %4060 = vmatmul.msk.f32.vlgmr.msra.gmra.mxu0 %vm374_vm14, %v2457_v35 }
 0xe1f   :  { %4070 = vmatmul.msk.f32.vlgmr.msrb.gmra.mxu3 %vm374_vm14, %v2585_v62 }
 0xe23   :  { %v2589_v37 = vpop.permute.xlu1 %2588 }
 0xe26   :  { %4061 = vmatmul.msk.f32.gmra.mxu0 %vm374_vm14, %v2459_v56 }
 0xe27   :  { %4071 = vmatmul.msk.f32.gmra.mxu3 %vm374_vm14, %v2587_v43  ;;  %v2902_v55 = vpop.permute.xlu2 %2901 }
 0xe2f   :  { %4072 = vmatmul.msk.f32.gmra.mxu3 %vm374_vm14, %v2589_v37  ;;  %v2776_v16 = vpop.permute.xlu2 %2775 }
 0xe30   :  { %4077 = vmatpush.xpose.msk.msrb.mxu0 %vm374_vm14, %v2776_v16 }
 0xe37   :  { %v2900_v45 = vpop.permute.xlu1 %2899  ;;  %v2774_v8 = vpop.permute.xlu2 %2773 }
 0xe38   :  { %4078 = vmatpush.xpose.msk.msrb.mxu0 %vm374_vm14, %v2774_v8 }
 0xe3e   :  { %v2904_v18 = vpop.permute.xlu0 %2903 }
 0xe3f   :  { %v2461_v38 = vpop.permute.xlu1 %2460  ;;  %4087 = vmatpush.xpose.msk.msra.mxu3 %vm374_vm14, %v2904_v18  ;;  %v3160_v12 = vpop.permute.xlu2 %3159 }
 0xe40   :  { %4062 = vmatmul.msk.f32.gmra.mxu0 %vm374_vm14, %v2461_v38 }
 0xe43   :  { %4088 = vmatpush.xpose.msk.msra.mxu3 %vm374_vm14, %v2902_v55 }
 0xe46   :  { %v2894_v44 = vpop.permute.xlu0 %2893 }
 0xe47   :  { %v2896_v48 = vpop.permute.xlu1 %2895  ;;  %4089 = vmatpush.xpose.msk.msra.mxu3 %vm374_vm14, %v2900_v45  ;;  %v3156_v47 = vpop.permute.xlu2 %3155 }
 0xe4a   :  { %4090 = vmatmul.msk.f32.vlgmr.msra.gmra.mxu3 %vm374_vm14, %v2894_v44 }
 0xe4b   :  { %4107 = vmatpush.xpose.msk.msrb.mxu3 %vm374_vm14, %v3160_v12 }
 0xe4e   :  { %v2772_v20 = vpop.permute.xlu0 %2771 }
 0xe4f   :  { %v3158_v46 = vpop.permute.xlu1 %3157  ;;  %4079 = vmatpush.xpose.msk.msrb.mxu0 %vm374_vm14, %v2772_v20  ;;  %v3030_v22 = vpop.permute.xlu2 %3029 }
 0xe50   :  { %4108 = vmatpush.xpose.msk.msrb.mxu3 %vm374_vm14, %v3158_v46 }
 0xe52   :  { %4080 = vmatmul.msk.f32.vlgmr.msrb.gmra.mxu0 %vm374_vm14, %v5783_v26  ;;  %4091 = vmatmul.msk.f32.gmra.mxu3 %vm374_vm14, %v2896_v48 }
 0xe54   :  { %4109 = vmatpush.xpose.msk.msrb.mxu3 %vm374_vm14, %v3156_v47 }
 0xe56   :  { %v2898_v25 = vpop.permute.xlu0 %2897 }
 0xe57   :  { %v3150_v10 = vpop.permute.xlu1 %3149  ;;  %v4218_v61 = vpop.permute.xlu2 %4217 }
 0xe58   :  { %v4219_v34 = vunpack.i.l.bf16 %v4218_v61  ;;  %v4220_v2 = vunpack.i.h.bf16 %v4218_v61 }
 0xe5a   :  { %4081 = vmatmul.msk.f32.gmra.mxu0 %vm374_vm14, %v5787_v0  ;;  %4092 = vmatmul.msk.f32.gmra.mxu3 %vm374_vm14, %v2898_v25 }
 0xe5e   :  { %v3032_v31 = vpop.permute.xlu0 %3031 }
 0xe5f   :  { %v3022_v33 = vpop.permute.xlu1 %3021  ;;  %4097 = vmatpush.xpose.msk.msra.mxu0 %vm374_vm14, %v3032_v31  ;;  %v2672_v28 = vpop.permute.xlu2 %2671 }
 0xe62   :  { %4082 = vmatmul.msk.f32.gmra.mxu0 %vm374_vm14, %v5779_v53  ;;  %4110 = vmatmul.msk.f32.vlgmr.msrb.gmra.mxu3 %vm374_vm14, %v3150_v10 }
 0xe63   :  { %4098 = vmatpush.xpose.msk.msra.mxu0 %vm374_vm14, %v3030_v22 }
 0xe66   :  { %v3028_v57 = vpop.permute.xlu0 %3027 }
 0xe67   :  { %v2416_v49 = vpop.permute.xlu1 %2415  ;;  %4099 = vmatpush.xpose.msk.msra.mxu0 %vm374_vm14, %v3028_v57  ;;  %v4233_v5 = vpop.permute.xlu2 %4232 }
 0xe68   :  { %4053 = vmatpush.msk.msra.mxu2 %vm133_vm1, %v2416_v49  ;;  %v4234_v50 = vunpack.i.l.bf16 %v4233_v5  ;;  %v4235_v26 = vunpack.i.h.bf16 %v4233_v5 }
 0xe6a   :  { %2444 = vmatpush.msra.mxu2 %v4219_v34  ;;  %4100 = vmatmul.msk.f32.vlgmr.msra.gmra.mxu0 %vm374_vm14, %v3022_v33 }
 0xe6c   :  { %2445 = vmatpush.msra.mxu2 %v4220_v2 }
 0xe6e   :  { %4073 = vmatpush.msk.msrb.mxu2 %vm133_vm1, %v2672_v28  ;;  %v2288_v29 = vpop.permute.xlu0 %2287 }
 0xe6f   :  { %v4223_v19 = vpop.permute.xlu1 %4222  ;;  %4043 = vmatpush.msk.msrb.mxu1 %vm133_vm1, %v2288_v29  ;;  %v5967_v49 = vpop.permute.xlu2 %2980 }
 0xe70   :  { %v4224_v58 = vunpack.i.l.bf16 %v4223_v19  ;;  %v4225_v42 = vunpack.i.h.bf16 %v4223_v19 }
 0xe72   :  { %2316 = vmatpush.msrb.mxu1 %v4224_v58 }
 0xe74   :  { %2317 = vmatpush.msrb.mxu1 %v4225_v42 }
 0xe76   :  { %v2544_v21 = vpop.permute.xlu0 %2543 }
 0xe77   :  { %v4228_v3 = vpop.permute.xlu1 %4227  ;;  %4063 = vmatpush.msk.msra.mxu1 %vm133_vm1, %v2544_v21  ;;  %v5975_v29 = vpop.permute.xlu2 %4242 }
 0xe78   :  { %v4229_v40 = vunpack.i.l.bf16 %v4228_v3  ;;  %v4230_v4 = vunpack.i.h.bf16 %v4228_v3 }
 0xe79   :  { %2572 = vmatpush.msra.mxu1 %v4234_v50 }
 0xe7a   :  { %2700 = vmatpush.msrb.mxu2 %v4229_v40 }
 0xe7b   :  { %2573 = vmatpush.msra.mxu1 %v4235_v26 }
 0xe7c   :  { %2701 = vmatpush.msrb.mxu2 %v4230_v4 }
 0xe7e   :  { %v5959_v31 = vpop.permute.xlu0 %2852 }
 0xe7f   :  { %v5978_v5 = vpop.permute.xlu1 %4237 }
 0xe83   :  { %v5889_v11 = vpop.f32.mrf.mxu0 }
 0xe84   :  { %v2250_v13 = vsel %vm416_vm15, %v5889_v11, -inf }
 0xe85   :  { %2251 = vmax.xlane.f32.xlu0 %v2250_v13 }
 0xe86   :  { %v5971_v2 = vpop.permute.xlu0 %3236 }
 0xe8a   :  { %v5893_v9 = vpop.f32.mrf.mxu3 }
 0xe8b   :  { %v2378_v17 = vsel %vm416_vm15, %v5893_v9, -inf  ;;  %v5897_v52 = vpop.f32.mrf.mxu0 }
 0xe8c   :  { %2379 = vmax.xlane.f32.xlu2 %v2378_v17  ;;  %v2253_v6 = vsel %vm416_vm15, %v5897_v52, -inf }
 0xe92   :  { %v5899_v30 = vpop.f32.mrf.mxu3 }
 0xe93   :  { %v2381_v39 = vsel %vm416_vm15, %v5899_v30, -inf  ;;  %v5905_v59 = vpop.f32.mrf.mxu0 }
 0xe94   :  { %2254 = vmax.xlane.f32.xlu2 %v2253_v6  ;;  %2382 = vmax.xlane.f32.xlu1 %v2381_v39  ;;  %v2256_v7 = vsel %vm423_vm3, %v5905_v59, -inf }
 0xe9a   :  { %v5907_v63 = vpop.f32.mrf.mxu3 }
 0xe9b   :  { %v2384_v60 = vsel %vm423_vm3, %v5907_v63, -inf  ;;  %v5913_v32 = vpop.f32.mrf.mxu0 }
 0xe9c   :  { %2257 = vmax.xlane.f32.xlu1 %v2256_v7  ;;  %2385 = vmax.xlane.f32.xlu0 %v2384_v60  ;;  %v2506_v23 = vsel %vm416_vm15, %v5913_v32, -inf }
 0xea2   :  { %v5915_v14 = vpop.f32.mrf.mxu3 }
 0xea3   :  { %v2634_v62 = vsel %vm416_vm15, %v5915_v14, -inf  ;;  %v5921_v35 = vpop.f32.mrf.mxu0 }
 0xea4   :  { %2507 = vmax.xlane.f32.xlu0 %v2506_v23  ;;  %2635 = vmax.xlane.f32.xlu2 %v2634_v62  ;;  %v2509_v56 = vsel %vm416_vm15, %v5921_v35, -inf }
 0xeaa   :  { %v5923_v43 = vpop.f32.mrf.mxu3 }
 0xeab   :  { %v2637_v55 = vsel %vm416_vm15, %v5923_v43, -inf }
 0xeac   :  { %2510 = vmax.xlane.f32.xlu2 %v2509_v56  ;;  %2638 = vmax.xlane.f32.xlu1 %v2637_v55 }
 0xeb2   :  { %v5929_v37 = vpop.f32.mrf.mxu3 }
 0xeb3   :  { %v2640_v16 = vsel %vm423_vm3, %v5929_v37, -inf }
 0xeb4   :  { %2641 = vmax.xlane.f32.xlu0 %v2640_v16 }
 0xebd   :  { %v5933_v45 = vpop.f32.mrf.mxu0 }
 0xebe   :  { %v2512_v8 = vsel %vm423_vm3, %v5933_v45, -inf }
 0xebf   :  { %2513 = vmax.xlane.f32.xlu1 %v2512_v8 }
 0xecd   :  { %v5937_v18 = vpop.f32.mrf.mxu3 }
 0xece   :  { %v2943_v38 = vsel %vm416_vm15, %v5937_v18, -inf }
 0xecf   :  { %2944 = vmax.xlane.f32.xlu2 %v2943_v38  ;;  %v5941_v12 = vpop.f32.mrf.mxu0 }
 0xed0   :  { %v2815_v44 = vsel %vm416_vm15, %v5941_v12, -inf }
 0xed1   :  { %2816 = vmax.xlane.f32.xlu1 %v2815_v44 }
 0xed5   :  { %v5945_v48 = vpop.f32.mrf.mxu3 }
 0xed6   :  { %v2946_v47 = vsel %vm416_vm15, %v5945_v48, -inf }
 0xed7   :  { %v5949_v20 = vpop.f32.mrf.mxu0  ;;  %2947 = vmax.xlane.f32.xlu2 %v2946_v47 }
 0xed8   :  { %v2818_v46 = vsel %vm416_vm15, %v5949_v20, -inf }
 0xed9   :  { %2819 = vmax.xlane.f32.xlu0 %v2818_v46 }
 0xedd   :  { %v5957_v10 = vpop.f32.mrf.mxu3 }
 0xede   :  { %v2949_v61 = vsel %vm423_vm3, %v5957_v10, -inf }
 0xedf   :  { %v5953_v22 = vpop.f32.mrf.mxu0 }
 0xee0   :  { %v2821_v25 = vsel %vm423_vm3, %v5953_v22, -inf }
 0xee1   :  { %2822 = vmax.xlane.f32.xlu2 %v2821_v25 }
 0xee5   :  { %v5969_v34 = vpop.f32.mrf.mxu3 }
 0xee6   :  { %v3199_v28 = vsel %vm416_vm15, %v5969_v34, -inf }
 0xee7   :  { %v5961_v33 = vpop.f32.mrf.mxu0 }
 0xee8   :  { %v3071_v57 = vsel %vm416_vm15, %v5961_v33, -inf }
 0xee9   :  { %2950 = vmax.xlane.f32.xlu2 %v2949_v61  ;;  %3072 = vmax.xlane.f32.xlu1 %v3071_v57 }
 0xef1   :  { %3200 = vmax.xlane.f32.xlu2 %v3199_v28 }
 0xef8   :  { %v2252_v19 = vpop.xlane.xlu0 %2251 }
 0xef9   :  { %v2259_v58 = vsub.f32 %v5889_v11, %v2252_v19 }
 0xefb   :  { %v2262_v42 = vmul.f32 1.442695, %v2259_v58 }
 0xefd   :  { %4424 = vpow2.f32 %v2262_v42 }
 0xeff   :  { %v2380_v21 = vpop.xlane.xlu2 %2379 }
 0xf00   :  { %v2387_v50 = vsub.f32 %v5893_v9, %v2380_v21 }
 0xf02   :  { %v2390_v3 = vmul.f32 1.442695, %v2387_v50 }
 0xf03   :  { %v5981_v40 = vpop.eup %4424 }
 0xf04   :  { %4426 = vpow2.f32 %v2390_v3  ;;  %v2268_v26 = vsel %vm416_vm15, %v5981_v40, 0.0 }
 0xf05   :  { %2269 = vadd.xlane.f32.xlu0 %v2268_v26 }
 0xf07   :  { %v2255_v4 = vpop.xlane.xlu2 %2254  ;;  %v2383_v13 = vpop.xlane.xlu1 %2382 }
 0xf08   :  { %v2260_v17 = vsub.f32 %v5897_v52, %v2255_v4  ;;  %v2388_v11 = vsub.f32 %v5899_v30, %v2383_v13 }
 0xf0a   :  { %v5987_v6 = vpop.eup %4426  ;;  %v2264_v39 = vmul.f32 1.442695, %v2260_v17  ;;  %v2392_v7 = vmul.f32 1.442695, %v2388_v11 }
 0xf0b   :  { %v2396_v9 = vsel %vm416_vm15, %v5987_v6, 0.0 }
 0xf0c   :  { %4428 = vpow2.f32 %v2264_v39 }
 0xf0d   :  { %4430 = vpow2.f32 %v2392_v7  ;;  %2397 = vadd.xlane.f32.xlu0 %v2396_v9 }
 0xf0f   :  { %v2386_v60 = vpop.xlane.xlu0 %2385  ;;  %v2258_v23 = vpop.xlane.xlu1 %2257 }
 0xf10   :  { %v2389_v62 = vsub.f32 %v5907_v63, %v2386_v60  ;;  %v2261_v56 = vsub.f32 %v5905_v59, %v2258_v23 }
 0xf12   :  { %v5993_v55 = vpop.eup %4428  ;;  %v2394_v52 = vmul.f32 1.442695, %v2389_v62  ;;  %v2266_v30 = vmul.f32 1.442695, %v2261_v56 }
 0xf13   :  { %v5995_v16 = vpop.eup %4430  ;;  %v2271_v8 = vsel %vm416_vm15, %v5993_v55, 0.0 }
 0xf14   :  { %4432 = vpow2.f32 %v2394_v52  ;;  %2272 = vadd.xlane.f32.xlu1 %v2271_v8  ;;  %v2399_v38 = vsel %vm416_vm15, %v5995_v16, 0.0 }
 0xf15   :  { %4434 = vpow2.f32 %v2266_v30  ;;  %2400 = vadd.xlane.f32.xlu0 %v2399_v38 }
 0xf17   :  { %v2508_v44 = vpop.xlane.xlu0 %2507  ;;  %v2636_v63 = vpop.xlane.xlu2 %2635 }
 0xf18   :  { %v2515_v59 = vsub.f32 %v5913_v32, %v2508_v44  ;;  %v2643_v47 = vsub.f32 %v5915_v14, %v2636_v63 }
 0xf1a   :  { %v6003_v46 = vpop.eup %4432  ;;  %v2518_v25 = vmul.f32 1.442695, %v2515_v59  ;;  %v2646_v61 = vmul.f32 1.442695, %v2643_v47 }
 0xf1b   :  { %v6005_v57 = vpop.eup %4434  ;;  %v2402_v19 = vsel %vm423_vm3, %v6003_v46, 0.0 }
 0xf1c   :  { %4436 = vpow2.f32 %v2518_v25  ;;  %v2274_v28 = vsel %vm423_vm3, %v6005_v57, 0.0 }
 0xf1d   :  { %4438 = vpow2.f32 %v2646_v61  ;;  %2275 = vadd.xlane.f32.xlu1 %v2274_v28  ;;  %2403 = vadd.xlane.f32.xlu0 %v2402_v19 }
 0xf1f   :  { %v2639_v58 = vpop.xlane.xlu1 %2638  ;;  %v2511_v11 = vpop.xlane.xlu2 %2510 }
 0xf20   :  { %v2644_v32 = vsub.f32 %v5923_v43, %v2639_v58  ;;  %v2516_v23 = vsub.f32 %v5921_v35, %v2511_v11 }
 0xf22   :  { %v6012_v14 = vpop.eup %4436  ;;  %v2648_v42 = vmul.f32 1.442695, %v2644_v32 }
 0xf23   :  { %v6014_v21 = vpop.eup %4438  ;;  %v2524_v3 = vsel %vm416_vm15, %v6012_v14, 0.0 }
 0xf24   :  { %v2652_v50 = vsel %vm416_vm15, %v6014_v21, 0.0  ;;  %4440 = vpow2.f32 %v2648_v42 }
 0xf25   :  { %2653 = vadd.xlane.f32.xlu2 %v2652_v50  ;;  %2525 = vadd.xlane.f32.xlu0 %v2524_v3 }
 0xf27   :  { %v2642_v62 = vpop.xlane.xlu0 %2641 }
 0xf28   :  { %v2645_v30 = vsub.f32 %v5929_v37, %v2642_v62 }
 0xf2a   :  { %v6020_v26 = vpop.eup %4440  ;;  %v2650_v63 = vmul.f32 1.442695, %v2645_v30 }
 0xf2b   :  { %v2655_v4 = vsel %vm416_vm15, %v6020_v26, 0.0 }
 0xf2d   :  { %2656 = vadd.xlane.f32.xlu0 %v2655_v4 }
 0xf32   :  { %v2514_v43 = vpop.xlane.xlu1 %2513 }
 0xf33   :  { %v2517_v13 = vsub.f32 %v5933_v45, %v2514_v43  ;;  %v2520_v45 = vmul.f32 1.442695, %v2516_v23 }
 0xf35   :  { %v2522_v17 = vmul.f32 1.442695, %v2517_v13 }
 0xf36   :  { %4247 = vrot.lane.b32.xlu1 %v5777_v36, %s6504_s1 }
 0xf37   :  { %4442 = vpow2.f32 %v2522_v17 }
 0xf38   :  { %4444 = vpow2.f32 %v2520_v45 }
 0xf3d   :  { %v6027_v39 = vpop.eup %4442 }
 0xf3e   :  { %v2530_v7 = vsel %vm423_vm3, %v6027_v39, 0.0  ;;  %v6038_v44 = vpop.eup %4444 }
 0xf3f   :  { %2531 = vadd.xlane.f32.xlu2 %v2530_v7  ;;  %v2527_v47 = vsel %vm416_vm15, %v6038_v44, 0.0 }
 0xf41   :  { %4252 = vrot.lane.b32.xlu0 %v5777_v36, %s6503_s22 }
 0xf42   :  { %v2945_v9 = vpop.xlane.xlu2 %2944 }
 0xf43   :  { %v2952_v52 = vsub.f32 %v5937_v18, %v2945_v9 }
 0xf44   :  { %v2817_v59 = vpop.xlane.xlu1 %2816 }
 0xf45   :  { %v2955_v8 = vmul.f32 1.442695, %v2952_v52  ;;  %v2824_v18 = vsub.f32 %v5941_v12, %v2817_v59 }
 0xf47   :  { %4446 = vpow2.f32 %v2955_v8  ;;  %v2827_v61 = vmul.f32 1.442695, %v2824_v18 }
 0xf48   :  { %4448 = vpow2.f32 %v2650_v63  ;;  %v4244_v63 = vunpack.i.l.bf16 %v5975_v29 }
 0xf4a   :  { %v2948_v60 = vpop.xlane.xlu2 %2947 }
 0xf4b   :  { %v2953_v58 = vsub.f32 %v5945_v48, %v2948_v60 }
 0xf4c   :  { %v2820_v38 = vpop.xlane.xlu0 %2819 }
 0xf4d   :  { %v2825_v35 = vsub.f32 %v5949_v20, %v2820_v38  ;;  %v6044_v25 = vpop.eup %4446  ;;  %v2957_v50 = vmul.f32 1.442695, %v2953_v58 }
 0xf4e   :  { %v2961_v19 = vsel %vm416_vm15, %v6044_v25, 0.0  ;;  %v6049_v20 = vpop.eup %4448 }
 0xf4f   :  { %v2658_v12 = vsel %vm423_vm3, %v6049_v20, 0.0 }
 0xf54   :  { %v2823_v56 = vpop.xlane.xlu2 %2822 }
 0xf55   :  { %v2826_v43 = vsub.f32 %v5953_v22, %v2823_v56 }
 0xf57   :  { %3108 = vrot.lane.b32.xlu2 %v5768_v51, %s6503_s22  ;;  %v2829_v51 = vmul.f32 1.442695, %v2825_v35  ;;  %v2831_v7 = vmul.f32 1.442695, %v2826_v43  ;;  %v4245_v35 = vunpack.i.h.bf16 %v5975_v29 }
 0xf59   :  { %4450 = vpow2.f32 %v2829_v51 }
 0xf5a   :  { %4452 = vpow2.f32 %v2827_v61 }
 0xf5c   :  { %v2951_v36 = vpop.xlane.xlu2 %2950  ;;  %v3073_v13 = vpop.xlane.xlu1 %3072 }
 0xf5d   :  { %v2954_v3 = vsub.f32 %v5957_v10, %v2951_v36  ;;  %v3080_v10 = vsub.f32 %v5961_v33, %v3073_v13 }
 0xf5f   :  { %v6054_v42 = vpop.eup %4450  ;;  %v2959_v48 = vmul.f32 1.442695, %v2954_v3  ;;  %v3083_v23 = vmul.f32 1.442695, %v3080_v10 }
 0xf60   :  { %2528 = vadd.xlane.f32.xlu1 %v2527_v47  ;;  %v6059_v4 = vpop.eup %4452 }
 0xf61   :  { %v2833_v17 = vsel %vm416_vm15, %v6059_v4, 0.0 }
 0xf64   :  { %v3201_v37 = vpop.xlane.xlu2 %3200 }
 0xf65   :  { %v3208_v28 = vsub.f32 %v5969_v34, %v3201_v37  ;;  %v2836_v34 = vsel %vm416_vm15, %v6054_v42, 0.0  ;;  %v4240_v37 = vunpack.i.h.bf16 %v5978_v5 }
 0xf67   :  { %v3211_v32 = vmul.f32 1.442695, %v3208_v28 }
 0xf68   :  { %2962 = vadd.xlane.f32.xlu1 %v2961_v19 }
 0xf69   :  { %4454 = vpow2.f32 %v3211_v32 }
 0xf6a   :  { %4456 = vpow2.f32 %v2957_v50 }
 0xf6b   :  { %2659 = vadd.xlane.f32.xlu0 %v2658_v12  ;;  %4458 = vpow2.f32 %v2959_v48 }
 0xf6c   :  { %4460 = vpow2.f32 %v2831_v7 }
 0xf6f   :  { %v6064_v11 = vpop.eup %4454 }
 0xf70   :  { %2837 = vadd.xlane.f32.xlu1 %v2836_v34  ;;  %v3217_v9 = vsel %vm416_vm15, %v6064_v11, 0.0  ;;  %v6069_v60 = vpop.eup %4456 }
 0xf71   :  { %v2964_v45 = vsel %vm416_vm15, %v6069_v60, 0.0  ;;  %v6073_v62 = vpop.eup %4458 }
 0xf72   :  { %v6075_v56 = vpop.eup %4460  ;;  %v2967_v33 = vsel %vm423_vm3, %v6073_v62, 0.0 }
 0xf73   :  { %2834 = vadd.xlane.f32.xlu0 %v2833_v17  ;;  %v2839_v38 = vsel %vm423_vm3, %v6075_v56, 0.0 }
 0xf78   :  { %3218 = vadd.xlane.f32.xlu1 %v3217_v9  ;;  %v2270_v22 = vpop.xlane.xlu0 %2269 }
 0xf79   :  { %4462 = vrcp.f32 %v2270_v22 }
 0xf7a   :  { %4464 = vpow2.f32 %v3083_v23 }
 0xf7b   :  { %2965 = vadd.xlane.f32.xlu0 %v2964_v45 }
 0xf7f   :  { %v4463_v52 = vpop.eup %4462 }
 0xf80   :  { %2968 = vadd.xlane.f32.xlu2 %v2967_v33  ;;  %v2280_v30 = vmul.f32 %v4463_v52, %v5981_v40  ;;  %v2398_v8 = vpop.xlane.xlu0 %2397  ;;  %v6083_v36 = vpop.eup %4464 }
 0xf81   :  { %4466 = vrcp.f32 %v2398_v8  ;;  %v3089_v40 = vsel %vm416_vm15, %v6083_v36, 0.0 }
 0xf82   :  { %4044 = vmatmul.msk.f32.vlgmr.msrb.gmra.mxu1 %vm416_vm15, %v2280_v30 }
 0xf83   :  { %4083 = vmatpush.msk.msrb.mxu1 %vm133_vm1, %v5959_v31  ;;  %2840 = vadd.xlane.f32.xlu0 %v2839_v38  ;;  %v4239_v31 = vunpack.i.l.bf16 %v5978_v5 }
 0xf85   :  { %2881 = vmatpush.msrb.mxu1 %v4244_v63 }
 0xf87   :  { %v2273_v59 = vpop.xlane.xlu1 %2272  ;;  %v4467_v47 = vpop.eup %4466  ;;  %2882 = vmatpush.msrb.mxu1 %v4245_v35 }
 0xf88   :  { %4468 = vrcp.f32 %v2273_v59  ;;  %3090 = vadd.xlane.f32.xlu2 %v3089_v40  ;;  %v2408_v18 = vmul.f32 %v4467_v47, %v5987_v6  ;;  %v2401_v51 = vpop.xlane.xlu0 %2400 }
 0xf89   :  { %4470 = vrcp.f32 %v2401_v51 }
 0xf8a   :  { %4054 = vmatmul.msk.f32.vlgmr.msra.gmra.mxu2 %vm416_vm15, %v2408_v18 }
 0xf8b   :  { %4093 = vmatpush.msk.msra.mxu2 %vm133_vm1, %v5967_v49 }
 0xf8d   :  { %3009 = vmatpush.msra.mxu2 %v4239_v31 }
 0xf8e   :  { %v4469_v29 = vpop.eup %4468 }
 0xf8f   :  { %v2281_v61 = vmul.f32 %v4469_v29, %v5993_v55  ;;  %v4471_v28 = vpop.eup %4470  ;;  %3010 = vmatpush.msra.mxu2 %v4240_v37 }
 0xf90   :  { %v2276_v19 = vpop.xlane.xlu1 %2275  ;;  %v2404_v6 = vpop.xlane.xlu0 %2403  ;;  %v2409_v58 = vmul.f32 %v4471_v28, %v5995_v16 }
 0xf91   :  { %4472 = vrcp.f32 %v2276_v19  ;;  %3151 = vrot.lane.b32.xlu1 %v5787_v0, %s6500_s30  ;;  %4045 = vmatmul.msk.f32.gmra.mxu1 %vm416_vm15, %v2281_v61 }
 0xf92   :  { %4474 = vrcp.f32 %v2404_v6  ;;  %4055 = vmatmul.msk.f32.gmra.mxu2 %vm416_vm15, %v2409_v58 }
 0xf97   :  { %v4473_v49 = vpop.eup %4472  ;;  %3153 = vrot.lane.b32.xlu0 %v5779_v53, %s6500_s30 }
 0xf98   :  { %v4475_v5 = vpop.eup %4474  ;;  %v2654_v32 = vpop.xlane.xlu2 %2653  ;;  %v2282_v55 = vmul.f32 %v4473_v49, %v6005_v57 }
 0xf99   :  { %4476 = vrcp.f32 %v2654_v32  ;;  %3025 = vrot.lane.b32.xlu1 %v5779_v53, %s6499_s8  ;;  %v2526_v12 = vpop.xlane.xlu0 %2525  ;;  %v2410_v50 = vmul.f32 %v4475_v5, %v6003_v46 }
 0xf9a   :  { %4478 = vrcp.f32 %v2526_v12  ;;  %4046 = vmatmul.msk.f32.gmra.mxu1 %vm416_vm15, %v2282_v55 }
 0xf9b   :  { %4056 = vmatmul.msk.f32.gmra.mxu2 %vm416_vm15, %v2410_v50 }
 0xf9f   :  { %v4477_v16 = vpop.eup %4476 }
 0xfa0   :  { %v4479_v3 = vpop.eup %4478  ;;  %3023 = vrot.lane.b32.xlu2 %v5787_v0, %s6499_s8  ;;  %v2664_v34 = vmul.f32 %v4477_v16, %v6014_v21 }
 0xfa1   :  { %v2536_v57 = vmul.f32 %v4479_v3, %v6012_v14  ;;  %v2657_v43 = vpop.xlane.xlu0 %2656 }
 0xfa2   :  { %4480 = vrcp.f32 %v2657_v43 }
 0xfa3   :  { %4064 = vmatmul.msk.f32.vlgmr.msra.gmra.mxu1 %vm416_vm15, %v2536_v57  ;;  %4074 = vmatmul.msk.f32.vlgmr.msrb.gmra.mxu2 %vm416_vm15, %v2664_v34 }
 0xfa4   :  { %4113 = vmatpush.msk.msrb.mxu2 %vm133_vm1, %v5971_v2 }
 0xfa8   :  { %v4481_v53 = vpop.eup %4480  ;;  %v4248_v46 = vpop.permute.xlu1 %4247 }
 0xfa9   :  { %v4249_v48 = vunpack.i.l.bf16 %v4248_v46  ;;  %v2665_v13 = vmul.f32 %v4481_v53, %v6020_v26  ;;  %v4250_v17 = vunpack.i.h.bf16 %v4248_v46  ;;  %v4120_v46 = vld [vmem:[%s6453_s9 + $0x38] sm:$0xff] }
 0xfaa   :  { %3367 = vmatpush.msrb.mxu0 %v4120_v46 }
 0xfab   :  { %3265 = vmatpush.msrb.mxu2 %v4249_v48  ;;  %v4119_v48 = vld [vmem:[%s6453_s9 + $0x30] sm:$0xff] }
 0xfac   :  { %4075 = vmatmul.msk.f32.gmra.mxu2 %vm416_vm15, %v2665_v13  ;;  %3368 = vmatpush.msrb.mxu0 %v4119_v48 }
 0xfad   :  { %3266 = vmatpush.msrb.mxu2 %v4250_v17 }
 0xfb2   :  { %v2532_v0 = vpop.xlane.xlu2 %2531 }
 0xfb3   :  { %v4253_v14 = vpop.permute.xlu0 %4252 }
 0xfb4   :  { %v4254_v7 = vunpack.i.l.bf16 %v4253_v14  ;;  %v4255_v10 = vunpack.i.h.bf16 %v4253_v14  ;;  %v4117_v14 = vld [vmem:[%s6453_s9 + $0x20] sm:$0xff] }
 0xfba   :  { %v3109_v21 = vpop.permute.xlu2 %3108 }
 0xfbb   :  { %4103 = vmatpush.msk.msra.mxu1 %vm133_vm1, %v3109_v21 }
 0xfbd   :  { %3137 = vmatpush.msra.mxu1 %v4254_v7 }
 0xfbf   :  { %3138 = vmatpush.msra.mxu1 %v4255_v10 }
 0xfd3   :  { %v2529_v2 = vpop.xlane.xlu1 %2528 }
 0xfd4   :  { %4482 = vrcp.f32 %v2529_v2 }
 0xfd5   :  { %4484 = vrcp.f32 %v2532_v0  ;;  %v4118_v0 = vld [vmem:[%s6453_s9 + $0x28] sm:$0xff]  ;;  %s3912_s9 = sshll.u32 %s6465_s21, 4  ;;  %s3913_s9 = int_to_ptr.hbm [resolvable:$true] %s3912_s9 }
 0xfd6   :  { %3369 = vmatpush.msrb.mxu0 %v4118_v0 }
 0xfd8   :  { %3370 = vmatpush.msrb.mxu0 %v4117_v14 }
 0xfda   :  { %v4483_v9 = vpop.eup %4482 }
 0xfdb   :  { %v2537_v26 = vmul.f32 %v4483_v9, %v6038_v44  ;;  %v4485_v23 = vpop.eup %4484  ;;  %v2963_v45 = vpop.xlane.xlu1 %2962 }
 0xfdc   :  { %v2538_v33 = vmul.f32 %v4485_v23, %v6027_v39 }
 0xfdd   :  { %4065 = vmatmul.msk.f32.gmra.mxu1 %vm416_vm15, %v2537_v26 }
 0xfde   :  { %v2660_v22 = vpop.xlane.xlu0 %2659 }
 0xfdf   :  { %4486 = vrcp.f32 %v2660_v22 }
 0xfe0   :  { %4488 = vrcp.f32 %v2963_v45 }
 0xfe3   :  { %v2838_v38 = vpop.xlane.xlu1 %2837 }
 0xfe5   :  { %4066 = vmatmul.msk.f32.gmra.mxu1 %vm416_vm15, %v2538_v33  ;;  %v4487_v52 = vpop.eup %4486 }
 0xfe6   :  { %v2835_v30 = vpop.xlane.xlu0 %2834  ;;  %v2666_v8 = vmul.f32 %v4487_v52, %v6049_v20  ;;  %v4489_v44 = vpop.eup %4488 }
 0xfe7   :  { %4490 = vrcp.f32 %v2835_v30  ;;  %v2973_v35 = vmul.f32 %v4489_v44, %v6044_v25 }
 0xfe8   :  { %4076 = vmatmul.msk.f32.gmra.mxu2 %vm416_vm15, %v2666_v8  ;;  %4492 = vrcp.f32 %v2838_v38 }
 0xfeb   :  { %v3219_v25 = vpop.xlane.xlu1 %3218 }
 0xfed   :  { %v4491_v63 = vpop.eup %4490 }
 0xfee   :  { %v2845_v59 = vmul.f32 %v4491_v63, %v6059_v4  ;;  %v2966_v40 = vpop.xlane.xlu0 %2965  ;;  %v4493_v47 = vpop.eup %4492 }
 0xfef   :  { %4494 = vrcp.f32 %v2966_v40  ;;  %v2846_v51 = vmul.f32 %v4493_v47, %v6054_v42 }
 0xff0   :  { %4084 = vmatmul.msk.f32.vlgmr.msrb.gmra.mxu1 %vm416_vm15, %v2845_v59  ;;  %4094 = vmatmul.msk.f32.vlgmr.msra.gmra.mxu2 %vm416_vm15, %v2973_v35 }
 0xff3   :  { %v2969_v39 = vpop.xlane.xlu2 %2968 }
 0xff4   :  { %4496 = vrcp.f32 %v2969_v39 }
 0xff5   :  { %v4495_v20 = vpop.eup %4494 }
 0xff6   :  { %v2841_v18 = vpop.xlane.xlu0 %2840  ;;  %v2974_v31 = vmul.f32 %v4495_v20, %v6069_v60 }
 0xff7   :  { %4498 = vrcp.f32 %v2841_v18 }
 0xff8   :  { %4085 = vmatmul.msk.f32.gmra.mxu1 %vm416_vm15, %v2846_v51  ;;  %4095 = vmatmul.msk.f32.gmra.mxu2 %vm416_vm15, %v2974_v31  ;;  %4500 = vrcp.f32 %v3219_v25 }
 0xffa   :  { %v4497_v29 = vpop.eup %4496 }
 0xffb   :  { %v3091_v4 = vpop.xlane.xlu2 %3090  ;;  %v2975_v28 = vmul.f32 %v4497_v29, %v6073_v62 }
 0xffc   :  { %4502 = vrcp.f32 %v3091_v4 }
 0xffd   :  { %v4499_v37 = vpop.eup %4498 }
 0xffe   :  { %v2847_v61 = vmul.f32 %v4499_v37, %v6075_v56  ;;  %v4501_v42 = vpop.eup %4500 }
 0xfff   :  { %v2319_v58 = vpop.f32.mrf.mxu1  ;;  %v3229_v49 = vmul.f32 %v4501_v42, %v6064_v11 }
0x1000   :  { %4086 = vmatmul.msk.f32.gmra.mxu1 %vm416_vm15, %v2847_v61  ;;  %4096 = vmatmul.msk.f32.gmra.mxu2 %vm416_vm15, %v2975_v28 }
0x1002   :  { %v4503_v6 = vpop.eup %4502 }
0x1003   :  { %v3152_v60 = vpop.permute.xlu1 %3151  ;;  %v3024_v19 = vpop.permute.xlu2 %3023  ;;  %v3101_v5 = vmul.f32 %v4503_v6, %v6083_v36 }
0x1004   :  { %4111 = vmatmul.msk.f32.gmra.mxu3 %vm374_vm14, %v3152_v60  ;;  %4101 = vmatmul.msk.f32.gmra.mxu0 %vm374_vm14, %v3024_v19 }
0x1008   :  { %4104 = vmatmul.msk.f32.vlgmr.msra.gmra.mxu1 %vm416_vm15, %v3101_v5  ;;  %4114 = vmatmul.msk.f32.vlgmr.msrb.gmra.mxu2 %vm416_vm15, %v3229_v49 }
0x1009   :  { %v3154_v62 = vpop.permute.xlu0 %3153 }
0x100b   :  { %v3026_v56 = vpop.permute.xlu1 %3025 }
0x100c   :  { %4112 = vmatmul.msk.f32.gmra.mxu3 %vm374_vm14, %v3154_v62  ;;  %4102 = vmatmul.msk.f32.gmra.mxu0 %vm374_vm14, %v3026_v56 }
0x100d   :  { %v2447_v55 = vpop.f32.mrf.mxu2 }
0x100e   :  { %v2322_v32 = vpop.f32.mrf.mxu1  ;;  %2715 = vrot.lane.b32.xlu0 %v2447_v55, %s4591_s4 }
0x1015   :  { %v2450_v12 = vpop.f32.mrf.mxu2 }
0x1016   :  { %2717 = vrot.lane.b32.xlu0 %v2450_v12, %s4591_s4 }
0x1017   :  { %v6150_v11 = vpop.f32.mrf.mxu1 }
0x101e   :  { %v2453_v36 = vpop.f32.mrf.mxu2 }
0x101f   :  { %2719 = vrot.lane.b32.xlu1 %v2453_v36, %s4591_s4 }
0x1020   :  { %v2575_v50 = vpop.f32.mrf.mxu1 }
0x1021   :  { %2727 = vrot.lane.b32.xlu2 %v2575_v50, %s6505_s2 }
0x1026   :  { %v2703_v16 = vpop.f32.mrf.mxu2 }
0x1027   :  { %2739 = vrot.lane.b32.xlu1 %v2703_v16, %s6506_s23 }
0x102f   :  { %v2706_v3 = vpop.f32.mrf.mxu2 }
0x1030   :  { %2741 = vrot.lane.b32.xlu1 %v2706_v3, %s6506_s23 }
0x105a   :  { %v2578_v34 = vpop.f32.mrf.mxu1 }
0x105b   :  { %2729 = vrot.lane.b32.xlu2 %v2578_v34, %s6505_s2  ;;  %v6215_v34 = vld [vmem:[%s6454_s10 + $0x1] ss:$0 sm:$0xff] }
0x1062   :  { %v2581_v57 = vpop.f32.mrf.mxu1 }
0x1063   :  { %2731 = vrot.lane.b32.xlu2 %v2581_v57, %s6505_s2 }
0x106b   :  { %v2709_v43 = vpop.f32.mrf.mxu2 }
0x106c   :  { %2743 = vrot.lane.b32.xlu1 %v2709_v43, %s6506_s23 }
0x106d   :  { %v2884_v53 = vpop.f32.mrf.mxu1 }
0x1073   :  { %v3012_v13 = vpop.f32.mrf.mxu2 }
0x1074   :  { %3280 = vrot.lane.b32.xlu0 %v3012_v13, %s4591_s4 }
0x1075   :  { %v6166_v17 = vpop.f32.mrf.mxu1 }
0x107b   :  { %v6174_v21 = vpop.f32.mrf.mxu2  ;;  %v2728_v30 = vpop.permute.xlu2 %2727 }
0x107d   :  { %v6176_v7 = vpop.f32.mrf.mxu1 }
0x1080   :  { %v2716_v23 = vpop.permute.xlu0 %2715 }
0x1081   :  { %v2748_v33 = vsel %vm374_vm14, %v2319_v58, %v2716_v23  ;;  %v3065_v63 = vpop.f32.mrf.mxu0 }
0x1082   :  { %v2751_v38 = vsel %vm919_vm11, %v2748_v33, %v2728_v30  ;;  %v3074_v35 = vsel %vm416_vm15, %v3065_v63, -inf }
0x1083   :  { %v6178_v10 = vpop.f32.mrf.mxu2 }
0x1085   :  { %v3140_v2 = vpop.f32.mrf.mxu1 }
0x1086   :  { %3292 = vrot.lane.b32.xlu2 %v3140_v2, %s6505_s2 }
0x1087   :  { %v3193_v9 = vpop.f32.mrf.mxu3 }
0x1088   :  { %v2718_v59 = vpop.permute.xlu0 %2717  ;;  %v3202_v51 = vsel %vm416_vm15, %v3193_v9, -inf }
0x1089   :  { %v3068_v40 = vpop.f32.mrf.mxu0  ;;  %v2749_v39 = vsel %vm374_vm14, %v2322_v32, %v2718_v59 }
0x108a   :  { %v3077_v25 = vsel %vm423_vm3, %v3068_v40, -inf }
0x108b   :  { %v3268_v26 = vpop.f32.mrf.mxu2 }
0x108c   :  { %3304 = vrot.lane.b32.xlu0 %v3268_v26, %s6506_s23 }
0x108f   :  { %v3196_v45 = vpop.f32.mrf.mxu3 }
0x1090   :  { %v3205_v52 = vsel %vm423_vm3, %v3196_v45, -inf }
0x1091   :  { %v2720_v22 = vpop.permute.xlu1 %2719 }
0x1092   :  { %v2750_v19 = vsel %vm374_vm14, %v6150_v11, %v2720_v22 }
0x1096   :  { %3206 = vmax.xlane.f32.xlu1 %v3205_v52 }
0x1099   :  { %v2740_v8 = vpop.permute.xlu1 %2739 }
0x109a   :  { %v2754_v44 = vsel %vm6507_vm10, %v2751_v38, %v2740_v8  ;;  %vm6511_vm10 = vmmov %vm6509_vm4 }
0x109b   :  { %4122 = vmatmul.msk.f32.vlgmr.msrb.gmra.mxu0 %vm170_vm2, %v2754_v44 }
0x10a2   :  { %v2742_v20 = vpop.permute.xlu1 %2741 }
0x10af   :  { %3075 = vmax.xlane.f32.xlu2 %v3074_v35 }
0x10b5   :  { %v2730_v47 = vpop.permute.xlu2 %2729 }
0x10b6   :  { %v2752_v18 = vsel %vm919_vm11, %v2749_v39, %v2730_v47  ;;  %3203 = vmax.xlane.f32.xlu0 %v3202_v51 }
0x10b7   :  { %v2755_v31 = vsel %vm6508_vm12, %v2752_v18, %v2742_v20  ;;  %3078 = vmax.xlane.f32.xlu2 %v3077_v25 }
0x10b8   :  { %4123 = vmatmul.msk.f32.gmra.mxu0 %vm170_vm2, %v2755_v31 }
0x10bd   :  { %v2732_v4 = vpop.permute.xlu2 %2731 }
0x10be   :  { %v2753_v58 = vsel %vm919_vm11, %v2750_v19, %v2732_v4 }
0x10de   :  { %v2744_v28 = vpop.permute.xlu1 %2743 }
0x10df   :  { %v2756_v5 = vsel %vm6510_vm5, %v2753_v58, %v2744_v28 }
0x10e0   :  { %v3293_v61 = vpop.permute.xlu2 %3292 }
0x10e6   :  { %v3281_v29 = vpop.permute.xlu0 %3280 }
0x10e7   :  { %v3313_v37 = vsel %vm374_vm14, %v2884_v53, %v3281_v29 }
0x10e8   :  { %v3316_v60 = vsel %vm919_vm11, %v3313_v37, %v3293_v61 }
0x10fe   :  { %v3305_v42 = vpop.permute.xlu0 %3304 }
0x10ff   :  { %v6199_v6 = vsel %vm6509_vm4, %v3316_v60, %v3305_v42 }
0x1100   :  { %v3325_v49 = vrot.slane %v6199_v6, 7 }
0x1102   :  { %v3331_v62 = vsel %vm133_vm1, %v2756_v5, %v3325_v49 }
0x1103   :  { %4124 = vmatmul.msk.f32.gmra.mxu0 %vm170_vm2, %v3331_v62 }
0x1109   :  { %v3207_v56 = vpop.xlane.xlu1 %3206 }
0x110a   :  { %v3210_v32 = vsub.f32 %v3196_v45, %v3207_v56  ;;  %v4132_v56 = vld [vmem:[%s6457_s13 + $0x38] sm:$0xff] }
0x110b   :  { %3559 = vmatpush.msrb.mxu1 %v4132_v56 }
0x110c   :  { %v3215_v55 = vmul.f32 1.442695, %v3210_v32  ;;  %v4131_v32 = vld [vmem:[%s6457_s13 + $0x30] sm:$0xff] }
0x110d   :  { %3560 = vmatpush.msrb.mxu1 %v4131_v32  ;;  %v4146_v32 = vld [vmem:[%s6459_s15 + $0x78] sm:$0xff] }
0x110e   :  { %4504 = vpow2.f32 %v3215_v55  ;;  %v4130_v55 = vld [vmem:[%s6457_s13 + $0x28] sm:$0xff]  ;;  %3816 = vmatpush.msra.mxu3 %v4146_v32 }
0x110f   :  { %3561 = vmatpush.msrb.mxu1 %v4130_v55 }
0x1114   :  { %v6208_v12 = vpop.eup %4504 }
0x1115   :  { %v3223_v11 = vsel %vm423_vm3, %v6208_v12, 0.0 }
0x1116   :  { %3224 = vadd.xlane.f32.xlu2 %v3223_v11 }
0x1118   :  { %v3372_v53 = vpop.f32.mrf.mxu0 }
0x1119   :  { %v3373_v0 = vadd.f32 %v6215_v34, %v3372_v53 }
0x111b   :  { %v6220_v26 = vadd.f32 %v3373_v0, %v5584_v41 }
0x111d   :  { %v3396_v33 = vsel %vm170_vm2, %v6220_v26, 0.0 }
0x1122   :  { %v3076_v36 = vpop.xlane.xlu2 %3075 }
0x1123   :  { %v3081_v50 = vsub.f32 %v3065_v63, %v3076_v36 }
0x1125   :  { %v3085_v16 = vmul.f32 1.442695, %v3081_v50 }
0x1127   :  { %4506 = vpow2.f32 %v3085_v16 }
0x1129   :  { %v3204_v3 = vpop.xlane.xlu0 %3203 }
0x112a   :  { %v3209_v57 = vsub.f32 %v3193_v9, %v3204_v3  ;;  %v3079_v43 = vpop.xlane.xlu2 %3078 }
0x112b   :  { %v3082_v48 = vsub.f32 %v3068_v40, %v3079_v43 }
0x112c   :  { %v3213_v46 = vmul.f32 1.442695, %v3209_v57 }
0x112d   :  { %v4507_v13 = vpop.eup %4506  ;;  %v3087_v2 = vmul.f32 1.442695, %v3082_v48 }
0x112e   :  { %4508 = vpow2.f32 %v3213_v46  ;;  %v3092_v14 = vsel %vm416_vm15, %v4507_v13, 0.0 }
0x112f   :  { %3093 = vadd.xlane.f32.xlu1 %v3092_v14  ;;  %4510 = vpow2.f32 %v3087_v2 }
0x1134   :  { %v4509_v22 = vpop.eup %4508 }
0x1135   :  { %v3375_v23 = vpop.f32.mrf.mxu0  ;;  %v3220_v45 = vsel %vm416_vm15, %v4509_v22, 0.0  ;;  %v4511_v8 = vpop.eup %4510 }
0x1136   :  { %v3376_v9 = vadd.f32 %v6215_v34, %v3375_v23  ;;  %3221 = vadd.xlane.f32.xlu0 %v3220_v45  ;;  %v3095_v41 = vsel %vm423_vm3, %v4511_v8, 0.0 }
0x1137   :  { %3397 = vadd.xlane.f32.xlu1 %v3396_v33  ;;  %v6275_v33 = vld [vmem:[%s6455_s11 + $0x1] ss:$0 sm:$0xff] }
0x1138   :  { %v3388_v52 = vadd.f32 %v3376_v9, %v5605_v1 }
0x113a   :  { %v3399_v30 = vsel %vm170_vm2, %v3388_v52, 0.0 }
0x113b   :  { %3400 = vadd.xlane.f32.xlu2 %v3399_v30 }
0x113e   :  { %3096 = vadd.xlane.f32.xlu0 %v3095_v41 }
0x1180   :  { %v3378_v38 = vpop.f32.mrf.mxu0 }
0x1181   :  { %v3379_v44 = vadd.f32 %v6215_v34, %v3378_v38 }
0x1183   :  { %v6231_v63 = vadd.f32 %v3379_v44, %v5620_v15 }
0x1185   :  { %v3402_v35 = vsel %vm170_vm2, %v6231_v63, 0.0 }
0x1186   :  { %3403 = vadd.xlane.f32.xlu0 %v3402_v35 }
0x1189   :  { %v3225_v1 = vpop.xlane.xlu2 %3224 }
0x11a2   :  { %v3094_v59 = vpop.xlane.xlu1 %3093 }
0x11a3   :  { %4512 = vrcp.f32 %v3094_v59 }
0x11a9   :  { %v4513_v40 = vpop.eup %4512  ;;  %v3222_v39 = vpop.xlane.xlu0 %3221 }
0x11aa   :  { %4514 = vrcp.f32 %v3222_v39  ;;  %v3398_v47 = vpop.xlane.xlu1 %3397  ;;  %v3102_v20 = vmul.f32 %v4513_v40, %v4507_v13 }
0x11ab   :  { %v3411_v18 = vmul.f32 %v3398_v47, %v4782_v54  ;;  %4516 = vrcp.f32 %v3225_v1 }
0x11ac   :  { %4105 = vmatmul.msk.f32.gmra.mxu1 %vm416_vm15, %v3102_v20 }
0x11ad   :  { %v6238_v51 = vsub.f32 %v6220_v26, %v3411_v18 }
0x11ae   :  { %v3401_v15 = vpop.xlane.xlu2 %3400 }
0x11af   :  { %v3412_v31 = vmul.f32 %v3401_v15, %v4782_v54  ;;  %v3421_v25 = vmul.f32 %v6238_v51, %v6238_v51 }
0x11b0   :  { %v4515_v4 = vpop.eup %4514 }
0x11b1   :  { %v6243_v29 = vsub.f32 %v3388_v52, %v3412_v31  ;;  %v3097_v37 = vpop.xlane.xlu0 %3096  ;;  %v3426_v61 = vsel %vm170_vm2, %v3421_v25, 0.0  ;;  %v3230_v28 = vmul.f32 %v4515_v4, %v4509_v22  ;;  %v4517_v19 = vpop.eup %4516 }
0x11b2   :  { %4518 = vrcp.f32 %v3097_v37  ;;  %3427 = vadd.xlane.f32.xlu1 %v3426_v61  ;;  %v3231_v62 = vmul.f32 %v4517_v19, %v6208_v12  ;;  %v4129_v12 = vld [vmem:[%s6457_s13 + $0x20] sm:$0xff] }
0x11b3   :  { %v3422_v42 = vmul.f32 %v6243_v29, %v6243_v29  ;;  %4115 = vmatmul.msk.f32.gmra.mxu2 %vm416_vm15, %v3230_v28  ;;  %3562 = vmatpush.msrb.mxu1 %v4129_v12  ;;  %v4145_v12 = vld [vmem:[%s6459_s15 + $0x70] sm:$0xff] }
0x11b4   :  { %3817 = vmatpush.msra.mxu3 %v4145_v12 }
0x11b5   :  { %v3429_v60 = vsel %vm170_vm2, %v3422_v42, 0.0 }
0x11b6   :  { %3430 = vadd.xlane.f32.xlu2 %v3429_v60 }
0x11b8   :  { %v4519_v58 = vpop.eup %4518 }
0x11b9   :  { %v3103_v5 = vmul.f32 %v4519_v58, %v4511_v8  ;;  %v6280_v8 = vld [vmem:[%s6456_s12 + $0x1] ss:$0 sm:$0xff] }
0x11bb   :  { %4106 = vmatmul.msk.f32.gmra.mxu1 %vm416_vm15, %v3103_v5  ;;  %4116 = vmatmul.msk.f32.gmra.mxu2 %vm416_vm15, %v3231_v62 }
0x11cb   :  { %3282 = vrot.lane.b32.xlu1 %v6174_v21, %s4591_s4 }
0x11f9   :  { %v3404_v20 = vpop.xlane.xlu0 %3403 }
0x11fa   :  { %v3413_v18 = vmul.f32 %v3404_v20, %v4782_v54 }
0x1225   :  { %v3428_v21 = vpop.xlane.xlu1 %3427 }
0x1226   :  { %v3441_v11 = vmul.f32 %v3428_v21, %v4782_v54 }
0x1228   :  { %v3446_v36 = vadd.f32 1e-05, %v3441_v11  ;;  %v4144_v11 = vld [vmem:[%s6459_s15 + $0x68] sm:$0xff] }
0x1229   :  { %v3431_v50 = vpop.xlane.xlu2 %3430  ;;  %v3143_v3 = vpop.f32.mrf.mxu1  ;;  %3818 = vmatpush.msra.mxu3 %v4144_v11 }
0x122a   :  { %v3442_v16 = vmul.f32 %v3431_v50, %v4782_v54  ;;  %4520 = vrsqrt.f32 %v3446_v36  ;;  %3294 = vrot.lane.b32.xlu2 %v3143_v3, %s6505_s2  ;;  %vm3457_vm3 = vweird.f32 %v3446_v36 }
0x122c   :  { %v3447_v57 = vadd.f32 1e-05, %v3442_v16  ;;  %v4143_v16 = vld [vmem:[%s6459_s15 + $0x60] sm:$0xff] }
0x122d   :  { %3819 = vmatpush.msra.mxu3 %v4143_v16 }
0x122e   :  { %4522 = vrsqrt.f32 %v3447_v57  ;;  %vm3467_vm8 = vweird.f32 %v3447_v57 }
0x1230   :  { %v4521_v43 = vpop.eup %4520 }
0x1231   :  { %v3452_v53 = vmul.f32 %v4521_v43, %v3446_v36  ;;  %vm3458_vm15 = vweird.f32 %v4521_v43 }
0x1232   :  { %vm3459_vm6 = vmor %vm3457_vm3, %vm3458_vm15 }
0x1233   :  { %v3453_v48 = vmul.f32 %v4521_v43, %v3452_v53 }
0x1234   :  { %v4523_v46 = vpop.eup %4522 }
0x1235   :  { %v3462_v13 = vmul.f32 %v4523_v46, %v3447_v57  ;;  %v3454_v0 = vmul.f32 0.5, %v3453_v48  ;;  %vm3468_vm7 = vweird.f32 %v4523_v46 }
0x1236   :  { %v3271_v2 = vpop.f32.mrf.mxu2  ;;  %vm3469_vm9 = vmor %vm3467_vm8, %vm3468_vm7 }
0x1237   :  { %v3463_v14 = vmul.f32 %v4523_v46, %v3462_v13  ;;  %v3455_v22 = vsub.f32 1.5, %v3454_v0  ;;  %3306 = vrot.lane.b32.xlu0 %v3271_v2, %s6506_s23  ;;  %v4141_v13 = vld [vmem:[%s6459_s15 + $0x50] sm:$0xff] }
0x1238   :  { %v3146_v9 = vpop.f32.mrf.mxu1 }
0x1239   :  { %v3464_v23 = vmul.f32 0.5, %v3463_v14  ;;  %v3456_v45 = vmul.f32 %v4521_v43, %v3455_v22  ;;  %3296 = vrot.lane.b32.xlu1 %v3146_v9, %s6505_s2  ;;  %v4140_v22 = vld [vmem:[%s6459_s15 + $0x48] sm:$0xff] }
0x123b   :  { %v3465_v52 = vsub.f32 1.5, %v3464_v23  ;;  %v3460_v30 = vsel %vm3459_vm6, %v4521_v43, %v3456_v45  ;;  %v4142_v43 = vld [vmem:[%s6459_s15 + $0x58] sm:$0xff] }
0x123c   :  { %v3501_v41 = vmul.f32 %v3460_v30, %v6238_v51  ;;  %v6293_v51 = vsub.f32 %v6231_v63, %v3413_v18  ;;  %3820 = vmatpush.msra.mxu3 %v4142_v43 }
0x123d   :  { %v3466_v38 = vmul.f32 %v4523_v46, %v3465_v52  ;;  %v3283_v25 = vpop.permute.xlu1 %3282  ;;  %v4139_v52 = vld [vmem:[%s6459_s15 + $0x40] sm:$0xff] }
0x123e   :  { %v3509_v44 = vmul.f32 %v6275_v33, %v3501_v41  ;;  %v3274_v59 = vpop.f32.mrf.mxu2  ;;  %v3423_v15 = vmul.f32 %v6293_v51, %v6293_v51  ;;  %3821 = vmatpush.msra.mxu3 %v4141_v13 }
0x123f   :  { %v3470_v35 = vsel %vm3469_vm9, %v4523_v46, %v3466_v38  ;;  %3308 = vrot.lane.b32.xlu2 %v3274_v59, %s6506_s23 }
0x1240   :  { %v3517_v1 = vadd.f32 %v6280_v8, %v3509_v44  ;;  %v3502_v40 = vmul.f32 %v3470_v35, %v6243_v29  ;;  %v3432_v31 = vsel %vm170_vm2, %v3423_v15, 0.0  ;;  %v3314_v29 = vsel %vm374_vm14, %v6166_v17, %v3283_v25  ;;  %v6316_v17 = vld [vmem:[%s6458_s14 + $0x1] ss:$0 sm:$0xff]  ;;  %3822 = vmatpush.msra.mxu3 %v4140_v22 }
0x1242   :  { %4134 = vmatmul.msk.f32.vlgmr.msrb.gmra.mxu1 %vm170_vm2, %v3517_v1  ;;  %v3510_v39 = vmul.f32 %v6275_v33, %v3502_v40  ;;  %3823 = vmatpush.msra.mxu3 %v4139_v52 }
0x1244   :  { %v3518_v47 = vadd.f32 %v6280_v8, %v3510_v39 }
0x124a   :  { %4135 = vmatmul.msk.f32.gmra.mxu1 %vm170_vm2, %v3518_v47 }
0x1261   :  { %3433 = vadd.xlane.f32.xlu0 %v3432_v31 }
0x1275   :  { %3284 = vrot.lane.b32.xlu0 %v6178_v10, %s4591_s4 }
0x1284   :  { %v3295_v4 = vpop.permute.xlu2 %3294 }
0x1285   :  { %v3317_v37 = vsel %vm919_vm11, %v3314_v29, %v3295_v4 }
0x12a9   :  { %v3307_v61 = vpop.permute.xlu0 %3306 }
0x12aa   :  { %v6304_v28 = vsel %vm6511_vm10, %v3317_v37, %v3307_v61 }
0x12ab   :  { %v3326_v42 = vrot.slane %v6304_v28, 7 }
0x12ad   :  { %v3327_v60 = vsel %vm133_vm1, %v3325_v49, %v3326_v42 }
0x12ae   :  { %4125 = vmatmul.msk.f32.gmra.mxu0 %vm170_vm2, %v3327_v60 }
0x12bf   :  { %v3564_v10 = vpop.f32.mrf.mxu1 }
0x12c0   :  { %v6319_v19 = vadd.f32 %v6316_v17, %v3564_v10 }
0x12c2   :  { %v6322_v58 = vmul.f32 0.70710677, %v6319_v19  ;;  %v3579_v28 = vmul.f32 0.5, %v6319_v19 }
0x12c4   :  { %v3589_v5 = vand.u32 2147483647, %v6322_v58 }
0x12c6   :  { %v3594_v62 = vmul.f32 0.3275911, %v3589_v5  ;;  %v3724_v44 = vsub.f32 0.0, %v3589_v5 }
0x12c7   :  { %v3567_v6 = vpop.f32.mrf.mxu1 }
0x12c8   :  { %v3599_v56 = vadd.f32 1.0, %v3594_v62  ;;  %v6326_v49 = vadd.f32 %v6316_v17, %v3567_v6  ;;  %v3729_v47 = vmul.f32 %v3724_v44, %v3589_v5 }
0x12ca   :  { %4524 = vrcp.f32 %v3599_v56  ;;  %v6332_v55 = vmul.f32 0.70710677, %v6326_v49  ;;  %v3615_v46 = vand.u32 2147483648, %v3599_v56  ;;  %v3613_v14 = vand.u32 2147483647, %v3599_v56 }
0x12cb   :  { %vm3609_vm4 = vweird.f32 %v3599_v56  ;;  %v3734_v61 = vmul.f32 1.442695, %v3729_v47 }
0x12cc   :  { %v6338_v21 = vand.u32 2147483647, %v6332_v55  ;;  %v3616_v45 = vor.u32 1.1754944e-38, %v3615_v46  ;;  %vm3614_vm15 = vcmp.eq.f32.partialorder %v3613_v14, 8.507059e+37 }
0x12ce   :  { %v3595_v36 = vmul.f32 0.3275911, %v6338_v21 }
0x12d0   :  { %v4525_v50 = vpop.eup %4524  ;;  %v3600_v57 = vadd.f32 1.0, %v3595_v36 }
0x12d1   :  { %v3605_v3 = vmul.f32 %v4525_v50, %v3599_v56  ;;  %vm3610_vm12 = vweird.f32 %v4525_v50  ;;  %v3725_v56 = vsub.f32 0.0, %v6338_v21 }
0x12d2   :  { %4526 = vrcp.f32 %v3600_v57  ;;  %vm3611_vm5 = vmor %vm3609_vm4, %vm3610_vm12  ;;  %v3630_v39 = vand.u32 2147483648, %v3600_v57  ;;  %v3628_v18 = vand.u32 2147483647, %v3600_v57  ;;  %vm3624_vm6 = vweird.f32 %v3600_v57 }
0x12d3   :  { %v3606_v53 = vsub.f32 1.0, %v3605_v3  ;;  %v3730_v16 = vmul.f32 %v3725_v56, %v6338_v21  ;;  %vm6512_vm4 = vcmask 195584  }
0x12d4   :  { %v3434_v48 = vpop.xlane.xlu0 %3433  ;;  %v3631_v37 = vor.u32 1.1754944e-38, %v3630_v39  ;;  %vm3629_vm8 = vcmp.eq.f32.partialorder %v3628_v18, 8.507059e+37 }
0x12d5   :  { %v3607_v0 = vmul.f32 %v4525_v50, %v3606_v53  ;;  %v3443_v2 = vmul.f32 %v3434_v48, %v4782_v54  ;;  %v3309_v48 = vpop.permute.xlu2 %3308 }
0x12d7   :  { %v3608_v23 = vadd.f32 %v4525_v50, %v3607_v0  ;;  %v3448_v9 = vadd.f32 1e-05, %v3443_v2 }
0x12d8   :  { %v4527_v30 = vpop.eup %4526 }
0x12d9   :  { %v3612_v41 = vsel %vm3611_vm5, %v4525_v50, %v3608_v23  ;;  %4528 = vrsqrt.f32 %v3448_v9  ;;  %v3620_v35 = vmul.f32 %v4527_v30, %v3600_v57  ;;  %vm3625_vm3 = vweird.f32 %v4527_v30  ;;  %v3297_v57 = vpop.permute.xlu1 %3296 }
0x12da   :  { %v3617_v38 = vsel %vm3614_vm15, %v3616_v45, %v3612_v41  ;;  %vm3626_vm7 = vmor %vm3624_vm6, %vm3625_vm3  ;;  %4530 = vpow2.f32 %v3734_v61  ;;  %vm3477_vm10 = vweird.f32 %v3448_v9  ;;  %v3736_v45 = vmul.f32 1.442695, %v3730_v16 }
0x12db   :  { %v3679_v59 = vmul.f32 1.0614054, %v3617_v38  ;;  %v3621_v1 = vsub.f32 1.0, %v3620_v35 }
0x12dc   :  { %4532 = vpow2.f32 %v3736_v45 }
0x12dd   :  { %v3684_v40 = vadd.f32 -1.4531521, %v3679_v59  ;;  %v3622_v20 = vmul.f32 %v4527_v30, %v3621_v1 }
0x12df   :  { %v4529_v15 = vpop.eup %4528  ;;  %v3689_v31 = vmul.f32 %v3684_v40, %v3617_v38  ;;  %v3623_v25 = vadd.f32 %v4527_v30, %v3622_v20 }
0x12e0   :  { %v3472_v4 = vmul.f32 %v4529_v15, %v3448_v9  ;;  %vm3478_vm9 = vweird.f32 %v4529_v15 }
0x12e1   :  { %v3694_v29 = vadd.f32 1.4214138, %v3689_v31  ;;  %v3627_v60 = vsel %vm3626_vm7, %v4527_v30, %v3623_v25  ;;  %vm3479_vm12 = vmor %vm3477_vm10, %vm3478_vm9  ;;  %v4531_v30 = vpop.eup %4530 }
0x12e2   :  { %v3473_v10 = vmul.f32 %v4529_v15, %v3472_v4  ;;  %v3632_v6 = vsel %vm3629_vm8, %v3631_v37, %v3627_v60  ;;  %v4533_v20 = vpop.eup %4532 }
0x12e3   :  { %v3699_v62 = vmul.f32 %v3694_v29, %v3617_v38  ;;  %v3680_v5 = vmul.f32 1.0614054, %v3632_v6  ;;  %v3580_v29 = vmul.f32 0.5, %v6326_v49 }
0x12e4   :  { %v3474_v32 = vmul.f32 0.5, %v3473_v10 }
0x12e5   :  { %v3704_v12 = vadd.f32 -0.28449672, %v3699_v62  ;;  %v3685_v11 = vadd.f32 -1.4531521, %v3680_v5 }
0x12e6   :  { %v3475_v36 = vsub.f32 1.5, %v3474_v32 }
0x12e7   :  { %v3709_v50 = vmul.f32 %v3704_v12, %v3617_v38  ;;  %v3285_v3 = vpop.permute.xlu0 %3284  ;;  %v3690_v43 = vmul.f32 %v3685_v11, %v3632_v6 }
0x12e8   :  { %v3476_v53 = vmul.f32 %v4529_v15, %v3475_v36  ;;  %v3315_v46 = vsel %vm374_vm14, %v6176_v7, %v3285_v3  ;;  %vm3754_vm14 = vcmp.ge.f32.partialorder %v6322_v58, 0.0 }
0x12e9   :  { %v3714_v13 = vadd.f32 0.2548296, %v3709_v50  ;;  %v3318_v0 = vsel %vm919_vm11, %v3315_v46, %v3297_v57  ;;  %v3695_v14 = vadd.f32 1.4214138, %v3690_v43  ;;  %vm3755_vm11 = vcmp.ge.f32.partialorder %v6332_v55, 0.0 }
0x12ea   :  { %v3480_v2 = vsel %vm3479_vm12, %v4529_v15, %v3476_v53  ;;  %v3321_v22 = vsel %vm6512_vm4, %v3318_v0, %v3309_v48 }
0x12eb   :  { %v3719_v23 = vmul.f32 %v3714_v13, %v3617_v38  ;;  %v3503_v21 = vmul.f32 %v3480_v2, %v6293_v51  ;;  %v3328_v52 = vrot.slane %v3321_v22, 7  ;;  %v3700_v41 = vmul.f32 %v3695_v14, %v3632_v6 }
0x12ed   :  { %v3744_v9 = vmul.f32 %v4531_v30, %v3719_v23  ;;  %v3329_v7 = vsel %vm133_vm1, %v3326_v42, %v3328_v52  ;;  %v3511_v44 = vmul.f32 %v6275_v33, %v3503_v21  ;;  %v3705_v35 = vadd.f32 -0.28449672, %v3700_v41 }
0x12ee   :  { %4126 = vmatmul.msk.f32.gmra.mxu0 %vm170_vm2, %v3329_v7 }
0x12ef   :  { %v3749_v59 = vsub.f32 1.0, %v3744_v9  ;;  %v3519_v38 = vadd.f32 %v6280_v8, %v3511_v44  ;;  %v3710_v1 = vmul.f32 %v3705_v35, %v3632_v6 }
0x12f1   :  { %v3759_v40 = vsub.f32 0.0, %v3749_v59  ;;  %4136 = vmatmul.msk.f32.gmra.mxu1 %vm170_vm2, %v3519_v38  ;;  %v3715_v51 = vadd.f32 0.2548296, %v3710_v1 }
0x12f3   :  { %v3764_v39 = vsel %vm3754_vm14, %v3749_v59, %v3759_v40  ;;  %v3720_v47 = vmul.f32 %v3715_v51, %v3632_v6 }
0x12f4   :  { %v3769_v42 = vadd.f32 1.0, %v3764_v39 }
0x12f5   :  { %v3745_v15 = vmul.f32 %v4533_v20, %v3720_v47 }
0x12f6   :  { %v3774_v18 = vmul.f32 %v3769_v42, %v3579_v28 }
0x12f7   :  { %v3750_v31 = vsub.f32 1.0, %v3745_v15 }
0x12f8   :  { %4148 = vmatmul.msk.f32.vlgmr.msra.gmra.mxu3 %vm85_vm0, %v3774_v18 }
0x12f9   :  { %v3760_v25 = vsub.f32 0.0, %v3750_v31 }
0x12fb   :  { %v3765_v4 = vsel %vm3755_vm11, %v3750_v31, %v3760_v25 }
0x12fc   :  { %v3770_v37 = vadd.f32 1.0, %v3765_v4 }
0x12fe   :  { %v3775_v58 = vmul.f32 %v3770_v37, %v3580_v29 }
0x1300   :  { %4149 = vmatmul.msk.f32.gmra.mxu3 %vm85_vm0, %v3775_v58 }
0x132b   :  { %v3381_v61 = vpop.f32.mrf.mxu0 }
0x132c   :  { %v3382_v19 = vadd.f32 %v6215_v34, %v3381_v61 }
0x132e   :  { %v3390_v60 = vadd.f32 %v3382_v19, %v5633_v24  ;;  %v4272_v19 = vld [vmem:[%s6460_s16 + $0x1] ss:$0 sm:$0xff] }
0x1330   :  { %v3405_v10 = vsel %vm170_vm2, %v3390_v60, 0.0 }
0x1331   :  { %3406 = vadd.xlane.f32.xlu0 %v3405_v10 }
0x136b   :  { %v3384_v62 = vpop.f32.mrf.mxu0 }
0x136c   :  { %v3385_v6 = vadd.f32 %v6215_v34, %v3384_v62 }
0x136e   :  { %v3391_v55 = vadd.f32 %v3385_v6, %v5639_v27  ;;  %v3570_v56 = vpop.f32.mrf.mxu1 }
0x136f   :  { %v3571_v49 = vadd.f32 %v6316_v17, %v3570_v56 }
0x1370   :  { %v3408_v5 = vsel %vm183_vm13, %v3391_v55, 0.0 }
0x1371   :  { %v3586_v32 = vmul.f32 0.70710677, %v3571_v49  ;;  %3409 = vadd.xlane.f32.xlu1 %v3408_v5  ;;  %v3581_v40 = vmul.f32 0.5, %v3571_v49 }
0x1373   :  { %v3591_v12 = vand.u32 2147483647, %v3586_v32  ;;  %vm3756_vm7 = vcmp.ge.f32.partialorder %v3586_v32, 0.0 }
0x1375   :  { %v3596_v11 = vmul.f32 0.3275911, %v3591_v12  ;;  %v3726_v0 = vsub.f32 0.0, %v3591_v12 }
0x1377   :  { %v3601_v36 = vadd.f32 1.0, %v3596_v11  ;;  %v3731_v22 = vmul.f32 %v3726_v0, %v3591_v12 }
0x1379   :  { %4534 = vrcp.f32 %v3601_v36  ;;  %v3645_v57 = vand.u32 2147483648, %v3601_v36  ;;  %v3643_v34 = vand.u32 2147483647, %v3601_v36  ;;  %vm3639_vm15 = vweird.f32 %v3601_v36 }
0x137a   :  { %v3738_v21 = vmul.f32 1.442695, %v3731_v22 }
0x137b   :  { %v3825_v24 = vpop.f32.mrf.mxu3  ;;  %v3646_v46 = vor.u32 1.1754944e-38, %v3645_v57  ;;  %vm3644_vm6 = vcmp.eq.f32.partialorder %v3643_v34, 8.507059e+37 }
0x137c   :  { %4536 = vpow2.f32 %v3738_v21 }
0x137f   :  { %v4535_v50 = vpop.eup %4534 }
0x1380   :  { %v3635_v16 = vmul.f32 %v4535_v50, %v3601_v36  ;;  %vm3640_vm5 = vweird.f32 %v4535_v50 }
0x1381   :  { %vm3641_vm3 = vmor %vm3639_vm15, %vm3640_vm5 }
0x1382   :  { %v3636_v3 = vsub.f32 1.0, %v3635_v16  ;;  %v4537_v44 = vpop.eup %4536 }
0x1383   :  { %v3828_v27 = vpop.f32.mrf.mxu3 }
0x1384   :  { %v3637_v43 = vmul.f32 %v4535_v50, %v3636_v3 }
0x1386   :  { %v3638_v53 = vadd.f32 %v4535_v50, %v3637_v43 }
0x1388   :  { %v3642_v48 = vsel %vm3641_vm3, %v4535_v50, %v3638_v53 }
0x1389   :  { %v3647_v13 = vsel %vm3644_vm6, %v3646_v46, %v3642_v48 }
0x138a   :  { %v3681_v14 = vmul.f32 1.0614054, %v3647_v13 }
0x138c   :  { %v3686_v2 = vadd.f32 -1.4531521, %v3681_v14 }
0x138e   :  { %v3691_v23 = vmul.f32 %v3686_v2, %v3647_v13 }
0x1390   :  { %v3696_v45 = vadd.f32 1.4214138, %v3691_v23 }
0x1392   :  { %v3701_v52 = vmul.f32 %v3696_v45, %v3647_v13 }
0x1394   :  { %v3706_v30 = vadd.f32 -0.28449672, %v3701_v52 }
0x1396   :  { %v3711_v41 = vmul.f32 %v3706_v30, %v3647_v13 }
0x1398   :  { %v3716_v9 = vadd.f32 0.2548296, %v3711_v41 }
0x139a   :  { %v3721_v7 = vmul.f32 %v3716_v9, %v3647_v13 }
0x139c   :  { %v3746_v35 = vmul.f32 %v4537_v44, %v3721_v7 }
0x139e   :  { %v3751_v59 = vsub.f32 1.0, %v3746_v35 }
0x13a0   :  { %v3761_v38 = vsub.f32 0.0, %v3751_v59 }
0x13a2   :  { %v3766_v1 = vsel %vm3756_vm7, %v3751_v59, %v3761_v38 }
0x13a3   :  { %v3771_v51 = vadd.f32 1.0, %v3766_v1 }
0x13a4   :  { %v3407_v39 = vpop.xlane.xlu0 %3406 }
0x13a5   :  { %v3776_v28 = vmul.f32 %v3771_v51, %v3581_v40  ;;  %v3414_v42 = vmul.f32 %v3407_v39, %v4782_v54 }
0x13a7   :  { %v3419_v47 = vsub.f32 %v3390_v60, %v3414_v42  ;;  %4150 = vmatmul.msk.f32.gmra.mxu3 %vm85_vm0, %v3776_v28  ;;  %v3826_v60 = vadd.f32 %v4272_v19, %v3825_v24 }
0x13a9   :  { %v3424_v20 = vmul.f32 %v3419_v47, %v3419_v47 }
0x13ab   :  { %v3435_v18 = vsel %vm170_vm2, %v3424_v20, 0.0 }
0x13ac   :  { %3436 = vadd.xlane.f32.xlu2 %v3435_v18 }
0x13e4   :  { %v3410_v15 = vpop.xlane.xlu1 %3409 }
0x13e5   :  { %v3415_v31 = vmul.f32 %v3410_v15, %v4782_v54 }
0x13e7   :  { %v3420_v25 = vsub.f32 %v3391_v55, %v3415_v31  ;;  %v3837_v55 = vadd.f32 %v3826_v60, %v6220_v26 }
0x13e9   :  { %v3425_v4 = vmul.f32 %v3420_v25, %v3420_v25 }
0x13eb   :  { %v3438_v29 = vsel %vm183_vm13, %v3425_v4, 0.0 }
0x13ec   :  { %3439 = vadd.xlane.f32.xlu0 %v3438_v29 }
0x141f   :  { %v3437_v37 = vpop.xlane.xlu2 %3436 }
0x1420   :  { %v3444_v58 = vmul.f32 %v3437_v37, %v4782_v54 }
0x1422   :  { %v3449_v61 = vadd.f32 1e-05, %v3444_v58 }
0x1424   :  { %4538 = vrsqrt.f32 %v3449_v61  ;;  %vm3487_vm9 = vweird.f32 %v3449_v61 }
0x142a   :  { %v4539_v10 = vpop.eup %4538  ;;  %v3830_v62 = vpop.f32.mrf.mxu3 }
0x142b   :  { %v3482_v6 = vmul.f32 %v4539_v10, %v3449_v61  ;;  %v3831_v56 = vadd.f32 %v4272_v19, %v3830_v62  ;;  %vm3488_vm8 = vweird.f32 %v4539_v10 }
0x142c   :  { %vm3489_vm10 = vmor %vm3487_vm9, %vm3488_vm8 }
0x142d   :  { %v3483_v49 = vmul.f32 %v4539_v10, %v3482_v6  ;;  %v3838_v5 = vadd.f32 %v3831_v56, %v6231_v63 }
0x142f   :  { %v3484_v32 = vmul.f32 0.5, %v3483_v49  ;;  %v3839_v12 = vsel %vm133_vm1, %v3837_v55, %v3838_v5 }
0x1430   :  { %v3842_v11 = vsel %vm183_vm13, %v3839_v12, 0.0 }
0x1431   :  { %v3485_v36 = vsub.f32 1.5, %v3484_v32  ;;  %3843 = vadd.xlane.f32.xlu2 %v3842_v11 }
0x1433   :  { %v3486_v50 = vmul.f32 %v4539_v10, %v3485_v36 }
0x1435   :  { %v3490_v24 = vsel %vm3489_vm10, %v4539_v10, %v3486_v50 }
0x1436   :  { %v3504_v16 = vmul.f32 %v3490_v24, %v3419_v47 }
0x1438   :  { %v3512_v3 = vmul.f32 %v6275_v33, %v3504_v16 }
0x143a   :  { %v3520_v26 = vadd.f32 %v6280_v8, %v3512_v3 }
0x143c   :  { %4137 = vmatmul.msk.f32.gmra.mxu1 %vm170_vm2, %v3520_v26 }
0x145f   :  { %v3440_v63 = vpop.xlane.xlu0 %3439 }
0x1460   :  { %v3445_v57 = vmul.f32 %v3440_v63, %v4782_v54 }
0x1462   :  { %v3450_v43 = vadd.f32 1e-05, %v3445_v57 }
0x1464   :  { %4540 = vrsqrt.f32 %v3450_v43  ;;  %vm3497_vm12 = vweird.f32 %v3450_v43 }
0x146a   :  { %v4541_v34 = vpop.eup %4540 }
0x146b   :  { %v3492_v27 = vmul.f32 %v4541_v34, %v3450_v43  ;;  %vm3498_vm1 = vweird.f32 %v4541_v34 }
0x146c   :  { %vm3499_vm4 = vmor %vm3497_vm12, %vm3498_vm1 }
0x146d   :  { %v3493_v53 = vmul.f32 %v4541_v34, %v3492_v27 }
0x146f   :  { %v3494_v46 = vmul.f32 0.5, %v3493_v53 }
0x1471   :  { %v3495_v48 = vsub.f32 1.5, %v3494_v46 }
0x1473   :  { %v3496_v13 = vmul.f32 %v4541_v34, %v3495_v48 }
0x1475   :  { %v3500_v0 = vsel %vm3499_vm4, %v4541_v34, %v3496_v13 }
0x1476   :  { %v3505_v14 = vmul.f32 %v3500_v0, %v3420_v25  ;;  %v3875_v0 = vld [vmem:[%s6463_s19 + $0x18] sm:$0xff] }
0x1477   :  { %3895 = vmatpush.msra.mxu2 %v3875_v0 }
0x1478   :  { %v3513_v2 = vmul.f32 %v6275_v33, %v3505_v14 }
0x147a   :  { %v3521_v22 = vadd.f32 %v6280_v8, %v3513_v2 }
0x147c   :  { %4138 = vmatmul.msk.f32.gmra.mxu1 %vm170_vm2, %v3521_v22  ;;  %v3874_v22 = vld [vmem:[%s6463_s19 + $0x10] sm:$0xff] }
0x147d   :  { %3896 = vmatpush.msra.mxu2 %v3874_v22 }
0x14a4   :  { %v3844_v23 = vpop.xlane.xlu2 %3843 }
0x14a5   :  { %v3845_v45 = vmul.f32 %v3844_v23, %v4782_v54 }
0x14a7   :  { %v6408_v21 = vsub.f32 %v3839_v12, %v3845_v45  ;;  %v3873_v45 = vld [vmem:[%s6463_s19 + $0x8] sm:$0xff] }
0x14a8   :  { %3897 = vmatpush.msra.mxu2 %v3873_v45 }
0x14a9   :  { %v3847_v52 = vmul.f32 %v6408_v21, %v6408_v21 }
0x14ab   :  { %v3848_v30 = vsel %vm183_vm13, %v3847_v52, 0.0  ;;  %v3872_v52 = vld [vmem:[%s6463_s19] sm:$0xff] }
0x14ac   :  { %3849 = vadd.xlane.f32.xlu1 %v3848_v30  ;;  %3898 = vmatpush.msra.mxu2 %v3872_v52 }
0x14b9   :  { %v3573_v41 = vpop.f32.mrf.mxu1 }
0x14ba   :  { %v3574_v9 = vadd.f32 %v6316_v17, %v3573_v41 }
0x14bc   :  { %v3587_v7 = vmul.f32 0.70710677, %v3574_v9  ;;  %v3582_v49 = vmul.f32 0.5, %v3574_v9 }
0x14be   :  { %v3592_v33 = vand.u32 2147483647, %v3587_v7  ;;  %vm3757_vm15 = vcmp.ge.f32.partialorder %v3587_v7, 0.0 }
0x14c0   :  { %v3597_v44 = vmul.f32 0.3275911, %v3592_v33  ;;  %v3727_v20 = vsub.f32 0.0, %v3592_v33 }
0x14c2   :  { %v3602_v8 = vadd.f32 1.0, %v3597_v44  ;;  %v3732_v31 = vmul.f32 %v3727_v20, %v3592_v33 }
0x14c4   :  { %4542 = vrcp.f32 %v3602_v8  ;;  %v3660_v1 = vand.u32 2147483648, %v3602_v8  ;;  %v3658_v51 = vand.u32 2147483647, %v3602_v8  ;;  %vm3654_vm11 = vweird.f32 %v3602_v8 }
0x14c5   :  { %v3740_v29 = vmul.f32 1.442695, %v3732_v31 }
0x14c6   :  { %v3661_v28 = vor.u32 1.1754944e-38, %v3660_v1  ;;  %vm3659_vm13 = vcmp.eq.f32.partialorder %v3658_v51, 8.507059e+37 }
0x14c7   :  { %4544 = vpow2.f32 %v3740_v29  ;;  %v4273_v29 = vld [vmem:[%s6461_s17] ss:$0 sm:$0xff]  ;;  %s3910_s17 = sshll.u32 %s4593_s7, 4  ;;  %s3911_s17 = int_to_ptr.vmem [resolvable:$true] %s3910_s17 }
0x14ca   :  { %v4543_v35 = vpop.eup %4542 }
0x14cb   :  { %v3650_v59 = vmul.f32 %v4543_v35, %v3602_v8  ;;  %vm3655_vm14 = vweird.f32 %v4543_v35 }
0x14cc   :  { %vm3656_vm5 = vmor %vm3654_vm11, %vm3655_vm14 }
0x14cd   :  { %v3651_v38 = vsub.f32 1.0, %v3650_v59  ;;  %v4545_v10 = vpop.eup %4544 }
0x14cf   :  { %v3652_v40 = vmul.f32 %v4543_v35, %v3651_v38 }
0x14d1   :  { %v3653_v39 = vadd.f32 %v4543_v35, %v3652_v40 }
0x14d3   :  { %v3657_v42 = vsel %vm3656_vm5, %v4543_v35, %v3653_v39 }
0x14d4   :  { %v3662_v47 = vsel %vm3659_vm13, %v3661_v28, %v3657_v42 }
0x14d5   :  { %v3682_v18 = vmul.f32 1.0614054, %v3662_v47 }
0x14d7   :  { %v3687_v15 = vadd.f32 -1.4531521, %v3682_v18 }
0x14d9   :  { %v3692_v25 = vmul.f32 %v3687_v15, %v3662_v47 }
0x14db   :  { %v3697_v4 = vadd.f32 1.4214138, %v3692_v25 }
0x14dd   :  { %v3702_v37 = vmul.f32 %v3697_v4, %v3662_v47 }
0x14df   :  { %v3707_v58 = vadd.f32 -0.28449672, %v3702_v37 }
0x14e1   :  { %v3712_v61 = vmul.f32 %v3707_v58, %v3662_v47  ;;  %v4274_v58 = vld [vmem:[%s6462_s18] ss:$0 sm:$0xff] }
0x14e3   :  { %v3717_v19 = vadd.f32 0.2548296, %v3712_v61 }
0x14e5   :  { %v3722_v60 = vmul.f32 %v3717_v19, %v3662_v47 }
0x14e7   :  { %v3747_v62 = vmul.f32 %v4545_v10, %v3722_v60 }
0x14e9   :  { %v3752_v6 = vsub.f32 1.0, %v3747_v62 }
0x14eb   :  { %v3762_v56 = vsub.f32 0.0, %v3752_v6 }
0x14ed   :  { %v3767_v55 = vsel %vm3757_vm15, %v3752_v6, %v3762_v56  ;;  %v4275_v6 = vld [vmem:[%s6464_s20] ss:$0 sm:$0xff] }
0x14ee   :  { %v3772_v5 = vadd.f32 1.0, %v3767_v55 }
0x14f0   :  { %v3777_v32 = vmul.f32 %v3772_v5, %v3582_v49 }
0x14f2   :  { %4151 = vmatmul.msk.f32.gmra.mxu3 %vm85_vm0, %v3777_v32 }
0x14f9   :  { %v3576_v12 = vpop.f32.mrf.mxu1 }
0x14fa   :  { %v3577_v11 = vadd.f32 %v6316_v17, %v3576_v12 }
0x14fc   :  { %v3588_v36 = vmul.f32 0.70710677, %v3577_v11  ;;  %v3583_v18 = vmul.f32 0.5, %v3577_v11 }
0x14fe   :  { %v3593_v50 = vand.u32 2147483647, %v3588_v36  ;;  %vm3758_vm9 = vcmp.ge.f32.partialorder %v3588_v36, 0.0 }
0x1500   :  { %v3598_v24 = vmul.f32 0.3275911, %v3593_v50  ;;  %v3728_v17 = vsub.f32 0.0, %v3593_v50 }
0x1502   :  { %v3603_v16 = vadd.f32 1.0, %v3598_v24  ;;  %v3733_v2 = vmul.f32 %v3728_v17, %v3593_v50 }
0x1504   :  { %4546 = vrcp.f32 %v3603_v16  ;;  %v3675_v57 = vand.u32 2147483648, %v3603_v16  ;;  %v3673_v34 = vand.u32 2147483647, %v3603_v16  ;;  %vm3669_vm6 = vweird.f32 %v3603_v16 }
0x1505   :  { %v3742_v41 = vmul.f32 1.442695, %v3733_v2 }
0x1506   :  { %v3676_v53 = vor.u32 1.1754944e-38, %v3675_v57  ;;  %vm3674_vm8 = vcmp.eq.f32.partialorder %v3673_v34, 8.507059e+37 }
0x1507   :  { %4548 = vpow2.f32 %v3742_v41 }
0x150a   :  { %v4547_v3 = vpop.eup %4546 }
0x150b   :  { %v3665_v26 = vmul.f32 %v4547_v3, %v3603_v16  ;;  %vm3670_vm3 = vweird.f32 %v4547_v3 }
0x150c   :  { %vm3671_vm7 = vmor %vm3669_vm6, %vm3670_vm3 }
0x150d   :  { %v3666_v63 = vsub.f32 1.0, %v3665_v26  ;;  %v4549_v1 = vpop.eup %4548 }
0x150f   :  { %v3667_v43 = vmul.f32 %v4547_v3, %v3666_v63 }
0x1511   :  { %v3668_v27 = vadd.f32 %v4547_v3, %v3667_v43 }
0x1513   :  { %v3672_v46 = vsel %vm3671_vm7, %v4547_v3, %v3668_v27 }
0x1514   :  { %v3677_v48 = vsel %vm3674_vm8, %v3676_v53, %v3672_v46 }
0x1515   :  { %v3683_v13 = vmul.f32 1.0614054, %v3677_v48 }
0x1517   :  { %v3688_v14 = vadd.f32 -1.4531521, %v3683_v13 }
0x1519   :  { %v3693_v23 = vmul.f32 %v3688_v14, %v3677_v48 }
0x151b   :  { %v3698_v30 = vadd.f32 1.4214138, %v3693_v23 }
0x151d   :  { %v3703_v9 = vmul.f32 %v3698_v30, %v3677_v48 }
0x151f   :  { %v3708_v7 = vadd.f32 -0.28449672, %v3703_v9  ;;  %v3850_v33 = vpop.xlane.xlu1 %3849 }
0x1520   :  { %v3851_v44 = vmul.f32 %v3850_v33, %v4782_v54 }
0x1521   :  { %v3713_v8 = vmul.f32 %v3708_v7, %v3677_v48 }
0x1522   :  { %v3852_v35 = vadd.f32 1e-05, %v3851_v44 }
0x1523   :  { %v3718_v59 = vadd.f32 0.2548296, %v3713_v8 }
0x1524   :  { %4550 = vrsqrt.f32 %v3852_v35  ;;  %vm3859_vm1 = vweird.f32 %v3852_v35 }
0x1525   :  { %v3723_v38 = vmul.f32 %v3718_v59, %v3677_v48 }
0x1527   :  { %v3748_v40 = vmul.f32 %v4549_v1, %v3723_v38 }
0x1529   :  { %v3753_v51 = vsub.f32 1.0, %v3748_v40 }
0x152a   :  { %v4551_v39 = vpop.eup %4550 }
0x152b   :  { %v3763_v28 = vsub.f32 0.0, %v3753_v51  ;;  %v3854_v42 = vmul.f32 %v4551_v39, %v3852_v35  ;;  %vm3860_vm10 = vweird.f32 %v4551_v39 }
0x152c   :  { %vm3861_vm12 = vmor %vm3859_vm1, %vm3860_vm10 }
0x152d   :  { %v3768_v47 = vsel %vm3758_vm9, %v3753_v51, %v3763_v28  ;;  %v3855_v20 = vmul.f32 %v4551_v39, %v3854_v42 }
0x152e   :  { %v3773_v15 = vadd.f32 1.0, %v3768_v47 }
0x152f   :  { %v3856_v31 = vmul.f32 0.5, %v3855_v20 }
0x1530   :  { %v3778_v25 = vmul.f32 %v3773_v15, %v3583_v18 }
0x1531   :  { %v3857_v4 = vsub.f32 1.5, %v3856_v31 }
0x1532   :  { %4152 = vmatmul.msk.f32.gmra.mxu3 %vm85_vm0, %v3778_v25  ;;  %vm3903_vm0 = vcmask 74752  }
0x1533   :  { %v3858_v54 = vmul.f32 %v4551_v39, %v3857_v4 }
0x1535   :  { %v3862_v37 = vsel %vm3861_vm12, %v4551_v39, %v3858_v54 }
0x1536   :  { %v3863_v61 = vmul.f32 %v3862_v37, %v6408_v21 }
0x1538   :  { %v3867_v19 = vmul.f32 %v4273_v29, %v3863_v61 }
0x153a   :  { %v3871_v60 = vadd.f32 %v4274_v58, %v3867_v19 }
0x153c   :  { %4153 = vmatmul.msk.f32.vlgmr.msra.gmra.mxu2 %vm170_vm2, %v3871_v60 }
0x1575   :  { %v3833_v10 = vpop.f32.mrf.mxu3 }
0x15b5   :  { %v3835_v62 = vpop.f32.mrf.mxu3 }
0x15bf   :  { %v3900_v56 = vpop.f32.mrf.mxu2 }
0x15c0   :  { %v3901_v55 = vadd.f32 %v4275_v6, %v3900_v56 }
0x15c2   :  { %3904 = vst.msk [vmem:[#allocation2] sm:$0x3] %vm3903_vm0, %v3901_v55 }
0x15c3   :  { %3915 = dma.vmem_to_hbm [thread:$0]  %s3911_s17, 32, %s3913_s9, [#allocation3]  }
0x15c4   :  { %4576 = dma.done.wait [#allocation3], 32  }
0x15c5   :  { %4577 = vsyncadd [#allocation3], 4294967264 }
0x15c6   :  { %3920 = vsyncpa [#allocation3], 1 }

</bundles_post_ra>
